<compile_context>
chip_gen: v5e
topology: v5e:2x2
jax: 0.10.0
libtpu: 0.0.40
codegen_flags: <defaults>
</compile_context>

<pallas_src>
import functools

import jax
import jax.numpy as jnp
from jax.experimental import pallas as pl
from jax.experimental.pallas import tpu as pltpu

BN_EPS = 1e-5  # PyTorch BatchNorm1d default eps
LANES = 128


def relative_loc_head_kernel(feat_u_ref, feat_r_ref,
                             w7_ref, b7_ref,
                             wc_ref, bc_ref,
                             out_ref):
    """Fused head for one batch tile.

    feat_*_ref : [TB, C, HW] bf16  (HW on lanes -> pool is an XLU lane reduce)
    w7         : [2C, D]     bf16  (BN already folded in)
    b7         : [1, D]      f32   (BN already folded in)
    wc         : [D, KP]     bf16  (KP = n_classes padded to 128 lanes)
    bc         : [1, KP]     f32
    out        : [TB, KP]    f32
    """
    hw = feat_u_ref.shape[-1]
    inv_hw = 1.0 / hw

    # AdaptiveAvgPool2d((1,1)): spatial mean over the lane axis; accumulate in
    # f32 even though the HBM stream is bf16.
    pooled_u = jnp.sum(feat_u_ref[...].astype(jnp.float32), axis=-1) * inv_hw  # [TB, C]
    pooled_r = jnp.sum(feat_r_ref[...].astype(jnp.float32), axis=-1) * inv_hw  # [TB, C]

    # torch.cat((u, r), dim=1) -> one [TB, 2C] operand, one MXU pass for fc7.
    cat = jnp.concatenate([pooled_u, pooled_r], axis=-1).astype(jnp.bfloat16)  # [TB, 2C]

    h = (jnp.dot(cat, w7_ref[...], preferred_element_type=jnp.float32)
         + b7_ref[...])                                                        # [TB, D] f32

    # ReLU (BatchNorm folded into w7/b7; Dropout is identity at inference).
    h = jnp.maximum(h, 0.0).astype(jnp.bfloat16)

    out = (jnp.dot(h, wc_ref[...], preferred_element_type=jnp.float32)
           + bc_ref[...])                                                      # [TB, KP]
    out_ref[...] = out.astype(out_ref.dtype)


@functools.partial(jax.jit, static_argnames=("tb",))
def relative_loc_forward(feat_uniform, feat_random, params, *, tb=128):
    """feat_* : [B, C, H, W] backbone feature maps (NCHW, like PyTorch)."""
    B, C, H, W = feat_uniform.shape
    HW = H * W
    two_c, out_dim = params["w7"].shape
    n_classes = params["wc"].shape[1]

    # --- layout: NCHW -> [B, C, HW] is a pure (contiguous) reshape: no extra
    # HBM transpose pass. Stream features as bf16 (no-op if already bf16).
    fu = feat_uniform.reshape(B, C, HW).astype(jnp.bfloat16)
    fr = feat_random.reshape(B, C, HW).astype(jnp.bfloat16)

    # --- fold eval-mode BatchNorm1d into fc7 (in f32), then bf16 weights ------
    scale = params["gamma"] * jax.lax.rsqrt(params["rvar"] + BN_EPS)           # [1, D]
    w7 = (params["w7"].astype(jnp.float32) * scale).astype(jnp.bfloat16)       # [2C, D]
    b7 = ((params["b7"] - params["rmean"]) * scale + params["beta"]
          ).astype(jnp.float32)                                                # [1, D]

    # --- pad classifier output to a lane-dense 128-wide slab ------------------
    kp = -(-n_classes // LANES) * LANES
    wc = jnp.zeros((out_dim, kp), jnp.bfloat16)
    wc = wc.at[:, :n_classes].set(params["wc"].astype(jnp.bfloat16))
    bc = jnp.zeros((1, kp), jnp.float32)
    bc = bc.at[:, :n_classes].set(params["bc"].astype(jnp.float32))

    # --- batch tile: large (amortize ~0.35us/step, dense MXU rows), but keep
    # >= 2 grid steps when possible (v7x megacore) and within 56 MiB VMEM ------
    bp8 = -(-B // 8) * 8
    tb_eff = min(tb, bp8)
    if bp8 // tb_eff < 2 and bp8 >= 16:
        tb_eff = -(-(bp8 // 2) // 8) * 8       # halve the tile, keep 8-multiple
    bp = -(-bp8 // tb_eff) * tb_eff
    if bp != B:
        pad = ((0, bp - B), (0, 0), (0, 0))
        fu = jnp.pad(fu, pad)
        fr = jnp.pad(fr, pad)

    grid = (bp // tb_eff,)
    feat_spec = pl.BlockSpec((tb_eff, C, HW), lambda i: (i, 0, 0))

    def resident(shape):
        # Constant-index weights: fetched once, stay in VMEM; single-buffered
        # (no point double-buffering a block that never changes).
        return pl.BlockSpec(shape, lambda i: (0,) * len(shape),
                            pipeline_mode=pl.Buffered(1))

    # Memory-bound custom call: tell XLA so surrounding ops overlap better.
    cost = pl.CostEstimate(
        flops=int(2 * bp * two_c * out_dim        # fc7 matmul
                  + 2 * bp * out_dim * kp         # fc_cls matmul
                  + 2 * bp * two_c * HW),         # pooling adds
        transcendentals=0,
        bytes_accessed=int(2 * bp * C * HW * 2    # both bf16 feature streams
                           + (w7.size + wc.size) * 2
                           + (b7.size + bc.size) * 4
                           + bp * kp * 4),
    )

    out = pl.pallas_call(
        relative_loc_head_kernel,
        out_shape=jax.ShapeDtypeStruct((bp, kp), jnp.float32),
        grid=grid,
        in_specs=[
            feat_spec, feat_spec,
            resident((two_c, out_dim)), resident((1, out_dim)),
            resident((out_dim, kp)), resident((1, kp)),
        ],
        out_specs=pl.BlockSpec((tb_eff, kp), lambda i: (i, 0)),
        compiler_params=pltpu.CompilerParams(
            dimension_semantics=("parallel",),      # megacore-shardable batch axis
            vmem_limit_bytes=56 * 1024 * 1024,      # fits v7x 64 MiB; v5e/v6e could
                                                    # go ~96-100 MiB for even larger tb
        ),
        cost_estimate=cost,
    )(fu, fr, w7, b7, wc, bc)

    return out[:B, :n_classes]


def reference_forward(feat_uniform, feat_random, params):
    """Pure-JAX f32 reference matching the PyTorch forward (eval mode)."""
    fu = feat_uniform.astype(jnp.float32)
    fr = feat_random.astype(jnp.float32)
    pu = jnp.mean(fu, axis=(2, 3))                 # [B, C]
    pr = jnp.mean(fr, axis=(2, 3))                 # [B, C]
    cat = jnp.concatenate([pu, pr], axis=1)        # [B, 2C]
    h = cat @ params["w7"] + params["b7"]
    h = (h - params["rmean"]) * jax.lax.rsqrt(params["rvar"] + BN_EPS) \
        * params["gamma"] + params["beta"]
    h = jnp.maximum(h, 0.0)
    return h @ params["wc"] + params["bc"]


def init_params(key, in_dim, out_dim, n_classes):
    k1, k2, k3, k4 = jax.random.split(key, 4)
    w7 = jax.random.normal(k1, (2 * in_dim, out_dim), jnp.float32) * 0.02
    b7 = jax.random.normal(k2, (1, out_dim), jnp.float32) * 0.01
    wc = jax.random.normal(k3, (out_dim, n_classes), jnp.float32) * 0.02
    bc = jax.random.normal(k4, (1, n_classes), jnp.float32) * 0.01
    return dict(
        w7=w7, b7=b7,
        gamma=jnp.ones((1, out_dim), jnp.float32),
        beta=jnp.zeros((1, out_dim), jnp.float32),
        rmean=jnp.zeros((1, out_dim), jnp.float32),
        rvar=jnp.ones((1, out_dim), jnp.float32),
        wc=wc, bc=bc,
    )


if __name__ == "__main__":
    # Small shapes consistent with the module (real: C=512, HW=49, D=4096, K=8).
    # B=12 exercises batch padding and a grid of >= 2 steps (megacore path).
    B, C, H, W = 12, 128, 8, 8
    OUT_DIM, N_CLASSES = 256, 8

    key = jax.random.PRNGKey(0)
    kf1, kf2, kparam = jax.random.split(key, 3)
    # Backbone feature maps; cast to bf16 once up-front, as if the backbone
    # emitted bf16 (the kernel streams them as-is — no extra wrapper pass).
    feat_uniform = jax.random.normal(kf1, (B, C, H, W), jnp.float32).astype(jnp.bfloat16)
    feat_random = jax.random.normal(kf2, (B, C, H, W), jnp.float32).astype(jnp.bfloat16)
    params = init_params(kparam, C, OUT_DIM, N_CLASSES)

    out = relative_loc_forward(feat_uniform, feat_random, params, tb=128)
    out = jax.block_until_ready(out)

    ref = reference_forward(feat_uniform, feat_random, params)
    assert out.shape == (B, N_CLASSES), out.shape
    # bf16 weights + bf16 matmul activations -> loosened tolerance vs f32 ref.
    assert jnp.allclose(out, ref, atol=3e-3, rtol=3e-2), (
        "mismatch vs reference: max abs err = %e"
        % float(jnp.max(jnp.abs(out - ref))))

    print("KERNEL_OK")
</pallas_src>

<mosaic_0001>
module attributes {stable_mosaic.version = 11 : i64} {
  func.func @relative_loc_head_kernel(%arg0: i32, %arg1: memref<8x128x64xbf16, #tpu.memory_space<vmem>>, %arg2: memref<8x128x64xbf16, #tpu.memory_space<vmem>>, %arg3: memref<256x256xbf16, #tpu.memory_space<vmem>>, %arg4: memref<1x256xf32, #tpu.memory_space<vmem>>, %arg5: memref<256x128xbf16, #tpu.memory_space<vmem>>, %arg6: memref<1x128xf32, #tpu.memory_space<vmem>>, %arg7: memref<8x128xf32, #tpu.memory_space<vmem>>) attributes {dimension_semantics = [#tpu.dimension_semantics<parallel>], iteration_bounds = array<i64: 2>, scalar_prefetch = 0 : i64, scratch_operands = 0 : i64, tpu.core_type = #tpu.core_type<tc>, window_params = [{transform_indices = @transform_0, window_bounds = array<i64: 8, 128, 64>}, {transform_indices = @transform_1, window_bounds = array<i64: 8, 128, 64>}, {pipeline_mode = #tpu.pipeline_mode<synchronous>, transform_indices = @transform_2, window_bounds = array<i64: 256, 256>}, {pipeline_mode = #tpu.pipeline_mode<synchronous>, transform_indices = @transform_3, window_bounds = array<i64: 1, 256>}, {pipeline_mode = #tpu.pipeline_mode<synchronous>, transform_indices = @transform_4, window_bounds = array<i64: 256, 128>}, {pipeline_mode = #tpu.pipeline_mode<synchronous>, transform_indices = @transform_5, window_bounds = array<i64: 1, 128>}, {transform_indices = @transform_6, window_bounds = array<i64: 8, 128>}]} {
    %c0 = arith.constant 0 : index
    %c0_0 = arith.constant 0 : index
    %c0_1 = arith.constant 0 : index
    %0 = vector.load %arg1[%c0, %c0_0, %c0_1] : memref<8x128x64xbf16, #tpu.memory_space<vmem>>, vector<8x128x64xbf16>
    %1 = arith.extf %0 : vector<8x128x64xbf16> to vector<8x128x64xf32>
    %cst = arith.constant dense<0.000000e+00> : vector<8x128xf32>
    %2 = vector.multi_reduction <add>, %1, %cst [2] : vector<8x128x64xf32> to vector<8x128xf32>
    %cst_2 = arith.constant 1.562500e-02 : f32
    %3 = vector.broadcast %cst_2 : f32 to vector<8x128xf32>
    %4 = arith.mulf %2, %3 : vector<8x128xf32>
    %c0_3 = arith.constant 0 : index
    %c0_4 = arith.constant 0 : index
    %c0_5 = arith.constant 0 : index
    %5 = vector.load %arg2[%c0_3, %c0_4, %c0_5] : memref<8x128x64xbf16, #tpu.memory_space<vmem>>, vector<8x128x64xbf16>
    %6 = arith.extf %5 : vector<8x128x64xbf16> to vector<8x128x64xf32>
    %cst_6 = arith.constant dense<0.000000e+00> : vector<8x128xf32>
    %7 = vector.multi_reduction <add>, %6, %cst_6 [2] : vector<8x128x64xf32> to vector<8x128xf32>
    %cst_7 = arith.constant 1.562500e-02 : f32
    %8 = vector.broadcast %cst_7 : f32 to vector<8x128xf32>
    %9 = arith.mulf %7, %8 : vector<8x128xf32>
    %10 = tpu.concatenate %4, %9 in 1 : vector<8x128xf32>, vector<8x128xf32> -> vector<8x256xf32>
    %11 = arith.truncf %10 : vector<8x256xf32> to vector<8x256xbf16>
    %c0_8 = arith.constant 0 : index
    %c0_9 = arith.constant 0 : index
    %12 = vector.load %arg3[%c0_8, %c0_9] : memref<256x256xbf16, #tpu.memory_space<vmem>>, vector<256x256xbf16>
    %cst_10 = arith.constant dense<0.000000e+00> : vector<8x256xf32>
    %13 = tpu.matmul %11, %12, %cst_10 {dimension_numbers = #tpu.dot_dimension_numbers<[1], [0], [0], [1], [0, 0, 1, 1], [], []>} : vector<8x256xbf16>, vector<256x256xbf16>, vector<8x256xf32> -> vector<8x256xf32>
    %c0_11 = arith.constant 0 : index
    %c0_12 = arith.constant 0 : index
    %14 = vector.load %arg4[%c0_11, %c0_12] : memref<1x256xf32, #tpu.memory_space<vmem>>, vector<1x256xf32>
    %15 = vector.broadcast %14 : vector<1x256xf32> to vector<8x256xf32>
    %16 = arith.addf %13, %15 : vector<8x256xf32>
    %cst_13 = arith.constant 0.000000e+00 : f32
    %17 = vector.broadcast %cst_13 : f32 to vector<8x256xf32>
    %18 = arith.maximumf %16, %17 : vector<8x256xf32>
    %19 = arith.truncf %18 : vector<8x256xf32> to vector<8x256xbf16>
    %c0_14 = arith.constant 0 : index
    %c0_15 = arith.constant 0 : index
    %20 = vector.load %arg5[%c0_14, %c0_15] : memref<256x128xbf16, #tpu.memory_space<vmem>>, vector<256x128xbf16>
    %cst_16 = arith.constant dense<0.000000e+00> : vector<8x128xf32>
    %21 = tpu.matmul %19, %20, %cst_16 {dimension_numbers = #tpu.dot_dimension_numbers<[1], [0], [0], [1], [0, 0, 1, 1], [], []>} : vector<8x256xbf16>, vector<256x128xbf16>, vector<8x128xf32> -> vector<8x128xf32>
    %c0_17 = arith.constant 0 : index
    %c0_18 = arith.constant 0 : index
    %22 = vector.load %arg6[%c0_17, %c0_18] : memref<1x128xf32, #tpu.memory_space<vmem>>, vector<1x128xf32>
    %23 = vector.broadcast %22 : vector<1x128xf32> to vector<8x128xf32>
    %24 = arith.addf %21, %23 : vector<8x128xf32>
    %c0_19 = arith.constant 0 : index
    %c0_20 = arith.constant 0 : index
    %25 = vector.load %arg7[%c0_19, %c0_20] : memref<8x128xf32, #tpu.memory_space<vmem>>, vector<8x128xf32>
    tpu.vector_store %arg7[%c0_19, %c0_20], %24 {strides = array<i32>} : memref<8x128xf32, #tpu.memory_space<vmem>>, vector<8x128xf32>,
    return
  }
  func.func @transform_0(%arg0: i32) -> (i32, i32, i32) {
    %c0_i32 = arith.constant 0 : i32
    %c0_i32_0 = arith.constant 0 : i32
    %c0_i32_1 = arith.constant 0 : i32
    return %arg0, %c0_i32, %c0_i32_0 : i32, i32, i32
  }
  func.func @transform_1(%arg0: i32) -> (i32, i32, i32) {
    %c0_i32 = arith.constant 0 : i32
    %c0_i32_0 = arith.constant 0 : i32
    %c0_i32_1 = arith.constant 0 : i32
    return %arg0, %c0_i32, %c0_i32_0 : i32, i32, i32
  }
  func.func @transform_2(%arg0: i32) -> (i32, i32) {
    %c0_i32 = arith.constant 0 : i32
    %c0_i32_0 = arith.constant 0 : i32
    %c0_i32_1 = arith.constant 0 : i32
    return %c0_i32, %c0_i32_0 : i32, i32
  }
  func.func @transform_3(%arg0: i32) -> (i32, i32) {
    %c0_i32 = arith.constant 0 : i32
    %c0_i32_0 = arith.constant 0 : i32
    %c0_i32_1 = arith.constant 0 : i32
    return %c0_i32, %c0_i32_0 : i32, i32
  }
  func.func @transform_4(%arg0: i32) -> (i32, i32) {
    %c0_i32 = arith.constant 0 : i32
    %c0_i32_0 = arith.constant 0 : i32
    %c0_i32_1 = arith.constant 0 : i32
    return %c0_i32, %c0_i32_0 : i32, i32
  }
  func.func @transform_5(%arg0: i32) -> (i32, i32) {
    %c0_i32 = arith.constant 0 : i32
    %c0_i32_0 = arith.constant 0 : i32
    %c0_i32_1 = arith.constant 0 : i32
    return %c0_i32, %c0_i32_0 : i32, i32
  }
  func.func @transform_6(%arg0: i32) -> (i32, i32) {
    %c0_i32 = arith.constant 0 : i32
    %c0_i32_0 = arith.constant 0 : i32
    return %arg0, %c0_i32 : i32, i32
  }
}

</mosaic_0001>

<bundles_post_ra>
// kernel: relative_loc_forward.1
= control target key start
LH: loop header
LB: loop body
LE: loop exit
PB: predicated region body
PF: predicated region fallthrough
CT: control target
= control target key end

     0   :  { %s4051_s21 = smov 0   ;;  %s5921_s0 = inlined_call_operand.vmem [shape: bf16[16,128,64], index: 0, kind: input, shape index: {}]   ;;  %s5922_s1 = inlined_call_operand.vmem [shape: bf16[16,128,64], index: 1, kind: input, shape index: {}]   ;;  %s5923_s2 = inlined_call_operand.vmem [shape: bf16[256,256], index: 2, kind: input, shape index: {}]   ;;  %s5924_s3 = inlined_call_operand.vmem [shape: f32[1,256], index: 3, kind: input, shape index: {}]   ;;  %s5925_s4 = inlined_call_operand.vmem [shape: bf16[256,128], index: 4, kind: input, shape index: {}]   ;;  %s5926_s5 = inlined_call_operand.vmem [shape: f32[1,128], index: 5, kind: input, shape index: {}]   ;;  %s5927_s6 = inlined_call_operand.vmem [shape: f32[16,128], index: 6, kind: output, shape index: {}]  }
   0x1 LB: > { %s4057_s22 = sadd.s32 4294967295, %s4014_s21   ;;  %p3108_p0 = scmp.ge.s32.totalorder %s4014_s21, 1  ;;  %s4014_s21 = sphi %s4051_s21, %s16_s21  }
   0x2   : > { %p226_p1 = scmp.lt.s32.totalorder %s4014_s21, 3 }
   0x4   : > { %p227_p2 = pnand %p3108_p0, %p226_p1 }
   0x6   : > { %230 = sbr.rel (%p227_p2) target bundleno = 1098 (0x44a), region = 44 }
   0xb   : > { %s3109_s23 = sshll.u32 %s4057_s22, 3  ;;  %vm536_vm0 = vcmask 523264   ;;  %vm1950_vm1 = vcmask 130112   ;;  %vm1954_vm2 = vcmask 195712   ;;  %vm1958_vm3 = vcmask 261312   ;;  %p276_p4 = scmp.lt.s32.totalorder %s4057_s22, 1 }
   0xc   : > { %p263_p3 = scmp.lt.s32.totalorder %s3109_s23, 15  ;;  %vm5930_vm4 = vcmask 326912   ;;  %vm1966_vm5 = vcmask 392512   ;;  %vm1970_vm6 = vcmask 458112   ;;  %vm1974_vm7 = vcmask 523712  }
   0xd   : > { %vm1978_vm8 = vcmask 589312   ;;  %vm1982_vm9 = vcmask 654912   ;;  %vm5928_vm10 = vcmask 720512   ;;  %vm5933_vm11 = vcmask 786112   ;;  %s6103_s22 = smov (!%p276_p4, %s4057_s22), 1 }
   0xe   : > { %s6101_s23 = smov (!%p263_p3, %s3109_s23), 15  ;;  %vm5934_vm12 = vcmask 851712   ;;  %vm1998_vm13 = vcmask 917312   ;;  %vm5929_vm14 = vcmask 982912   ;;  %vm2006_vm15 = vcmask 1048512   ;;  %s3115_s19 = sshll.u32 %s6103_s22, 3 }
   0xf   : > { %s3310_s24 = sshll.u32 %s6101_s23, 6 }
  0x10   : > { %s4070_s27 = scalar_lea.vmem %s5921_s0, %s3310_s24  ;;  %s4429_s30 = scalar_lea.vmem %s5922_s1, %s3310_s24 }
  0x11   : > { %v3873_v0 = vld [vmem:[%s4070_s27 + $0x10] sm:$0xff]   ;;  %v3872_v1 = vld [vmem:[%s4070_s27 + $0x8] sm:$0xff]   ;;  %v3361_v2 = vld [vmem:[%s4070_s27] sm:$0xff]   ;;  %s279_s24 = scalar_lea.vmem %s5927_s6, %s3115_s19 }
  0x12   : > { %v3370_v3 = vunpack.c.l.bf16 %v3873_v0  ;;  %v3366_v4 = vunpack.c.l.bf16 %v3872_v1  ;;  %v3362_v5 = vunpack.c.l.bf16 %v3361_v2  ;;  %v3371_v9 = vunpack.c.h.bf16 %v3873_v0  ;;  %v3875_v15 = vld [vmem:[%s4070_s27 + $0x20] sm:$0xff]   ;;  %v3874_v16 = vld [vmem:[%s4070_s27 + $0x18] sm:$0xff]   ;;  %v3876_v23 = vld [vmem:[%s4070_s27 + $0x28] sm:$0xff]  }
  0x13   : > { %v3367_v10 = vunpack.c.h.bf16 %v3872_v1  ;;  %v3363_v11 = vunpack.c.h.bf16 %v3361_v2  ;;  %v3378_v17 = vunpack.c.l.bf16 %v3875_v15  ;;  %v3375_v18 = vunpack.c.h.bf16 %v3874_v16  ;;  %v3878_v30 = vld [vmem:[%s4070_s27 + $0x38] sm:$0xff]   ;;  %v3877_v31 = vld [vmem:[%s4070_s27 + $0x30] sm:$0xff]   ;;  %v3879_v38 = vld [vmem:[%s4070_s27 + $0x40] sm:$0xff]  }
  0x14   : > { %v549_v6 = vsel %vm536_vm0, %v3370_v3, 0.0  ;;  %v543_v7 = vsel %vm536_vm0, %v3366_v4, 0.0  ;;  %v537_v8 = vsel %vm536_vm0, %v3362_v5, 0.0  ;;  %v552_v12 = vsel %vm536_vm0, %v3371_v9, 0.0  ;;  %v3881_v45 = vld [vmem:[%s4070_s27 + $0x50] sm:$0xff]   ;;  %v3880_v46 = vld [vmem:[%s4070_s27 + $0x48] sm:$0xff]  }
  0x15   : > { %550 = vadd.xlane.f32.xlu2 %v549_v6  ;;  %544 = vadd.xlane.f32.xlu1 %v543_v7  ;;  %v546_v13 = vsel %vm536_vm0, %v3367_v10, 0.0  ;;  %v540_v14 = vsel %vm536_vm0, %v3363_v11, 0.0  ;;  %v3374_v19 = vunpack.c.l.bf16 %v3874_v16  ;;  %v561_v20 = vsel %vm536_vm0, %v3378_v17, 0.0  ;;  %v3882_v53 = vld [vmem:[%s4070_s27 + $0x58] sm:$0xff]   ;;  %v3884_v60 = vld [vmem:[%s4070_s27 + $0x68] sm:$0xff]   ;;  %v3883_v61 = vld [vmem:[%s4070_s27 + $0x60] sm:$0xff]  }
  0x16   : > { %538 = vadd.xlane.f32.xlu0 %v537_v8  ;;  %v558_v21 = vsel %vm536_vm0, %v3375_v18, 0.0  ;;  %v3383_v24 = vunpack.c.h.bf16 %v3876_v23  ;;  %v3382_v25 = vunpack.c.l.bf16 %v3876_v23  ;;  %v3379_v26 = vunpack.c.h.bf16 %v3875_v15  ;;  %v3885_v4 = vld [vmem:[%s4070_s27 + $0x70] sm:$0xff]   ;;  %v3887_v11 = vld [vmem:[%s4070_s27 + $0x80] sm:$0xff]  }
  0x17   : > { %v555_v22 = vsel %vm536_vm0, %v3374_v19, 0.0  ;;  %v3390_v32 = vunpack.c.l.bf16 %v3878_v30  ;;  %v3387_v33 = vunpack.c.h.bf16 %v3877_v31  ;;  %v3386_v34 = vunpack.c.l.bf16 %v3877_v31  ;;  %v3888_v19 = vld [vmem:[%s4070_s27 + $0x88] sm:$0xff]  }
  0x18   : > { %v570_v27 = vsel %vm536_vm0, %v3383_v24, 0.0  ;;  %v567_v28 = vsel %vm536_vm0, %v3382_v25, 0.0  ;;  %v564_v29 = vsel %vm536_vm0, %v3379_v26, 0.0  ;;  %v3395_v39 = vunpack.c.h.bf16 %v3879_v38  ;;  %v3890_v26 = vld [vmem:[%s4070_s27 + $0x98] sm:$0xff]  }
  0x19   : > { %v579_v35 = vsel %vm536_vm0, %v3390_v32, 0.0  ;;  %v576_v36 = vsel %vm536_vm0, %v3387_v33, 0.0  ;;  %v573_v37 = vsel %vm536_vm0, %v3386_v34, 0.0  ;;  %v3394_v40 = vunpack.c.l.bf16 %v3879_v38  ;;  %v3891_v34 = vld [vmem:[%s4070_s27 + $0xa0] sm:$0xff]  }
  0x1a   : > { %v3391_v41 = vunpack.c.h.bf16 %v3878_v30  ;;  %v588_v42 = vsel %vm536_vm0, %v3395_v39, 0.0  ;;  %v3402_v47 = vunpack.c.l.bf16 %v3881_v45  ;;  %v3399_v48 = vunpack.c.h.bf16 %v3880_v46 }
  0x1b   : > { %v585_v43 = vsel %vm536_vm0, %v3394_v40, 0.0  ;;  %v3398_v49 = vunpack.c.l.bf16 %v3880_v46  ;;  %v3407_v54 = vunpack.c.h.bf16 %v3882_v53  ;;  %v3406_v55 = vunpack.c.l.bf16 %v3882_v53 }
  0x1c   : > { %v582_v44 = vsel %vm536_vm0, %v3391_v41, 0.0  ;;  %v597_v50 = vsel %vm536_vm0, %v3402_v47, 0.0  ;;  %v594_v51 = vsel %vm536_vm0, %v3399_v48, 0.0  ;;  %v3403_v56 = vunpack.c.h.bf16 %v3881_v45  ;;  %v3893_v41 = vld [vmem:[%s4070_s27 + $0xb0] sm:$0xff]  }
  0x1d   : > { %553 = vadd.xlane.f32.xlu2 %v552_v12  ;;  %547 = vadd.xlane.f32.xlu1 %v546_v13  ;;  %v591_v52 = vsel %vm536_vm0, %v3398_v49, 0.0  ;;  %v606_v57 = vsel %vm536_vm0, %v3407_v54, 0.0  ;;  %v603_v58 = vsel %vm536_vm0, %v3406_v55, 0.0  ;;  %v3414_v62 = vunpack.c.l.bf16 %v3884_v60  ;;  %v3886_v12 = vld [vmem:[%s4070_s27 + $0x78] sm:$0xff]  }
  0x1e   : > { %541 = vadd.xlane.f32.xlu0 %v540_v14  ;;  %v600_v59 = vsel %vm536_vm0, %v3403_v56, 0.0  ;;  %v3411_v63 = vunpack.c.h.bf16 %v3883_v61  ;;  %v3410_v0 = vunpack.c.l.bf16 %v3883_v61  ;;  %v3419_v5 = vunpack.c.h.bf16 %v3885_v4  ;;  %v3894_v49 = vld [vmem:[%s4070_s27 + $0xb8] sm:$0xff]  }
  0x1f   : > { %v615_v1 = vsel %vm536_vm0, %v3414_v62, 0.0  ;;  %v3418_v6 = vunpack.c.l.bf16 %v3885_v4  ;;  %v3415_v7 = vunpack.c.h.bf16 %v3884_v60  ;;  %v3426_v13 = vunpack.c.l.bf16 %v3887_v11  ;;  %v3895_v60 = vld [vmem:[%s4070_s27 + $0xc0] sm:$0xff]  }
  0x20   : > { %v612_v2 = vsel %vm536_vm0, %v3411_v63, 0.0  ;;  %v609_v3 = vsel %vm536_vm0, %v3410_v0, 0.0  ;;  %v624_v8 = vsel %vm536_vm0, %v3419_v5, 0.0  ;;  %v3423_v14 = vunpack.c.h.bf16 %v3886_v12 }
  0x21   : > { %v621_v9 = vsel %vm536_vm0, %v3418_v6, 0.0  ;;  %v618_v10 = vsel %vm536_vm0, %v3415_v7, 0.0  ;;  %v3422_v15 = vunpack.c.l.bf16 %v3886_v12  ;;  %v633_v16 = vsel %vm536_vm0, %v3426_v13, 0.0  ;;  %v3897_v6 = vld [vmem:[%s4070_s27 + $0xd0] sm:$0xff]  }
  0x22   : > { %v630_v17 = vsel %vm536_vm0, %v3423_v14, 0.0  ;;  %v3459_v62 = vunpack.c.h.bf16 %v3895_v60  ;;  %v3458_v63 = vunpack.c.l.bf16 %v3895_v60  ;;  %v3467_v7 = vunpack.c.h.bf16 %v3897_v6 }
  0x23   : > { %v627_v18 = vsel %vm536_vm0, %v3422_v15, 0.0 }
  0x24   : > { %v684_v4 = vsel %vm536_vm0, %v3459_v62, 0.0  ;;  %v681_v5 = vsel %vm536_vm0, %v3458_v63, 0.0  ;;  %v696_v13 = vsel %vm536_vm0, %v3467_v7, 0.0  ;;  %v3904_v62 = vld [vmem:[%s4070_s27 + $0x108] sm:$0xff]  }
  0x25   : > { %562 = vadd.xlane.f32.xlu2 %v561_v20  ;;  %559 = vadd.xlane.f32.xlu1 %v558_v21  ;;  %v3431_v20 = vunpack.c.h.bf16 %v3888_v19  ;;  %v3430_v21 = vunpack.c.l.bf16 %v3888_v19 }
  0x26   : > { %556 = vadd.xlane.f32.xlu0 %v555_v22  ;;  %v3427_v22 = vunpack.c.h.bf16 %v3887_v11 }
  0x27   : > { %v642_v23 = vsel %vm536_vm0, %v3431_v20, 0.0  ;;  %v639_v24 = vsel %vm536_vm0, %v3430_v21, 0.0 }
  0x28   : > { %v636_v25 = vsel %vm536_vm0, %v3427_v22, 0.0 }
  0x2d   : > { %571 = vadd.xlane.f32.xlu2 %v570_v27  ;;  %568 = vadd.xlane.f32.xlu1 %v567_v28  ;;  %v3889_v27 = vld [vmem:[%s4070_s27 + $0x90] sm:$0xff]   ;;  %v3438_v28 = vunpack.c.l.bf16 %v3890_v26 }
  0x2e   : > { %565 = vadd.xlane.f32.xlu0 %v564_v29  ;;  %v3435_v29 = vunpack.c.h.bf16 %v3889_v27  ;;  %v3434_v30 = vunpack.c.l.bf16 %v3889_v27  ;;  %v3900_v27 = vld [vmem:[%s4070_s27 + $0xe8] sm:$0xff]  }
  0x2f   : > { %v651_v31 = vsel %vm536_vm0, %v3438_v28, 0.0  ;;  %v3479_v28 = vunpack.c.h.bf16 %v3900_v27 }
  0x30   : > { %v648_v32 = vsel %vm536_vm0, %v3435_v29, 0.0  ;;  %v645_v33 = vsel %vm536_vm0, %v3434_v30, 0.0  ;;  %v3478_v29 = vunpack.c.l.bf16 %v3900_v27  ;;  %v3908_v27 = vld [vmem:[%s4070_s27 + $0x128] sm:$0xff]  }
  0x35   : > { %580 = vadd.xlane.f32.xlu2 %v579_v35  ;;  %577 = vadd.xlane.f32.xlu1 %v576_v36  ;;  %v3443_v35 = vunpack.c.h.bf16 %v3891_v34  ;;  %v3442_v36 = vunpack.c.l.bf16 %v3891_v34  ;;  %v714_v34 = vsel %vm536_vm0, %v3479_v28, 0.0  ;;  %v3907_v28 = vld [vmem:[%s4070_s27 + $0x120] sm:$0xff]  }
  0x36   : > { %574 = vadd.xlane.f32.xlu0 %v573_v37  ;;  %v3439_v37 = vunpack.c.h.bf16 %v3890_v26 }
  0x37   : > { %v660_v38 = vsel %vm536_vm0, %v3443_v35, 0.0  ;;  %v657_v39 = vsel %vm536_vm0, %v3442_v36, 0.0  ;;  %v711_v35 = vsel %vm536_vm0, %v3478_v29, 0.0  ;;  %v3510_v29 = vunpack.c.l.bf16 %v3908_v27 }
  0x38   : > { %v654_v40 = vsel %vm536_vm0, %v3439_v37, 0.0  ;;  %v3902_v37 = vld [vmem:[%s4070_s27 + $0xf8] sm:$0xff]  }
  0x3d   : > { %589 = vadd.xlane.f32.xlu2 %v588_v42  ;;  %586 = vadd.xlane.f32.xlu1 %v585_v43  ;;  %v3892_v42 = vld [vmem:[%s4070_s27 + $0xa8] sm:$0xff]   ;;  %v3450_v43 = vunpack.c.l.bf16 %v3893_v41 }
  0x3e   : > { %583 = vadd.xlane.f32.xlu0 %v582_v44  ;;  %v3447_v44 = vunpack.c.h.bf16 %v3892_v42  ;;  %v3446_v45 = vunpack.c.l.bf16 %v3892_v42 }
  0x3f   : > { %v669_v46 = vsel %vm536_vm0, %v3450_v43, 0.0 }
  0x40   : > { %v666_v47 = vsel %vm536_vm0, %v3447_v44, 0.0  ;;  %v663_v48 = vsel %vm536_vm0, %v3446_v45, 0.0 }
  0x45   : > { %598 = vadd.xlane.f32.xlu2 %v597_v50  ;;  %595 = vadd.xlane.f32.xlu1 %v594_v51  ;;  %v3455_v50 = vunpack.c.h.bf16 %v3894_v49  ;;  %v3454_v51 = vunpack.c.l.bf16 %v3894_v49 }
  0x46   : > { %592 = vadd.xlane.f32.xlu0 %v591_v52  ;;  %v3451_v52 = vunpack.c.h.bf16 %v3893_v41 }
  0x47   : > { %v678_v56 = vsel %vm536_vm0, %v3455_v50, 0.0 }
  0x4d   : > { %607 = vadd.xlane.f32.xlu2 %v606_v57  ;;  %604 = vadd.xlane.f32.xlu1 %v603_v58  ;;  %v675_v57 = vsel %vm536_vm0, %v3454_v51, 0.0  ;;  %v672_v58 = vsel %vm536_vm0, %v3451_v52, 0.0  ;;  %v3487_v51 = vunpack.c.h.bf16 %v3902_v37 }
  0x4e   : > { %601 = vadd.xlane.f32.xlu0 %v600_v59  ;;  %v3896_v59 = vld [vmem:[%s4070_s27 + $0xc8] sm:$0xff]  }
  0x4f   : > { %v3462_v61 = vunpack.c.l.bf16 %v3896_v59  ;;  %v726_v60 = vsel %vm536_vm0, %v3487_v51, 0.0 }
  0x55   : > { %616 = vadd.xlane.f32.xlu2 %v615_v1  ;;  %613 = vadd.xlane.f32.xlu1 %v612_v2 }
  0x56   : > { %610 = vadd.xlane.f32.xlu0 %v609_v3  ;;  %v687_v3 = vsel %vm536_vm0, %v3462_v61, 0.0  ;;  %v3905_v61 = vld [vmem:[%s4070_s27 + $0x110] sm:$0xff]  }
  0x57   : > { %v3498_v63 = vunpack.c.l.bf16 %v3905_v61 }
  0x5d   : > { %625 = vadd.xlane.f32.xlu2 %v624_v8  ;;  %622 = vadd.xlane.f32.xlu1 %v621_v9  ;;  %v3466_v8 = vunpack.c.l.bf16 %v3897_v6  ;;  %v3463_v9 = vunpack.c.h.bf16 %v3896_v59 }
  0x5e   : > { %619 = vadd.xlane.f32.xlu0 %v618_v10 }
  0x5f   : > { %v693_v14 = vsel %vm536_vm0, %v3466_v8, 0.0  ;;  %v690_v15 = vsel %vm536_vm0, %v3463_v9, 0.0  ;;  %v741_v8 = vsel %vm536_vm0, %v3498_v63, 0.0 }
  0x65   : > { %634 = vadd.xlane.f32.xlu2 %v633_v16  ;;  %631 = vadd.xlane.f32.xlu1 %v630_v17  ;;  %v3899_v16 = vld [vmem:[%s4070_s27 + $0xe0] sm:$0xff]   ;;  %v3898_v17 = vld [vmem:[%s4070_s27 + $0xd8] sm:$0xff]  }
  0x66   : > { %628 = vadd.xlane.f32.xlu0 %v627_v18  ;;  %v3474_v18 = vunpack.c.l.bf16 %v3899_v16  ;;  %v3471_v19 = vunpack.c.h.bf16 %v3898_v17  ;;  %v3470_v20 = vunpack.c.l.bf16 %v3898_v17  ;;  %v3475_v30 = vunpack.c.h.bf16 %v3899_v16 }
  0x67   : > { %v3499_v17 = vunpack.c.h.bf16 %v3905_v61  ;;  %v3910_v61 = vld [vmem:[%s4070_s27 + $0x138] sm:$0xff]  }
  0x68   : > { %v699_v26 = vsel %vm536_vm0, %v3470_v20, 0.0  ;;  %v708_v36 = vsel %vm536_vm0, %v3475_v30, 0.0  ;;  %v3507_v30 = vunpack.c.h.bf16 %v3907_v28  ;;  %v3519_v63 = vunpack.c.h.bf16 %v3910_v61 }
  0x6d   : > { %643 = vadd.xlane.f32.xlu2 %v642_v23  ;;  %640 = vadd.xlane.f32.xlu1 %v639_v24  ;;  %v705_v24 = vsel %vm536_vm0, %v3474_v18, 0.0 }
  0x6e   : > { %637 = vadd.xlane.f32.xlu0 %v636_v25  ;;  %v702_v25 = vsel %vm536_vm0, %v3471_v19, 0.0 }
  0x75   : > { %652 = vadd.xlane.f32.xlu2 %v651_v31  ;;  %649 = vadd.xlane.f32.xlu1 %v648_v32 }
  0x76   : > { %646 = vadd.xlane.f32.xlu0 %v645_v33 }
  0x7d   : > { %661 = vadd.xlane.f32.xlu2 %v660_v38  ;;  %658 = vadd.xlane.f32.xlu1 %v657_v39  ;;  %v3901_v38 = vld [vmem:[%s4070_s27 + $0xf0] sm:$0xff]   ;;  %v3486_v39 = vunpack.c.l.bf16 %v3902_v37 }
  0x7e   : > { %655 = vadd.xlane.f32.xlu0 %v654_v40  ;;  %v3483_v40 = vunpack.c.h.bf16 %v3901_v38  ;;  %v3482_v41 = vunpack.c.l.bf16 %v3901_v38  ;;  %v759_v38 = vsel %vm536_vm0, %v3510_v29, 0.0 }
  0x7f   : > { %v723_v45 = vsel %vm536_vm0, %v3486_v39, 0.0  ;;  %v756_v39 = vsel %vm536_vm0, %v3507_v30, 0.0 }
  0x85   : > { %670 = vadd.xlane.f32.xlu2 %v669_v46  ;;  %667 = vadd.xlane.f32.xlu1 %v666_v47  ;;  %v720_v46 = vsel %vm536_vm0, %v3483_v40, 0.0  ;;  %v717_v47 = vsel %vm536_vm0, %v3482_v41, 0.0  ;;  %v3909_v41 = vld [vmem:[%s4070_s27 + $0x130] sm:$0xff]  }
  0x86   : > { %664 = vadd.xlane.f32.xlu0 %v663_v48  ;;  %v3903_v48 = vld [vmem:[%s4070_s27 + $0x100] sm:$0xff]  }
  0x87   : > { %v3491_v49 = vunpack.c.h.bf16 %v3903_v48  ;;  %v3490_v50 = vunpack.c.l.bf16 %v3903_v48 }
  0x88   : > { %v4141_v53 = vpop.xlane.xlu2 %550  ;;  %v4143_v54 = vpop.xlane.xlu1 %544 }
  0x89   : > { %v4145_v55 = vpop.xlane.xlu0 %538  ;;  %v729_v59 = vsel %vm536_vm0, %v3490_v50, 0.0 }
  0x8d   : > { %679 = vadd.xlane.f32.xlu2 %v678_v56  ;;  %676 = vadd.xlane.f32.xlu1 %v675_v57 }
  0x8e   : > { %673 = vadd.xlane.f32.xlu0 %v672_v58  ;;  %v732_v58 = vsel %vm536_vm0, %v3491_v49, 0.0 }
  0x90   : > { %v4152_v0 = vpop.xlane.xlu2 %553  ;;  %v4154_v1 = vpop.xlane.xlu1 %547 }
  0x91   : > { %v4156_v2 = vpop.xlane.xlu0 %541 }
  0x95   : > { %688 = vadd.xlane.f32.xlu2 %v687_v3  ;;  %685 = vadd.xlane.f32.xlu1 %v684_v4  ;;  %v3495_v3 = vunpack.c.h.bf16 %v3904_v62  ;;  %v3494_v4 = vunpack.c.l.bf16 %v3904_v62 }
  0x96   : > { %682 = vadd.xlane.f32.xlu0 %v681_v5 }
  0x97   : > { %v738_v9 = vsel %vm536_vm0, %v3495_v3, 0.0  ;;  %v3518_v3 = vunpack.c.l.bf16 %v3910_v61  ;;  %v3915_v61 = vld [vmem:[%s4070_s27 + $0x160] sm:$0xff]  }
  0x98   : > { %v4162_v10 = vpop.xlane.xlu2 %562  ;;  %v4164_v11 = vpop.xlane.xlu1 %559 }
  0x99   : > { %v4166_v12 = vpop.xlane.xlu0 %556 }
  0x9d   : > { %697 = vadd.xlane.f32.xlu2 %v696_v13  ;;  %694 = vadd.xlane.f32.xlu1 %v693_v14  ;;  %v735_v13 = vsel %vm536_vm0, %v3494_v4, 0.0  ;;  %v3906_v14 = vld [vmem:[%s4070_s27 + $0x118] sm:$0xff]  }
  0x9e   : > { %691 = vadd.xlane.f32.xlu0 %v690_v15  ;;  %v3503_v15 = vunpack.c.h.bf16 %v3906_v14  ;;  %v3502_v16 = vunpack.c.l.bf16 %v3906_v14  ;;  %v774_v14 = vsel %vm536_vm0, %v3519_v63, 0.0  ;;  %v3538_v63 = vunpack.c.l.bf16 %v3915_v61 }
  0xa0   : > { %v4173_v21 = vpop.xlane.xlu2 %571  ;;  %v4175_v22 = vpop.xlane.xlu1 %568 }
  0xa1   : > { %v4177_v23 = vpop.xlane.xlu0 %565 }
  0xa5   : > { %706 = vadd.xlane.f32.xlu2 %v705_v24  ;;  %703 = vadd.xlane.f32.xlu1 %v702_v25  ;;  %v750_v24 = vsel %vm536_vm0, %v3503_v15, 0.0  ;;  %v747_v25 = vsel %vm536_vm0, %v3502_v16, 0.0  ;;  %v771_v15 = vsel %vm536_vm0, %v3518_v3, 0.0  ;;  %v3912_v16 = vld [vmem:[%s4070_s27 + $0x148] sm:$0xff]  }
  0xa6   : > { %700 = vadd.xlane.f32.xlu0 %v699_v26  ;;  %v744_v26 = vsel %vm536_vm0, %v3499_v17, 0.0  ;;  %v3527_v17 = vunpack.c.h.bf16 %v3912_v16 }
  0xa8   : > { %v4183_v31 = vpop.xlane.xlu2 %580  ;;  %v4185_v32 = vpop.xlane.xlu1 %577  ;;  %v786_v29 = vsel %vm536_vm0, %v3527_v17, 0.0  ;;  %v801_v17 = vsel %vm536_vm0, %v3538_v63, 0.0 }
  0xa9   : > { %v4187_v33 = vpop.xlane.xlu0 %574 }
  0xad   : > { %715 = vadd.xlane.f32.xlu2 %v714_v34  ;;  %712 = vadd.xlane.f32.xlu1 %v711_v35  ;;  %v3506_v34 = vunpack.c.l.bf16 %v3907_v28 }
  0xae   : > { %709 = vadd.xlane.f32.xlu0 %v708_v36 }
  0xaf   : > { %v753_v40 = vsel %vm536_vm0, %v3506_v34, 0.0 }
  0xb0   : > { %v4194_v42 = vpop.xlane.xlu2 %589  ;;  %v4196_v43 = vpop.xlane.xlu1 %586 }
  0xb1   : > { %v4198_v44 = vpop.xlane.xlu0 %583 }
  0xb5   : > { %724 = vadd.xlane.f32.xlu2 %v723_v45  ;;  %721 = vadd.xlane.f32.xlu1 %v720_v46  ;;  %v3515_v45 = vunpack.c.h.bf16 %v3909_v41  ;;  %v3514_v46 = vunpack.c.l.bf16 %v3909_v41 }
  0xb6   : > { %718 = vadd.xlane.f32.xlu0 %v717_v47  ;;  %v3511_v47 = vunpack.c.h.bf16 %v3908_v27 }
  0xb7   : > { %v768_v51 = vsel %vm536_vm0, %v3515_v45, 0.0 }
  0xb8   : > { %v4204_v52 = vpop.xlane.xlu2 %598  ;;  %v4206_v56 = vpop.xlane.xlu1 %595 }
  0xb9   : > { %v4208_v57 = vpop.xlane.xlu0 %592 }
  0xbd   : > { %733 = vadd.xlane.f32.xlu2 %v732_v58  ;;  %730 = vadd.xlane.f32.xlu1 %v729_v59  ;;  %v765_v58 = vsel %vm536_vm0, %v3514_v46, 0.0  ;;  %v762_v59 = vsel %vm536_vm0, %v3511_v47, 0.0 }
  0xbe   : > { %727 = vadd.xlane.f32.xlu0 %v726_v60  ;;  %v3911_v60 = vld [vmem:[%s4070_s27 + $0x140] sm:$0xff]  }
  0xbf   : > { %v3522_v62 = vunpack.c.l.bf16 %v3911_v60 }
  0xc0   : > { %v4215_v5 = vpop.xlane.xlu2 %607  ;;  %v4217_v6 = vpop.xlane.xlu1 %604 }
  0xc1   : > { %v4219_v7 = vpop.xlane.xlu0 %601 }
  0xc5   : > { %742 = vadd.xlane.f32.xlu2 %v741_v8  ;;  %739 = vadd.xlane.f32.xlu1 %v738_v9 }
  0xc6   : > { %736 = vadd.xlane.f32.xlu0 %v735_v13  ;;  %v777_v13 = vsel %vm536_vm0, %v3522_v62, 0.0  ;;  %v3539_v62 = vunpack.c.h.bf16 %v3915_v61 }
  0xc8   : > { %v4225_v18 = vpop.xlane.xlu2 %616  ;;  %v4227_v19 = vpop.xlane.xlu1 %613 }
  0xc9   : > { %v4229_v20 = vpop.xlane.xlu0 %610 }
  0xcd   : > { %751 = vadd.xlane.f32.xlu2 %v750_v24  ;;  %748 = vadd.xlane.f32.xlu1 %v747_v25  ;;  %v3526_v24 = vunpack.c.l.bf16 %v3912_v16  ;;  %v3523_v25 = vunpack.c.h.bf16 %v3911_v60  ;;  %v804_v16 = vsel %vm536_vm0, %v3539_v62, 0.0 }
  0xce   : > { %745 = vadd.xlane.f32.xlu0 %v744_v26 }
  0xcf   : > { %v783_v30 = vsel %vm536_vm0, %v3526_v24, 0.0  ;;  %v780_v34 = vsel %vm536_vm0, %v3523_v25, 0.0  ;;  %v3917_v25 = vld [vmem:[%s4070_s27 + $0x170] sm:$0xff]  }
  0xd0   : > { %v4236_v35 = vpop.xlane.xlu2 %625  ;;  %v4238_v36 = vpop.xlane.xlu1 %622  ;;  %v3547_v63 = vunpack.c.h.bf16 %v3917_v25 }
  0xd1   : > { %v4240_v37 = vpop.xlane.xlu0 %619 }
  0xd5   : > { %760 = vadd.xlane.f32.xlu2 %v759_v38  ;;  %757 = vadd.xlane.f32.xlu1 %v756_v39  ;;  %v3914_v38 = vld [vmem:[%s4070_s27 + $0x158] sm:$0xff]   ;;  %v3913_v39 = vld [vmem:[%s4070_s27 + $0x150] sm:$0xff]  }
  0xd6   : > { %754 = vadd.xlane.f32.xlu0 %v753_v40  ;;  %v3534_v40 = vunpack.c.l.bf16 %v3914_v38  ;;  %v3531_v41 = vunpack.c.h.bf16 %v3913_v39  ;;  %v3530_v45 = vunpack.c.l.bf16 %v3913_v39  ;;  %v3535_v3 = vunpack.c.h.bf16 %v3914_v38 }
  0xd8   : > { %v4246_v48 = vpop.xlane.xlu2 %634  ;;  %v4248_v49 = vpop.xlane.xlu1 %631  ;;  %v789_v60 = vsel %vm536_vm0, %v3530_v45, 0.0  ;;  %v798_v24 = vsel %vm536_vm0, %v3535_v3, 0.0 }
  0xd9   : > { %5938 = vst [vmem:[#allocation2_spill] sm:$0xff] %v4248_v49  ;;  %v4250_v50 = vpop.xlane.xlu0 %628  ;;  %v3935_v49 = vld [vmem:[%s4429_s30 + $0x8] sm:$0xff]  }
  0xdd   : > { %769 = vadd.xlane.f32.xlu2 %v768_v51  ;;  %766 = vadd.xlane.f32.xlu1 %v765_v58  ;;  %v795_v58 = vsel %vm536_vm0, %v3534_v40, 0.0 }
  0xde   : > { %763 = vadd.xlane.f32.xlu0 %v762_v59  ;;  %v792_v59 = vsel %vm536_vm0, %v3531_v41, 0.0 }
  0xe0   : > { %v4257_v4 = vpop.xlane.xlu2 %643  ;;  %v4259_v8 = vpop.xlane.xlu1 %640 }
  0xe1   : > { %v4261_v9 = vpop.xlane.xlu0 %637 }
  0xe5   : > { %778 = vadd.xlane.f32.xlu2 %v777_v13  ;;  %775 = vadd.xlane.f32.xlu1 %v774_v14 }
  0xe6   : > { %772 = vadd.xlane.f32.xlu0 %v771_v15 }
  0xe8   : > { %v4267_v26 = vpop.xlane.xlu2 %652  ;;  %v4269_v27 = vpop.xlane.xlu1 %649 }
  0xe9   : > { %v4271_v28 = vpop.xlane.xlu0 %646 }
  0xed   : > { %787 = vadd.xlane.f32.xlu2 %v786_v29  ;;  %784 = vadd.xlane.f32.xlu1 %v783_v30  ;;  %v3916_v29 = vld [vmem:[%s4070_s27 + $0x168] sm:$0xff]   ;;  %v3546_v30 = vunpack.c.l.bf16 %v3917_v25 }
  0xee   : > { %781 = vadd.xlane.f32.xlu0 %v780_v34  ;;  %v3543_v34 = vunpack.c.h.bf16 %v3916_v29  ;;  %v3542_v38 = vunpack.c.l.bf16 %v3916_v29 }
  0xef   : > { %v813_v45 = vsel %vm536_vm0, %v3546_v30, 0.0  ;;  %v816_v30 = vsel %vm536_vm0, %v3547_v63, 0.0 }
  0xf0   : > { %v4278_v46 = vpop.xlane.xlu2 %661  ;;  %v4280_v47 = vpop.xlane.xlu1 %658 }
  0xf1   : > { %5939 = vst [vmem:[#allocation3_spill] sm:$0xff] %v4278_v46  ;;  %v4282_v51 = vpop.xlane.xlu0 %655 }
  0xf5   : > { %796 = vadd.xlane.f32.xlu2 %v795_v58  ;;  %793 = vadd.xlane.f32.xlu1 %v792_v59  ;;  %v810_v58 = vsel %vm536_vm0, %v3543_v34, 0.0  ;;  %v807_v59 = vsel %vm536_vm0, %v3542_v38, 0.0  ;;  %v3920_v34 = vld [vmem:[%s4070_s27 + $0x188] sm:$0xff]   ;;  %v3919_v38 = vld [vmem:[%s4070_s27 + $0x180] sm:$0xff]  }
  0xf6   : > { %790 = vadd.xlane.f32.xlu0 %v789_v60  ;;  %v3918_v60 = vld [vmem:[%s4070_s27 + $0x178] sm:$0xff]   ;;  %v3555_v25 = vunpack.c.h.bf16 %v3919_v38 }
  0xf7   : > { %v3551_v61 = vunpack.c.h.bf16 %v3918_v60  ;;  %v3550_v62 = vunpack.c.l.bf16 %v3918_v60 }
  0xf8   : > { %v4288_v13 = vpop.xlane.xlu2 %670  ;;  %v4290_v14 = vpop.xlane.xlu1 %667 }
  0xf9   : > { %5940 = vst [vmem:[#allocation4_spill] sm:$0xff] %v4288_v13  ;;  %v4292_v15 = vpop.xlane.xlu0 %664  ;;  %v819_v29 = vsel %vm536_vm0, %v3550_v62, 0.0  ;;  %v828_v62 = vsel %vm536_vm0, %v3555_v25, 0.0 }
  0xfa   : > { %5941 = vst [vmem:[#allocation5_spill] sm:$0xff] %v4290_v14 }
  0xfb   : > { %5942 = vst [vmem:[#allocation6_spill] sm:$0xff] %v4292_v15 }
  0xfd   : > { %805 = vadd.xlane.f32.xlu2 %v804_v16  ;;  %802 = vadd.xlane.f32.xlu1 %v801_v17 }
  0xfe   : > { %799 = vadd.xlane.f32.xlu0 %v798_v24  ;;  %v822_v24 = vsel %vm536_vm0, %v3551_v61, 0.0 }
 0x100   : > { %v4299_v39 = vpop.xlane.xlu2 %679  ;;  %v4301_v40 = vpop.xlane.xlu1 %676 }
 0x101   : > { %5943 = vst [vmem:[#allocation7_spill] sm:$0xff] %v4299_v39  ;;  %v4303_v41 = vpop.xlane.xlu0 %673 }
 0x102   : > { %5944 = vst [vmem:[#allocation8_spill] sm:$0xff] %v4301_v40 }
 0x103   : > { %5945 = vst [vmem:[#allocation9_spill] sm:$0xff] %v4303_v41 }
 0x105   : > { %814 = vadd.xlane.f32.xlu2 %v813_v45  ;;  %811 = vadd.xlane.f32.xlu1 %v810_v58  ;;  %v3558_v45 = vunpack.c.l.bf16 %v3920_v34  ;;  %v3554_v58 = vunpack.c.l.bf16 %v3919_v38  ;;  %v3559_v38 = vunpack.c.h.bf16 %v3920_v34 }
 0x106   : > { %808 = vadd.xlane.f32.xlu0 %v807_v59 }
 0x107   : > { %v831_v61 = vsel %vm536_vm0, %v3558_v45, 0.0  ;;  %v825_v63 = vsel %vm536_vm0, %v3554_v58, 0.0  ;;  %v834_v58 = vsel %vm536_vm0, %v3559_v38, 0.0 }
 0x108   : > { %v4309_v3 = vpop.xlane.xlu2 %688  ;;  %v4311_v16 = vpop.xlane.xlu1 %685 }
 0x109   : > { %5946 = vst [vmem:[#allocation10_spill] sm:$0xff] %v4309_v3  ;;  %v4313_v17 = vpop.xlane.xlu0 %682 }
 0x10d   : > { %823 = vadd.xlane.f32.xlu2 %v822_v24  ;;  %820 = vadd.xlane.f32.xlu1 %v819_v29  ;;  %v3921_v24 = vld [vmem:[%s4070_s27 + $0x190] sm:$0xff]  }
 0x10e   : > { %817 = vadd.xlane.f32.xlu0 %v816_v30  ;;  %v3563_v29 = vunpack.c.h.bf16 %v3921_v24  ;;  %v3562_v30 = vunpack.c.l.bf16 %v3921_v24 }
 0x110   : > { %v4320_v59 = vpop.xlane.xlu2 %697  ;;  %v4322_v60 = vpop.xlane.xlu1 %694  ;;  %v840_v45 = vsel %vm536_vm0, %v3563_v29, 0.0  ;;  %v837_v25 = vsel %vm536_vm0, %v3562_v30, 0.0 }
 0x111   : > { %5947 = vst [vmem:[#allocation11_spill] sm:$0xff] %v4320_v59  ;;  %v4324_v39 = vpop.xlane.xlu0 %691  ;;  %v3923_v59 = vld [vmem:[%s4070_s27 + $0x1a0] sm:$0xff]  }
 0x112   : > { %5948 = vst [vmem:[#allocation12_spill] sm:$0xff] %v4322_v60 }
 0x113   : > { %5949 = vst [vmem:[#allocation13_spill] sm:$0xff] %v4324_v39  ;;  %v926_v39 = vmul.f32 0.015625, %v4152_v0  ;;  %v940_v0 = vmul.f32 0.015625, %v4206_v56 }
 0x115   : > { %832 = vadd.xlane.f32.xlu2 %v831_v61  ;;  %829 = vadd.xlane.f32.xlu1 %v828_v62  ;;  %v3922_v61 = vld [vmem:[%s4070_s27 + $0x198] sm:$0xff]   ;;  %v3570_v62 = vunpack.c.l.bf16 %v3923_v59 }
 0x116   : > { %826 = vadd.xlane.f32.xlu0 %v825_v63  ;;  %v3567_v34 = vunpack.c.h.bf16 %v3922_v61  ;;  %v3566_v63 = vunpack.c.l.bf16 %v3922_v61  ;;  %v3571_v61 = vunpack.c.h.bf16 %v3923_v59 }
 0x117   : > { %v849_v29 = vsel %vm536_vm0, %v3570_v62, 0.0 }
 0x118   : > { %v4330_v40 = vpop.xlane.xlu2 %706  ;;  %v4332_v41 = vpop.xlane.xlu1 %703  ;;  %v846_v30 = vsel %vm536_vm0, %v3567_v34, 0.0  ;;  %v843_v38 = vsel %vm536_vm0, %v3566_v63, 0.0  ;;  %v852_v63 = vsel %vm536_vm0, %v3571_v61, 0.0 }
 0x119   : > { %5950 = vst [vmem:[#allocation14_spill] sm:$0xff] %v4330_v40  ;;  %v4334_v13 = vpop.xlane.xlu0 %700 }
 0x11a   : > { %5951 = vst [vmem:[#allocation15_spill] sm:$0xff] %v4332_v41 }
 0x11b   : > { %5952 = vst [vmem:[#allocation16_spill] sm:$0xff] %v4334_v13  ;;  %v3926_v13 = vld [vmem:[%s4070_s27 + $0x1b8] sm:$0xff]  }
 0x11d   : > { %841 = vadd.xlane.f32.xlu2 %v840_v45  ;;  %838 = vadd.xlane.f32.xlu1 %v837_v25  ;;  %v3924_v45 = vld [vmem:[%s4070_s27 + $0x1a8] sm:$0xff]  }
 0x11e   : > { %835 = vadd.xlane.f32.xlu0 %v834_v58  ;;  %v3575_v25 = vunpack.c.h.bf16 %v3924_v45  ;;  %v3574_v58 = vunpack.c.l.bf16 %v3924_v45 }
 0x120   : > { %v4341_v24 = vpop.xlane.xlu2 %715  ;;  %v4343_v40 = vpop.xlane.xlu1 %712  ;;  %v858_v62 = vsel %vm536_vm0, %v3575_v25, 0.0  ;;  %v855_v34 = vsel %vm536_vm0, %v3574_v58, 0.0 }
 0x121   : > { %5953 = vst [vmem:[#allocation17_spill] sm:$0xff] %v4341_v24  ;;  %v4345_v41 = vpop.xlane.xlu0 %709 }
 0x122   : > { %5954 = vst [vmem:[#allocation18_spill] sm:$0xff] %v4343_v40 }
 0x123   : > { %5955 = vst [vmem:[#allocation19_spill] sm:$0xff] %v4345_v41 }
 0x125   : > { %850 = vadd.xlane.f32.xlu2 %v849_v29  ;;  %847 = vadd.xlane.f32.xlu1 %v846_v30  ;;  %v3925_v29 = vld [vmem:[%s4070_s27 + $0x1b0] sm:$0xff]   ;;  %v3582_v30 = vunpack.c.l.bf16 %v3926_v13 }
 0x126   : > { %844 = vadd.xlane.f32.xlu0 %v843_v38  ;;  %v3579_v59 = vunpack.c.h.bf16 %v3925_v29  ;;  %v3578_v38 = vunpack.c.l.bf16 %v3925_v29  ;;  %v3583_v29 = vunpack.c.h.bf16 %v3926_v13 }
 0x127   : > { %v867_v25 = vsel %vm536_vm0, %v3582_v30, 0.0 }
 0x128   : > { %v4351_v24 = vpop.xlane.xlu2 %724  ;;  %v4353_v40 = vpop.xlane.xlu1 %721  ;;  %v864_v58 = vsel %vm536_vm0, %v3579_v59, 0.0  ;;  %v861_v61 = vsel %vm536_vm0, %v3578_v38, 0.0  ;;  %v870_v38 = vsel %vm536_vm0, %v3583_v29, 0.0 }
 0x129   : > { %5956 = vst [vmem:[#allocation20_spill] sm:$0xff] %v4351_v24  ;;  %v4355_v41 = vpop.xlane.xlu0 %718 }
 0x12a   : > { %5957 = vst [vmem:[#allocation21_spill] sm:$0xff] %v4353_v40 }
 0x12b   : > { %5958 = vst [vmem:[#allocation22_spill] sm:$0xff] %v4355_v41 }
 0x12d   : > { %859 = vadd.xlane.f32.xlu2 %v858_v62  ;;  %856 = vadd.xlane.f32.xlu1 %v855_v34  ;;  %v3927_v62 = vld [vmem:[%s4070_s27 + $0x1c0] sm:$0xff]  }
 0x12e   : > { %853 = vadd.xlane.f32.xlu0 %v852_v63  ;;  %v3587_v34 = vunpack.c.h.bf16 %v3927_v62  ;;  %v3586_v63 = vunpack.c.l.bf16 %v3927_v62 }
 0x130   : > { %v4362_v45 = vpop.xlane.xlu2 %733  ;;  %v4364_v40 = vpop.xlane.xlu1 %730  ;;  %v876_v30 = vsel %vm536_vm0, %v3587_v34, 0.0  ;;  %v873_v59 = vsel %vm536_vm0, %v3586_v63, 0.0 }
 0x131   : > { %5959 = vst [vmem:[#allocation23_spill] sm:$0xff] %v4362_v45  ;;  %v4366_v24 = vpop.xlane.xlu0 %727  ;;  %v3929_v45 = vld [vmem:[%s4070_s27 + $0x1d0] sm:$0xff]  }
 0x132   : > { %5960 = vst [vmem:[#allocation24_spill] sm:$0xff] %v4364_v40 }
 0x133   : > { %5961 = vst [vmem:[#allocation25_spill] sm:$0xff] %v4366_v24 }
 0x135   : > { %868 = vadd.xlane.f32.xlu2 %v867_v25  ;;  %865 = vadd.xlane.f32.xlu1 %v864_v58  ;;  %v3928_v25 = vld [vmem:[%s4070_s27 + $0x1c8] sm:$0xff]   ;;  %v3594_v58 = vunpack.c.l.bf16 %v3929_v45 }
 0x136   : > { %862 = vadd.xlane.f32.xlu0 %v861_v61  ;;  %v3591_v13 = vunpack.c.h.bf16 %v3928_v25  ;;  %v3590_v61 = vunpack.c.l.bf16 %v3928_v25  ;;  %v3595_v25 = vunpack.c.h.bf16 %v3929_v45 }
 0x137   : > { %v885_v34 = vsel %vm536_vm0, %v3594_v58, 0.0 }
 0x138   : > { %v4372_v41 = vpop.xlane.xlu2 %742  ;;  %v4374_v40 = vpop.xlane.xlu1 %739  ;;  %v882_v63 = vsel %vm536_vm0, %v3591_v13, 0.0  ;;  %v879_v29 = vsel %vm536_vm0, %v3590_v61, 0.0  ;;  %v3932_v61 = vld [vmem:[%s4070_s27 + $0x1e8] sm:$0xff]  }
 0x139   : > { %5962 = vst [vmem:[#allocation26_spill] sm:$0xff] %v4372_v41  ;;  %v4376_v24 = vpop.xlane.xlu0 %736 }
 0x13a   : > { %5963 = vst [vmem:[#allocation27_spill] sm:$0xff] %v4374_v40 }
 0x13b   : > { %5964 = vst [vmem:[#allocation28_spill] sm:$0xff] %v4376_v24  ;;  %v888_v24 = vsel %vm536_vm0, %v3595_v25, 0.0 }
 0x13d   : > { %877 = vadd.xlane.f32.xlu2 %v876_v30  ;;  %874 = vadd.xlane.f32.xlu1 %v873_v59  ;;  %v3930_v30 = vld [vmem:[%s4070_s27 + $0x1d8] sm:$0xff]  }
 0x13e   : > { %871 = vadd.xlane.f32.xlu0 %v870_v38  ;;  %v3599_v59 = vunpack.c.h.bf16 %v3930_v30  ;;  %v3598_v38 = vunpack.c.l.bf16 %v3930_v30 }
 0x140   : > { %v4383_v62 = vpop.xlane.xlu2 %751  ;;  %v4385_v41 = vpop.xlane.xlu1 %748  ;;  %v894_v58 = vsel %vm536_vm0, %v3599_v59, 0.0  ;;  %v891_v13 = vsel %vm536_vm0, %v3598_v38, 0.0  ;;  %v1945_v59 = vlaneseq }
 0x141   : > { %5965 = vst [vmem:[#allocation29_spill] sm:$0xff] %v4383_v62  ;;  %v4387_v40 = vpop.xlane.xlu0 %745 }
 0x142   : > { %5966 = vst [vmem:[#allocation30_spill] sm:$0xff] %v4385_v41 }
 0x143   : > { %5967 = vst [vmem:[#allocation31_spill] sm:$0xff] %v4387_v40 }
 0x145   : > { %886 = vadd.xlane.f32.xlu2 %v885_v34  ;;  %883 = vadd.xlane.f32.xlu1 %v882_v63  ;;  %v3931_v34 = vld [vmem:[%s4070_s27 + $0x1e0] sm:$0xff]   ;;  %v3606_v63 = vunpack.c.l.bf16 %v3932_v61 }
 0x146   : > { %880 = vadd.xlane.f32.xlu0 %v879_v29  ;;  %v3603_v45 = vunpack.c.h.bf16 %v3931_v34  ;;  %v3602_v29 = vunpack.c.l.bf16 %v3931_v34 }
 0x147   : > { %v903_v38 = vsel %vm536_vm0, %v3606_v63, 0.0 }
 0x148   : > { %v4393_v62 = vpop.xlane.xlu2 %760  ;;  %v4395_v41 = vpop.xlane.xlu1 %757  ;;  %v900_v25 = vsel %vm536_vm0, %v3603_v45, 0.0 }
 0x149   : > { %5968 = vst [vmem:[#allocation32_spill] sm:$0xff] %v4393_v62  ;;  %v4397_v40 = vpop.xlane.xlu0 %754 }
 0x14a   : > { %5969 = vst [vmem:[#allocation33_spill] sm:$0xff] %v4395_v41 }
 0x14b   : > { %5970 = vst [vmem:[#allocation34_spill] sm:$0xff] %v4397_v40  ;;  %v897_v40 = vsel %vm536_vm0, %v3602_v29, 0.0 }
 0x14d   : > { %895 = vadd.xlane.f32.xlu2 %v894_v58  ;;  %892 = vadd.xlane.f32.xlu1 %v891_v13  ;;  %v3933_v58 = vld [vmem:[%s4070_s27 + $0x1f0] sm:$0xff]  }
 0x14e   : > { %889 = vadd.xlane.f32.xlu0 %v888_v24  ;;  %v4414_v24 = vand.u32 127, %v1945_v59  ;;  %v3611_v13 = vunpack.c.h.bf16 %v3933_v58  ;;  %v3610_v34 = vunpack.c.l.bf16 %v3933_v58 }
 0x150   : > { %v4404_v30 = vpop.xlane.xlu2 %769  ;;  %v4406_v62 = vpop.xlane.xlu1 %766  ;;  %v912_v29 = vsel %vm536_vm0, %v3611_v13, 0.0  ;;  %v909_v59 = vsel %vm536_vm0, %v3610_v34, 0.0  ;;  %v4456_v60 = vadd.s32 4294967256, %v4414_v24  ;;  %v4467_v15 = vadd.s32 4294967232, %v4414_v24 }
 0x151   : > { %5971 = vst [vmem:[#allocation35_spill] sm:$0xff] %v4404_v30  ;;  %v4408_v41 = vpop.xlane.xlu0 %763  ;;  %v3607_v30 = vunpack.c.h.bf16 %v3932_v61  ;;  %v921_v61 = vmul.f32 0.015625, %v4145_v55 }
 0x152   : > { %5972 = vst [vmem:[#allocation36_spill] sm:$0xff] %v4406_v62  ;;  %v4417_v62 = vadd.s32 4294967288, %v4414_v24 }
 0x153   : > { %5973 = vst [vmem:[#allocation37_spill] sm:$0xff] %v4408_v41  ;;  %v922_v41 = vmul.f32 0.015625, %v4156_v2  ;;  %v906_v2 = vsel %vm536_vm0, %v3607_v30, 0.0  ;;  %v1947_v55 = vperm.slane %v921_v61, %v4414_v24  ;;  %v924_v30 = vmul.f32 0.015625, %v4154_v1 }
 0x154   : > { %v937_v61 = vmul.f32 0.015625, %v4196_v43 }
 0x155   : > { %904 = vadd.xlane.f32.xlu2 %v903_v38  ;;  %901 = vadd.xlane.f32.xlu1 %v900_v25  ;;  %v4438_v38 = vld [vmem:[%s4429_s30] sm:$0xff]   ;;  %v3934_v25 = vld [vmem:[%s4070_s27 + $0x1f8] sm:$0xff]   ;;  %v1949_v58 = vperm.slane %v922_v41, %v4417_v62  ;;  %v4453_v41 = vadd.s32 4294967264, %v4414_v24 }
 0x156   : > { %898 = vadd.xlane.f32.xlu0 %v897_v40  ;;  %v3618_v13 = vunpack.c.l.bf16 %v4438_v38  ;;  %v3615_v34 = vunpack.c.h.bf16 %v3934_v25  ;;  %v3619_v3 = vunpack.c.h.bf16 %v4438_v38 }
 0x157   : > { %v1951_v14 = vsel %vm1950_vm1, %v1949_v58, %v1947_v55  ;;  %v925_v55 = vmul.f32 0.015625, %v4141_v53  ;;  %v927_v53 = vmul.f32 0.015625, %v4166_v12  ;;  %v1965_v12 = vperm.slane %v926_v39, %v4456_v60 }
 0x158   : > { %v4420_v63 = vpop.xlane.xlu2 %778  ;;  %v4422_v45 = vpop.xlane.xlu1 %775  ;;  %v918_v43 = vsel %vm536_vm0, %v3615_v34, 0.0  ;;  %v4486_v34 = vadd.s32 4294967240, %v4414_v24  ;;  %v4510_v39 = vadd.s32 4294967216, %v4414_v24 }
 0x159   : > { %5974 = vst [vmem:[#allocation38_spill] sm:$0xff] %v4420_v63  ;;  %v4431_v40 = vpop.xlane.xlu0 %772  ;;  %v923_v63 = vmul.f32 0.015625, %v4143_v54  ;;  %v3614_v54 = vunpack.c.l.bf16 %v3934_v25 }
 0x15a   : > { %5975 = vst [vmem:[#allocation39_spill] sm:$0xff] %v4422_v45  ;;  %v4443_v45 = vadd.s32 4294967280, %v4414_v24 }
 0x15b   : > { %5976 = vst [vmem:[#allocation40_spill] sm:$0xff] %v4431_v40  ;;  %v4447_v40 = vadd.s32 4294967272, %v4414_v24 }
 0x15d   : > { %913 = vadd.xlane.f32.xlu2 %v912_v29  ;;  %910 = vadd.xlane.f32.xlu1 %v909_v59  ;;  %v938_v29 = vmul.f32 0.015625, %v4194_v42  ;;  %v1957_v58 = vperm.slane %v924_v30, %v4447_v40  ;;  %v1305_v42 = vsel %vm536_vm0, %v3618_v13, 0.0  ;;  %v2008_v13 = vperm.slane %v937_v61, %v4414_v24 }
 0x15e   : > { %907 = vadd.xlane.f32.xlu0 %v906_v2  ;;  %v1953_v2 = vperm.slane %v923_v63, %v4443_v45  ;;  %v939_v63 = vmul.f32 0.015625, %v4208_v57  ;;  %v4493_v61 = vadd.s32 4294967208, %v4414_v24 }
 0x15f   : > { %v2009_v30 = vperm.slane %v938_v29, %v4417_v62  ;;  %v1961_v29 = vperm.slane %v925_v55, %v4453_v41  ;;  %v2013_v55 = vperm.slane %v940_v0, %v4447_v40 }
 0x160   : > { %v4461_v1 = vpop.xlane.xlu2 %787  ;;  %v4463_v59 = vpop.xlane.xlu1 %784 }
 0x161   : > { %5977 = vst [vmem:[#allocation41_spill] sm:$0xff] %v4461_v1  ;;  %v4469_v25 = vpop.xlane.xlu0 %781  ;;  %v1955_v1 = vsel %vm1954_vm2, %v1953_v2, %v1951_v14  ;;  %v3623_v14 = vunpack.c.h.bf16 %v3935_v49  ;;  %v2011_v2 = vperm.slane %v939_v63, %v4443_v45  ;;  %v2010_v56 = vsel %vm1950_vm1, %v2009_v30, %v2008_v13 }
 0x162   : > { %5978 = vst [vmem:[#allocation42_spill] sm:$0xff] %v4463_v59  ;;  %v915_v59 = vsel %vm536_vm0, %v3614_v54, 0.0  ;;  %v1959_v57 = vsel %vm1958_vm3, %v1957_v58, %v1955_v1  ;;  %v3622_v54 = vunpack.c.l.bf16 %v3935_v49  ;;  %v4500_v1 = vadd.s32 4294967224, %v4414_v24 }
 0x163   : > { %5979 = vst [vmem:[#allocation43_spill] sm:$0xff] %v4469_v25  ;;  %v4481_v25 = vadd.s32 4294967248, %v4414_v24  ;;  %v1963_v58 = vsel %vm5930_vm4, %v1961_v29, %v1959_v57  ;;  %v942_v63 = vmul.f32 0.015625, %v4219_v7  ;;  %v1314_v30 = vsel %vm536_vm0, %v3623_v14, 0.0 }
 0x164   : > { %v1311_v13 = vsel %vm536_vm0, %v3622_v54, 0.0  ;;  %v929_v57 = vmul.f32 0.015625, %v4162_v10  ;;  %v2012_v29 = vsel %vm1954_vm2, %v2011_v2, %v2010_v56  ;;  %v1967_v7 = vsel %vm1966_vm5, %v1965_v12, %v1963_v58 }
 0x165   : > { %1306 = vadd.xlane.f32.xlu2 %v1305_v42  ;;  %919 = vadd.xlane.f32.xlu1 %v918_v43  ;;  %v928_v42 = vmul.f32 0.015625, %v4164_v11  ;;  %v1969_v38 = vperm.slane %v927_v53, %v4481_v25  ;;  %v941_v11 = vmul.f32 0.015625, %v4204_v52  ;;  %v4521_v53 = vadd.s32 4294967184, %v4414_v24 }
 0x166   : > { %916 = vadd.xlane.f32.xlu0 %v915_v59  ;;  %v1308_v52 = vsel %vm536_vm0, %v3619_v3, 0.0  ;;  %v4532_v14 = vadd.s32 4294967192, %v4414_v24  ;;  %v4535_v54 = vadd.s32 4294967200, %v4414_v24  ;;  %v943_v3 = vmul.f32 0.015625, %v4217_v6 }
 0x167   : > { %v1973_v0 = vperm.slane %v928_v42, %v4486_v34  ;;  %v1971_v10 = vsel %vm1970_vm6, %v1969_v38, %v1967_v7  ;;  %v2015_v2 = vperm.slane %v941_v11, %v4453_v41  ;;  %v2014_v42 = vsel %vm1958_vm3, %v2013_v55, %v2012_v29 }
 0x168   : > { %v4503_v49 = vpop.xlane.xlu2 %796  ;;  %v4505_v59 = vpop.xlane.xlu1 %793  ;;  %v2017_v12 = vperm.slane %v942_v63, %v4456_v60  ;;  %v1977_v46 = vperm.slane %v929_v57, %v4467_v15  ;;  %v953_v38 = vmul.f32 0.015625, %v4246_v48  ;;  %v944_v55 = vmul.f32 0.015625, %v4215_v5 }
 0x169   : > { %5980 = vst [vmem:[#allocation44_spill] sm:$0xff] %v4503_v49  ;;  %v4513_v43 = vpop.xlane.xlu0 %790  ;;  %v4526_v49 = vld [vmem:[%s4429_s30 + $0x18] sm:$0xff]   ;;  %v1975_v6 = vsel %vm1974_vm7, %v1973_v0, %v1971_v10  ;;  %v2019_v48 = vperm.slane %v943_v3, %v4481_v25  ;;  %v955_v5 = vmul.f32 0.015625, %v4259_v8 }
 0x16a   : > { %5981 = vst [vmem:[#allocation45_spill] sm:$0xff] %v4505_v59  ;;  %v3936_v59 = vld [vmem:[%s4429_s30 + $0x10] sm:$0xff]   ;;  %v3630_v56 = vunpack.c.l.bf16 %v4526_v49  ;;  %v1979_v10 = vsel %vm1978_vm8, %v1977_v46, %v1975_v6  ;;  %v2021_v8 = vperm.slane %v944_v55, %v4486_v34 }
 0x16b   : > { %5982 = vst [vmem:[#allocation46_spill] sm:$0xff] %v4513_v43  ;;  %v930_v43 = vmul.f32 0.015625, %v4177_v23  ;;  %v3627_v58 = vunpack.c.h.bf16 %v3936_v59  ;;  %v954_v23 = vmul.f32 0.015625, %v4261_v9  ;;  %v3626_v11 = vunpack.c.l.bf16 %v3936_v59 }
 0x16c   : > { %v2016_v9 = vsel %vm5930_vm4, %v2015_v2, %v2014_v42  ;;  %v945_v59 = vmul.f32 0.015625, %v4229_v20  ;;  %v1323_v0 = vsel %vm536_vm0, %v3630_v56, 0.0  ;;  %v3938_v20 = vld [vmem:[%s4429_s30 + $0x20] sm:$0xff]   ;;  %v932_v42 = vmul.f32 0.015625, %v4173_v21 }
 0x16d   : > { %1315 = vadd.xlane.f32.xlu2 %v1314_v30  ;;  %1312 = vadd.xlane.f32.xlu1 %v1311_v13  ;;  %v931_v30 = vmul.f32 0.015625, %v4175_v22  ;;  %v4550_v13 = vadd.s32 4294967176, %v4414_v24  ;;  %v1981_v57 = vperm.slane %v930_v43, %v4500_v1  ;;  %v2018_v22 = vsel %vm1966_vm5, %v2017_v12, %v2016_v9 }
 0x16e   : > { %1309 = vadd.xlane.f32.xlu0 %v1308_v52  ;;  %v1320_v7 = vsel %vm536_vm0, %v3627_v58, 0.0  ;;  %v2039_v43 = vperm.slane %v953_v38, %v4414_v24  ;;  %v2040_v3 = vperm.slane %v954_v23, %v4417_v62  ;;  %v1317_v2 = vsel %vm536_vm0, %v3626_v11, 0.0 }
 0x16f   : > { %v946_v12 = vmul.f32 0.015625, %v4227_v19  ;;  %v1983_v56 = vsel %vm1982_vm9, %v1981_v57, %v1979_v10  ;;  %v2020_v46 = vsel %vm1970_vm6, %v2019_v48, %v2018_v22  ;;  %v2023_v58 = vperm.slane %v945_v59, %v4467_v15 }
 0x170   : > { %v4553_v63 = vpop.xlane.xlu2 %805  ;;  %v4555_v29 = vpop.xlane.xlu1 %802  ;;  %v956_v38 = vmul.f32 0.015625, %v4257_v4  ;;  %v2042_v23 = vperm.slane %v955_v5, %v4443_v45  ;;  %v957_v21 = vmul.f32 0.015625, %v4271_v28  ;;  %v3635_v11 = vunpack.c.h.bf16 %v3938_v20 }
 0x171   : > { %5983 = vst [vmem:[#allocation47_spill] sm:$0xff] %v4555_v29  ;;  %v4561_v52 = vpop.xlane.xlu0 %799  ;;  %v1985_v29 = vperm.slane %v931_v30, %v4510_v39  ;;  %v3634_v6 = vunpack.c.l.bf16 %v3938_v20  ;;  %v933_v30 = vmul.f32 0.015625, %v4187_v33  ;;  %v947_v19 = vmul.f32 0.015625, %v4225_v18 }
 0x172   : > { %v2041_v55 = vsel %vm1950_vm1, %v2040_v3, %v2039_v43  ;;  %v3631_v57 = vunpack.c.h.bf16 %v4526_v49  ;;  %v1989_v48 = vperm.slane %v932_v42, %v4493_v61  ;;  %v2025_v4 = vperm.slane %v946_v12, %v4500_v1  ;;  %v4609_v42 = vld [vmem:[%s4429_s30 + $0x30] sm:$0xff]  }
 0x173   : > { %v2022_v9 = vsel %vm1974_vm7, %v2021_v8, %v2020_v46  ;;  %v948_v28 = vmul.f32 0.015625, %v4240_v37  ;;  %v1987_v18 = vsel %vm5928_vm10, %v1985_v29, %v1983_v56  ;;  %v2044_v49 = vperm.slane %v956_v38, %v4447_v40 }
 0x174   : > { %v2024_v22 = vsel %vm1978_vm8, %v2023_v58, %v2022_v9  ;;  %v958_v5 = vmul.f32 0.015625, %v4269_v27  ;;  %v2046_v37 = vperm.slane %v957_v21, %v4453_v41  ;;  %v1332_v10 = vsel %vm536_vm0, %v3635_v11, 0.0  ;;  %v3939_v27 = vld [vmem:[%s4429_s30 + $0x28] sm:$0xff]  }
 0x175   : > { %1324 = vadd.xlane.f32.xlu2 %v1323_v0  ;;  %1321 = vadd.xlane.f32.xlu1 %v1320_v7  ;;  %v2043_v7 = vsel %vm1954_vm2, %v2042_v23, %v2041_v55  ;;  %v1329_v43 = vsel %vm536_vm0, %v3634_v6, 0.0  ;;  %v934_v3 = vmul.f32 0.015625, %v4185_v32  ;;  %v1993_v29 = vperm.slane %v933_v30, %v4535_v54 }
 0x176   : > { %1318 = vadd.xlane.f32.xlu0 %v1317_v2  ;;  %v2027_v2 = vperm.slane %v947_v19, %v4510_v39  ;;  %v1326_v20 = vsel %vm536_vm0, %v3631_v57, 0.0  ;;  %v2026_v8 = vsel %vm1982_vm9, %v2025_v4, %v2024_v22  ;;  %v949_v12 = vmul.f32 0.015625, %v4238_v36 }
 0x177   : > { %v2029_v56 = vperm.slane %v948_v28, %v4493_v61  ;;  %v959_v46 = vmul.f32 0.015625, %v4267_v26  ;;  %v1991_v58 = vsel %vm5933_vm11, %v1989_v48, %v1987_v18  ;;  %v2048_v32 = vperm.slane %v958_v5, %v4456_v60 }
 0x178   : > { %v4590_v59 = vpop.xlane.xlu2 %814  ;;  %v4592_v33 = vpop.xlane.xlu1 %811  ;;  %v2045_v38 = vsel %vm1958_vm3, %v2044_v49, %v2043_v7  ;;  %v960_v23 = vmul.f32 0.015625, %v4282_v51  ;;  %v935_v21 = vmul.f32 0.015625, %v4183_v31  ;;  %v3642_v36 = vunpack.c.l.bf16 %v4609_v42 }
 0x179   : > { %v4598_v0 = vpop.xlane.xlu0 %808  ;;  %v2047_v11 = vsel %vm5930_vm4, %v2046_v37, %v2045_v38  ;;  %v3639_v6 = vunpack.c.h.bf16 %v3939_v27  ;;  %v1997_v26 = vperm.slane %v934_v3, %v4532_v14  ;;  %v1995_v30 = vsel %vm5934_vm12, %v1993_v29, %v1991_v58  ;;  %v5989_v38 = vld [vmem:[#allocation13_spill] sm:$0xff] }
 0x17a   : > { %v2028_v19 = vsel %vm5928_vm10, %v2027_v2, %v2026_v8  ;;  %v3638_v55 = vunpack.c.l.bf16 %v3939_v27  ;;  %v950_v57 = vmul.f32 0.015625, %v4236_v35  ;;  %v2031_v51 = vperm.slane %v949_v12, %v4535_v54  ;;  %v3941_v2 = vld [vmem:[%s4429_s30 + $0x38] sm:$0xff]   ;;  %v5987_v27 = vld [vmem:[#allocation3_spill] sm:$0xff] }
 0x17b   : > { %v2030_v48 = vsel %vm5933_vm11, %v2029_v56, %v2028_v19  ;;  %v2050_v31 = vperm.slane %v959_v46, %v4481_v25  ;;  %v2049_v28 = vsel %vm1966_vm5, %v2048_v32, %v2047_v11  ;;  %v961_v18 = vmul.f32 0.015625, %v4280_v47  ;;  %v5988_v46 = vld [vmem:[#allocation10_spill] sm:$0xff] }
 0x17c   : > { %v2052_v22 = vperm.slane %v960_v23, %v4486_v34  ;;  %v970_v35 = vmul.f32 0.015625, %v4311_v16  ;;  %v2001_v5 = vperm.slane %v935_v21, %v4521_v53  ;;  %v969_v7 = vmul.f32 0.015625, %v4313_v17  ;;  %v4651_v16 = vld [vmem:[%s4429_s30 + $0x40] sm:$0xff]  }
 0x17d   : > { %1333 = vadd.xlane.f32.xlu2 %v1332_v10  ;;  %1330 = vadd.xlane.f32.xlu1 %v1329_v43  ;;  %v1341_v37 = vsel %vm536_vm0, %v3642_v36, 0.0  ;;  %v1338_v10 = vsel %vm536_vm0, %v3639_v6, 0.0  ;;  %v1999_v43 = vsel %vm1998_vm13, %v1997_v26, %v1995_v30  ;;  %v4646_v3 = vmul.f32 0.015625, %v4198_v44  ;;  %v5990_v36 = vld [vmem:[#allocation2_spill] sm:$0xff] }
 0x17e   : > { %1327 = vadd.xlane.f32.xlu0 %v1326_v20  ;;  %v951_v47 = vmul.f32 0.015625, %v4250_v50  ;;  %v1335_v29 = vsel %vm536_vm0, %v3638_v55, 0.0  ;;  %v2033_v20 = vperm.slane %v950_v57, %v4532_v14  ;;  %v2032_v17 = vsel %vm5934_vm12, %v2031_v51, %v2030_v48  ;;  %v5991_v30 = vld [vmem:[#allocation6_spill] sm:$0xff] }
 0x17f   : > { %v962_v8 = vmul.f32 0.015625, %v5987_v27  ;;  %v2051_v12 = vsel %vm1970_vm6, %v2050_v31, %v2049_v28  ;;  %v2054_v56 = vperm.slane %v961_v18, %v4467_v15  ;;  %v971_v58 = vmul.f32 0.015625, %v5988_v46  ;;  %v5994_v46 = vld [vmem:[#allocation11_spill] sm:$0xff]  ;;  %v6007_v51 = vld [vmem:[#allocation26_spill] sm:$0xff] }
 0x180   : > { %v4630_v4 = vpop.xlane.xlu2 %823  ;;  %v4632_v9 = vpop.xlane.xlu1 %820  ;;  %v2053_v44 = vsel %vm1974_vm7, %v2052_v22, %v2051_v12  ;;  %v2071_v50 = vperm.slane %v970_v35, %v4417_v62  ;;  %v2070_v32 = vperm.slane %v969_v7, %v4414_v24  ;;  %v972_v23 = vmul.f32 0.015625, %v5989_v38  ;;  %v5992_v35 = vld [vmem:[#allocation5_spill] sm:$0xff]  ;;  %v5993_v7 = vld [vmem:[#allocation12_spill] sm:$0xff]  ;;  %v4695_v12 = vld [vmem:[%s4429_s30 + $0x80] sm:$0xff]  }
 0x181   : > { %5984 = vst [vmem:[#allocation48_spill] sm:$0xff] %v4630_v4  ;;  %v4638_v49 = vpop.xlane.xlu0 %817  ;;  %v3650_v21 = vunpack.c.l.bf16 %v4651_v16  ;;  %v3646_v11 = vunpack.c.l.bf16 %v3941_v2  ;;  %v952_v6 = vmul.f32 0.015625, %v5990_v36  ;;  %v2035_v26 = vperm.slane %v951_v47, %v4521_v53  ;;  %v5996_v38 = vld [vmem:[#allocation24_spill] sm:$0xff]  ;;  %v6008_v4 = vld [vmem:[#allocation31_spill] sm:$0xff] }
 0x182   : > { %5985 = vst [vmem:[#allocation49_spill] sm:$0xff] %v4632_v9  ;;  %v963_v19 = vmul.f32 0.015625, %v5991_v30  ;;  %v3643_v55 = vunpack.c.h.bf16 %v4609_v42  ;;  %v4670_v57 = vsel %vm5929_vm14, %v2001_v5, %v1999_v43  ;;  %v2034_v48 = vsel %vm1998_vm13, %v2033_v20, %v2032_v17 }
 0x183   : > { %5986 = vst [vmem:[#allocation50_spill] sm:$0xff] %v4638_v49  ;;  %v2056_v31 = vperm.slane %v962_v8, %v4500_v1  ;;  %v2055_v22 = vsel %vm1978_vm8, %v2054_v56, %v2053_v44  ;;  %v964_v42 = vmul.f32 0.015625, %v5992_v35  ;;  %v2073_v5 = vperm.slane %v971_v58, %v4443_v45  ;;  %v4698_v56 = vld [vmem:[%s4429_s30 + $0x48] sm:$0xff]  }
 0x184   : > { %v2072_v43 = vsel %vm1950_vm1, %v2071_v50, %v2070_v32  ;;  %v2075_v47 = vperm.slane %v972_v23, %v4447_v40  ;;  %v1347_v2 = vsel %vm536_vm0, %v3646_v11, 0.0  ;;  %v2037_v20 = vperm.slane %v952_v6, %v4550_v13  ;;  %v5995_v50 = vld [vmem:[#allocation23_spill] sm:$0xff] }
 0x185   : > { %1342 = vadd.xlane.f32.xlu2 %v1341_v37  ;;  %1339 = vadd.xlane.f32.xlu1 %v1338_v10  ;;  %v973_v37 = vmul.f32 0.015625, %v5993_v7  ;;  %v2036_v17 = vsel %vm5929_vm14, %v2035_v26, %v2034_v48  ;;  %v2058_v27 = vperm.slane %v963_v19, %v4510_v39  ;;  %v1344_v8 = vsel %vm536_vm0, %v3643_v55, 0.0  ;;  %v5998_v26 = vld [vmem:[#allocation16_spill] sm:$0xff] }
 0x186   : > { %1336 = vadd.xlane.f32.xlu0 %v1335_v29  ;;  %v1353_v29 = vsel %vm536_vm0, %v3650_v21, 0.0  ;;  %v2057_v44 = vsel %vm1982_vm9, %v2056_v31, %v2055_v22  ;;  %v974_v58 = vmul.f32 0.015625, %v5994_v46  ;;  %v986_v32 = vmul.f32 0.015625, %v5995_v50  ;;  %v5997_v21 = vld [vmem:[#allocation4_spill] sm:$0xff] }
 0x187   : > { %v985_v23 = vmul.f32 0.015625, %v5996_v38  ;;  %v965_v11 = vmul.f32 0.015625, %v5997_v21  ;;  %v2077_v36 = vperm.slane %v973_v37, %v4453_v41  ;;  %v2074_v6 = vsel %vm1954_vm2, %v2073_v5, %v2072_v43  ;;  %v5999_v7 = vld [vmem:[#allocation28_spill] sm:$0xff] }
 0x188   : > { %v4676_v28 = vpop.xlane.xlu2 %832  ;;  %v4678_v18 = vpop.xlane.xlu1 %829  ;;  %v975_v30 = vmul.f32 0.015625, %v5998_v26  ;;  %v2060_v19 = vperm.slane %v964_v42, %v4493_v61  ;;  %v2076_v55 = vsel %vm1958_vm3, %v2075_v47, %v2074_v6  ;;  %v3682_v48 = vunpack.c.l.bf16 %v4695_v12  ;;  %v6003_v6 = vld [vmem:[#allocation8_spill] sm:$0xff] }
 0x189   : > { %v4684_v10 = vpop.xlane.xlu0 %826  ;;  %v3654_v31 = vunpack.c.l.bf16 %v4698_v56  ;;  %v4713_v22 = vsel %vm2006_vm15, %v2037_v20, %v2036_v17  ;;  %v2059_v35 = vsel %vm5928_vm10, %v2058_v27, %v2057_v44  ;;  %v987_v5 = vmul.f32 0.015625, %v5999_v7  ;;  %v6001_v17 = vld [vmem:[#allocation9_spill] sm:$0xff] }
 0x18a   : > { %v3651_v37 = vunpack.c.h.bf16 %v4651_v16  ;;  %v2079_v43 = vperm.slane %v974_v58, %v4456_v60  ;;  %v2102_v47 = vperm.slane %v986_v32, %v4417_v62  ;;  %v2062_v20 = vperm.slane %v965_v11, %v4535_v54  ;;  %v6002_v32 = vld [vmem:[#allocation27_spill] sm:$0xff]  ;;  %v6004_v11 = vld [vmem:[#allocation14_spill] sm:$0xff] }
 0x18b   : > { %v966_v27 = vmul.f32 0.015625, %v6001_v17  ;;  %v2078_v44 = vsel %vm5930_vm4, %v2077_v36, %v2076_v55  ;;  %v2081_v16 = vperm.slane %v975_v30, %v4481_v25  ;;  %v2061_v50 = vsel %vm5933_vm11, %v2060_v19, %v2059_v35  ;;  %v4741_v30 = vld [vmem:[%s4429_s30 + $0x88] sm:$0xff]  }
 0x18c   : > { %v988_v38 = vmul.f32 0.015625, %v6002_v32  ;;  %v1359_v21 = vsel %vm536_vm0, %v3654_v31, 0.0  ;;  %vm5932_vm10 = vcmask 1041409   ;;  %v967_v26 = vmul.f32 0.015625, %v6003_v6  ;;  %v6005_v35 = vld [vmem:[#allocation19_spill] sm:$0xff] }
 0x18d   : > { %1354 = vadd.xlane.f32.xlu2 %v1353_v29  ;;  %1348 = vadd.xlane.f32.xlu1 %v1347_v2  ;;  %v6000_v29 = vld [vmem:[#allocation15_spill] sm:$0xff]  ;;  %v2101_v2 = vperm.slane %v985_v23, %v4414_v24  ;;  %v1401_v23 = vsel %vm536_vm0, %v3682_v48, 0.0  ;;  %v977_v7 = vmul.f32 0.015625, %v6004_v11  ;;  %v1356_v36 = vsel %vm536_vm0, %v3651_v37, 0.0 }
 0x18e   : > { %1345 = vadd.xlane.f32.xlu0 %v1344_v8  ;;  %v976_v42 = vmul.f32 0.015625, %v6000_v29  ;;  %v2104_v29 = vperm.slane %v987_v5, %v4443_v45  ;;  %v2080_v19 = vsel %vm1966_vm5, %v2079_v43, %v2078_v44  ;;  %v978_v17 = vmul.f32 0.015625, %v6005_v35  ;;  %v6006_v31 = vld [vmem:[#allocation7_spill] sm:$0xff] }
 0x18f   : > { %v2103_v48 = vsel %vm1950_vm1, %v2102_v47, %v2101_v2  ;;  %v968_v32 = vmul.f32 0.015625, %v6006_v31  ;;  %v2064_v6 = vperm.slane %v966_v27, %v4532_v14  ;;  %v2082_v11 = vsel %vm1970_vm6, %v2081_v16, %v2080_v19  ;;  %v6009_v2 = vld [vmem:[#allocation18_spill] sm:$0xff]  ;;  %v4778_v31 = vld [vmem:[%s4429_s30 + $0x50] sm:$0xff]  }
 0x190   : > { %v4722_v8 = vpop.xlane.xlu2 %841  ;;  %v4724_v46 = vpop.xlane.xlu1 %838  ;;  %v2083_v55 = vperm.slane %v976_v42, %v4486_v34  ;;  %v989_v5 = vmul.f32 0.015625, %v6007_v51  ;;  %v2106_v37 = vperm.slane %v988_v38, %v4447_v40  ;;  %v990_v42 = vmul.f32 0.015625, %v6008_v4  ;;  %v6011_v19 = vld [vmem:[#allocation30_spill] sm:$0xff] }
 0x191   : > { %v4730_v58 = vpop.xlane.xlu0 %835  ;;  %v3686_v43 = vunpack.c.l.bf16 %v4741_v30  ;;  %v3655_v44 = vunpack.c.h.bf16 %v4698_v56  ;;  %v2085_v47 = vperm.slane %v977_v7, %v4467_v15  ;;  %v979_v35 = vmul.f32 0.015625, %v6009_v2 }
 0x192   : > { %v2105_v27 = vsel %vm1954_vm2, %v2104_v29, %v2103_v48  ;;  %v3683_v16 = vunpack.c.h.bf16 %v4695_v12  ;;  %v2066_v51 = vperm.slane %v967_v26, %v4521_v53  ;;  %v2063_v38 = vsel %vm5934_vm12, %v2062_v20, %v2061_v50 }
 0x193   : > { %v2084_v4 = vsel %vm1974_vm7, %v2083_v55, %v2082_v11  ;;  %v2065_v7 = vsel %vm1998_vm13, %v2064_v6, %v2063_v38  ;;  %v2108_v12 = vperm.slane %v989_v5, %v4453_v41  ;;  %v991_v48 = vmul.f32 0.015625, %v6011_v19  ;;  %v3958_v38 = vld [vmem:[%s4429_s30 + $0xc0] sm:$0xff]  }
 0x194   : > { %v2107_v20 = vsel %vm1958_vm3, %v2106_v37, %v2105_v27  ;;  %v2110_v50 = vperm.slane %v990_v42, %v4456_v60  ;;  %v1407_v55 = vsel %vm536_vm0, %v3686_v43, 0.0  ;;  %v2068_v6 = vperm.slane %v968_v32, %v4550_v13  ;;  %v6013_v27 = vld [vmem:[#allocation29_spill] sm:$0xff] }
 0x195   : > { %1402 = vadd.xlane.f32.xlu2 %v1401_v23  ;;  %1360 = vadd.xlane.f32.xlu1 %v1359_v21  ;;  %v2087_v23 = vperm.slane %v978_v17, %v4500_v1  ;;  %v1362_v17 = vsel %vm536_vm0, %v3655_v44, 0.0  ;;  %v2089_v11 = vperm.slane %v979_v35, %v4510_v39  ;;  %v2086_v5 = vsel %vm1978_vm8, %v2085_v47, %v2084_v4  ;;  %v6014_v47 = vld [vmem:[#allocation34_spill] sm:$0xff] }
 0x196   : > { %1357 = vadd.xlane.f32.xlu0 %v1356_v36  ;;  %v6010_v36 = vld [vmem:[#allocation17_spill] sm:$0xff]  ;;  %v1404_v2 = vsel %vm536_vm0, %v3683_v16, 0.0  ;;  %v6012_v37 = vperm.slane %v4646_v3, %v4550_v13  ;;  %v2067_v43 = vsel %vm5929_vm14, %v2066_v51, %v2065_v7  ;;  %v2112_v32 = vperm.slane %v991_v48, %v4481_v25  ;;  %v6016_v48 = vld [vmem:[#allocation22_spill] sm:$0xff] }
 0x197   : > { %v980_v29 = vmul.f32 0.015625, %v6010_v36  ;;  %v2088_v44 = vsel %vm1982_vm9, %v2087_v23, %v2086_v5  ;;  %v992_v36 = vmul.f32 0.015625, %v6013_v27  ;;  %v2109_v35 = vsel %vm5930_vm4, %v2108_v12, %v2107_v20  ;;  %v6018_v5 = vld [vmem:[#allocation38_spill] sm:$0xff]  ;;  %v3327_v27 = vld [vmem:[%s5923_s2 + $0x74] sm:$0xf0] }
 0x198   : > { %v4763_v21 = vpop.xlane.xlu2 %850  ;;  %v4765_v56 = vpop.xlane.xlu1 %847  ;;  %v2007_v42 = vsel %vm2006_vm15, %v6012_v37, %v4670_v57  ;;  %v993_v4 = vmul.f32 0.015625, %v6014_v47  ;;  %v3658_v16 = vunpack.c.l.bf16 %v4778_v31  ;;  %v2111_v51 = vsel %vm1966_vm5, %v2110_v50, %v2109_v35  ;;  %v4833_v47 = vld [vmem:[%s4429_s30 + $0x100] sm:$0xff]  }
 0x199   : > { %v4771_v26 = vpop.xlane.xlu0 %844  ;;  %v2226_v3 = vsel %vm5932_vm10, %v4713_v22, %v2007_v42  ;;  %v2091_v57 = vperm.slane %v980_v29, %v4493_v61  ;;  %v3715_v23 = vunpack.c.h.bf16 %v3958_v38  ;;  %v2069_v7 = vsel %vm2006_vm15, %v2068_v6, %v2067_v43 }
 0x19a   : > { %vm6015_vm14 = vcmask 720512   ;;  %vm5931_vm4 = vcmask 1042434   ;;  %v3714_v12 = vunpack.c.l.bf16 %v3958_v38  ;;  %v4804_v20 = vmul.f32 0.015625, %v6016_v48  ;;  %v6021_v38 = vld [vmem:[#allocation43_spill] sm:$0xff]  ;;  %v6023_v48 = vld [vmem:[#allocation20_spill] sm:$0xff] }
 0x19b   : > { %v2090_v19 = vsel %vm6015_vm14, %v2089_v11, %v2088_v44  ;;  %v4809_v29 = vmul.f32 0.015625, %v6018_v5  ;;  %v2113_v6 = vsel %vm1970_vm6, %v2112_v32, %v2111_v51  ;;  %v2116_v11 = vperm.slane %v993_v4, %v4467_v15  ;;  %v3174_v44 = vld [vmem:[%s5923_s2 + $0x70] sm:$0xf]  ;;  %v3176_v51 = vld [vmem:[%s5923_s2 + $0x78] sm:$0xf0] }
 0x19c   : > { %v1002_v37 = vmul.f32 0.015625, %v6021_v38  ;;  %v1365_v43 = vsel %vm536_vm0, %v3658_v16, 0.0  ;;  %v4829_v32 = vsel %vm5931_vm4, %v2069_v7, %v2226_v3  ;;  %v1452_v35 = vsel %vm536_vm0, %v3715_v23, 0.0  ;;  %v3326_v16 = vld [vmem:[%s5923_s2 + $0x74] sm:$0xf]  ;;  %v4847_v7 = vld [vmem:[%s4429_s30 + $0xc8] sm:$0xff]  }
 0x19d   : > { %1408 = vadd.xlane.f32.xlu2 %v1407_v55  ;;  %1363 = vadd.xlane.f32.xlu1 %v1362_v17  ;;  %v2114_v55 = vperm.slane %v992_v36, %v4486_v34  ;;  %v6017_v17 = vld [vmem:[#allocation33_spill] sm:$0xff]  ;;  %v2092_v36 = vsel %vm5933_vm11, %v2091_v57, %v2090_v19  ;;  %6022 = vst [vmem:[#allocation13_spill] sm:$0xff] %v4829_v32  ;;  %v6024_v57 = vld [vmem:[#allocation32_spill] sm:$0xff]  ;;  %v1449_v3 = vsel %vm536_vm0, %v3714_v12, 0.0  ;;  %v3746_v12 = vunpack.c.l.bf16 %v4833_v47 }
 0x19e   : > { %1405 = vadd.xlane.f32.xlu0 %v1404_v2  ;;  %v994_v22 = vmul.f32 0.015625, %v6017_v17  ;;  %v3175_v4 = vor.u32 %v3327_v27, %v3174_v44  ;;  %v4842_v17 = vmul.f32 0.015625, %v6023_v48  ;;  %v995_v19 = vmul.f32 0.015625, %v6024_v57  ;;  %v6025_v5 = vld [vmem:[#allocation21_spill] sm:$0xff]  ;;  %v6027_v57 = vld [vmem:[#allocation42_spill] sm:$0xff] }
 0x19f   : > { %v3179_v23 = vor.u32 %v3326_v16, %v3176_v51  ;;  %v982_v38 = vmul.f32 0.015625, %v6025_v5  ;;  %v2115_v27 = vsel %vm1974_vm7, %v2114_v55, %v2113_v6  ;;  %v6026_v32 = vld [vmem:[#allocation37_spill] sm:$0xff]  ;;  %v2093_v48 = vperm.slane %v4804_v20, %v4535_v54  ;;  %v3325_v55 = vld [vmem:[%s5923_s2 + $0x64] sm:$0xf0]  ;;  %v6028_v16 = vld [vmem:[#allocation36_spill] sm:$0xff] }
 0x1a0   : > { %v4811_v50 = vpop.xlane.xlu2 %859  ;;  %v4813_v2 = vpop.xlane.xlu1 %856  ;;  %v2118_v44 = vperm.slane %v994_v22, %v4500_v1  ;;  %2824 = vmatpush.bf16.msra.mxu0 %v3175_v4  ;;  %v2117_v9 = vsel %vm1978_vm8, %v2116_v11, %v2115_v27  ;;  %v3166_v22 = vld [vmem:[%s5923_s2 + $0x60] sm:$0xf]  ;;  %v2132_v6 = vperm.slane %v4809_v29, %v4414_v24  ;;  %v2133_v20 = vperm.slane %v1002_v37, %v4417_v62  ;;  %v6029_v5 = vld [vmem:[#allocation35_spill] sm:$0xff] }
 0x1a1   : > { %6019 = vst [vmem:[#allocation3_spill] sm:$0xff] %v4811_v50  ;;  %v4818_v42 = vpop.xlane.xlu0 %853  ;;  %v996_v50 = vmul.f32 0.015625, %v6026_v32  ;;  %v3718_v11 = vunpack.c.l.bf16 %v4847_v7  ;;  %2850 = vmatpush.bf16.msra.mxu2 %v3179_v23  ;;  %v3324_v32 = vld [vmem:[%s5923_s2 + $0x64] sm:$0xf]  ;;  %v2120_v4 = vperm.slane %v995_v19, %v4510_v39  ;;  %v997_v51 = vmul.f32 0.015625, %v6028_v16 }
 0x1a2   : > { %6020 = vst [vmem:[#allocation10_spill] sm:$0xff] %v4813_v2  ;;  %v1003_v2 = vmul.f32 0.015625, %v6027_v57  ;;  %v3687_v29 = vunpack.c.h.bf16 %v4741_v30  ;;  %v4879_v23 = vmul.f32 0.015625, %v6029_v5  ;;  %v6030_v57 = vld [vmem:[#allocation41_spill] sm:$0xff]  ;;  %v2095_v19 = vperm.slane %v982_v38, %v4532_v14  ;;  %v4903_v5 = vld [vmem:[%s4429_s30 + $0x90] sm:$0xff]  }
 0x1a3   : > { %v2122_v27 = vperm.slane %v996_v50, %v4493_v61  ;;  %v3158_v50 = vld [vmem:[%s5923_s2 + $0x50] sm:$0xf]  ;;  %v3323_v16 = vld [vmem:[%s5923_s2 + $0x54] sm:$0xf0]  ;;  %v2134_v38 = vsel %vm1950_vm1, %v2133_v20, %v2132_v6  ;;  %v2097_v20 = vperm.slane %v4842_v17, %v4521_v53  ;;  %v3150_v17 = vld [vmem:[%s5923_s2 + $0x40] sm:$0xf] }
 0x1a4   : > { %v2135_v30 = vperm.slane %v1003_v2, %v4443_v45  ;;  %v1455_v2 = vsel %vm536_vm0, %v3718_v11, 0.0  ;;  %vm6040_vm4 = vcmask 326912   ;;  %vm6052_vm10 = vcmask 982912  }
 0x1a5   : > { %1366 = vadd.xlane.f32.xlu2 %v1365_v43  ;;  %1453 = vadd.xlane.f32.xlu1 %v1452_v35  ;;  %v3167_v43 = vor.u32 %v3325_v55, %v3166_v22  ;;  %v3168_v35 = vld [vmem:[%s5923_s2 + $0x68] sm:$0xf0]  ;;  %v1004_v22 = vmul.f32 0.015625, %v6030_v57  ;;  %v3159_v57 = vor.u32 %v3323_v16, %v3158_v50  ;;  %v6035_v50 = vld [vmem:[#allocation45_spill] sm:$0xff] }
 0x1a6   : > { %1450 = vadd.xlane.f32.xlu0 %v1449_v3  ;;  %v3171_v37 = vor.u32 %v3324_v32, %v3168_v35  ;;  %v2119_v3 = vsel %vm1982_vm9, %v2118_v44, %v2117_v9  ;;  %v6033_v32 = vld [vmem:[#allocation46_spill] sm:$0xff]  ;;  %v1497_v44 = vsel %vm536_vm0, %v3746_v12, 0.0  ;;  %v3322_v12 = vld [vmem:[%s5923_s2 + $0x54] sm:$0xf]  ;;  %v1006_v16 = vmul.f32 0.015625, %v6035_v50 }
 0x1a7   : > { %2825 = vmatpush.bf16.msra.mxu0 %v3167_v43  ;;  %v1005_v35 = vmul.f32 0.015625, %v6033_v32  ;;  %v2094_v43 = vsel %vm5934_vm12, %v2093_v48, %v2092_v36  ;;  %v3160_v32 = vld [vmem:[%s5923_s2 + $0x58] sm:$0xf0]  ;;  %v2121_v36 = vsel %vm6015_vm14, %v2120_v4, %v2119_v3  ;;  %v1410_v48 = vsel %vm536_vm0, %v3687_v29, 0.0  ;;  %v3321_v29 = vld [vmem:[%s5923_s2 + $0x44] sm:$0xf0] }
 0x1a8   : > { %v4883_v55 = vpop.xlane.xlu2 %868  ;;  %v4885_v49 = vpop.xlane.xlu1 %865  ;;  %2851 = vmatpush.bf16.msra.mxu2 %v3171_v37  ;;  %v3163_v6 = vor.u32 %v3322_v12, %v3160_v32  ;;  %v2123_v11 = vsel %vm5933_vm11, %v2122_v27, %v2121_v36  ;;  %v2137_v37 = vperm.slane %v1004_v22, %v4447_v40  ;;  %v3690_v4 = vunpack.c.l.bf16 %v4903_v5  ;;  %v6036_v3 = vld [vmem:[#allocation25_spill] sm:$0xff]  ;;  %v6038_v12 = vld [vmem:[#allocation39_spill] sm:$0xff] }
 0x1a9   : > { %6031 = vst [vmem:[#allocation2_spill] sm:$0xff] %v4883_v55  ;;  %v4890_v9 = vpop.xlane.xlu0 %862  ;;  %v2124_v55 = vperm.slane %v997_v51, %v4535_v54  ;;  %v2139_v51 = vperm.slane %v1005_v35, %v4453_v41  ;;  %v4930_v27 = vmul.f32 0.015625, %v6036_v3  ;;  %v2126_v22 = vperm.slane %v4879_v23, %v4532_v14  ;;  %v3320_v35 = vld [vmem:[%s5923_s2 + $0x44] sm:$0xf]  ;;  %v6041_v3 = vld [vmem:[#allocation40_spill] sm:$0xff] }
 0x1aa   : > { %6032 = vst [vmem:[#allocation6_spill] sm:$0xff] %v4885_v49  ;;  %v2096_v49 = vsel %vm1998_vm13, %v2095_v19, %v2094_v43  ;;  %v3659_v19 = vunpack.c.h.bf16 %v4778_v31  ;;  %v4945_v32 = vmul.f32 0.015625, %v6038_v12  ;;  %v2141_v31 = vperm.slane %v1006_v16, %v4456_v60 }
 0x1ab   : > { %6034 = vst [vmem:[#allocation5_spill] sm:$0xff] %v4890_v9  ;;  %2826 = vmatpush.bf16.msra.mxu0 %v3159_v57  ;;  %v2136_v9 = vsel %vm1954_vm2, %v2135_v30, %v2134_v38  ;;  %v3151_v30 = vor.u32 %v3321_v29, %v3150_v17  ;;  %v2125_v43 = vsel %vm5934_vm12, %v2124_v55, %v2123_v11  ;;  %v6037_v38 = vld [vmem:[#allocation44_spill] sm:$0xff]  ;;  %v3747_v57 = vunpack.c.h.bf16 %v4833_v47  ;;  %v3144_v29 = vld [vmem:[%s5923_s2 + $0x38] sm:$0xf0] }
 0x1ac   : > { %2852 = vmatpush.bf16.msra.mxu2 %v3163_v6  ;;  %v2138_v36 = vsel %vm1958_vm3, %v2137_v37, %v2136_v9  ;;  %vm6039_vm14 = vcmask 982912   ;;  %v1017_v47 = vmul.f32 0.015625, %v4684_v10  ;;  %v1413_v16 = vsel %vm536_vm0, %v3690_v4, 0.0  ;;  %v3142_v9 = vld [vmem:[%s5923_s2 + $0x30] sm:$0xf]  ;;  %v4971_v37 = vld [vmem:[%s4429_s30 + $0x140] sm:$0xff]  }
 0x1ad   : > { %1498 = vadd.xlane.f32.xlu2 %v1497_v44  ;;  %1456 = vadd.xlane.f32.xlu1 %v1455_v2  ;;  %v3152_v44 = vld [vmem:[%s5923_s2 + $0x48] sm:$0xf0]  ;;  %v1007_v2 = vmul.f32 0.015625, %v6037_v38  ;;  %v4951_v55 = vsel %vm6039_vm14, %v2097_v20, %v2096_v49  ;;  %v2140_v11 = vsel %vm6040_vm4, %v2139_v51, %v2138_v36  ;;  %v4967_v20 = vsel %vm1998_vm13, %v2126_v22, %v2125_v43  ;;  %v3318_v4 = vld [vmem:[%s5923_s2 + $0x34] sm:$0xf] }
 0x1ae   : > { %1411 = vadd.xlane.f32.xlu0 %v1410_v48  ;;  %v3155_v23 = vor.u32 %v3320_v35, %v3152_v44  ;;  %v1018_v48 = vmul.f32 0.015625, %v4678_v18  ;;  %v3319_v18 = vld [vmem:[%s5923_s2 + $0x34] sm:$0xf0]  ;;  %v1368_v10 = vsel %vm536_vm0, %v3659_v19, 0.0  ;;  %v1500_v35 = vsel %vm536_vm0, %v3747_v57, 0.0  ;;  %v4985_v19 = vld [vmem:[%s4429_s30 + $0x108] sm:$0xff]  }
 0x1af   : > { %2827 = vmatpush.bf16.msra.mxu0 %v3151_v30  ;;  %v3143_v51 = vor.u32 %v3319_v18, %v3142_v9  ;;  %v4980_v30 = vmul.f32 0.015625, %v6041_v3  ;;  %v2143_v22 = vperm.slane %v1007_v2, %v4481_v25  ;;  %v3147_v44 = vor.u32 %v3318_v4, %v3144_v29 }
 0x1b0   : > { %v878_v6 = vpop.xlane.xlu2 %877  ;;  %v875_v50 = vpop.xlane.xlu1 %874  ;;  %2853 = vmatpush.bf16.msra.mxu2 %v3155_v23  ;;  %v2142_v43 = vsel %vm1966_vm5, %v2141_v31, %v2140_v11  ;;  %v4989_v38 = vmul.f32 0.015625, %v4553_v63  ;;  %v1008_v23 = vmul.f32 0.015625, %v4561_v52  ;;  %v1019_v12 = vmul.f32 0.015625, %v4676_v28  ;;  %v3134_v63 = vld [vmem:[%s5923_s2 + $0x20] sm:$0xf]  ;;  %v6042_v31 = vld [vmem:[#allocation47_spill] sm:$0xff] }
 0x1b1   : > { %v4955_v17 = vpop.xlane.xlu0 %871  ;;  %v2164_v36 = vperm.slane %v1018_v48, %v4417_v62  ;;  %v2163_v9 = vperm.slane %v1017_v47, %v4414_v24  ;;  %v1020_v2 = vmul.f32 0.015625, %v4730_v58  ;;  %v3778_v57 = vunpack.c.l.bf16 %v4971_v37  ;;  %v3317_v52 = vld [vmem:[%s5923_s2 + $0x24] sm:$0xf0]  ;;  %v3316_v47 = vld [vmem:[%s5923_s2 + $0x24] sm:$0xf] }
 0x1b2   : > { %v5006_v48 = vmul.f32 0.015625, %v6042_v31  ;;  %v3750_v58 = vunpack.c.l.bf16 %v4985_v19  ;;  %v3135_v11 = vor.u32 %v3317_v52, %v3134_v63  ;;  %v1034_v18 = vmul.f32 0.015625, %v878_v6 }
 0x1b3   : > { %2828 = vmatpush.bf16.msra.mxu0 %v3143_v51  ;;  %v3719_v51 = vunpack.c.h.bf16 %v4847_v7  ;;  %v2149_v29 = vperm.slane %v4989_v38, %v4500_v1  ;;  %v2144_v3 = vsel %vm1970_vm6, %v2143_v22, %v2142_v43  ;;  %v2165_v31 = vsel %vm1950_vm1, %v2164_v36, %v2163_v9  ;;  %v3126_v22 = vld [vmem:[%s5923_s2 + $0x10] sm:$0xf]  ;;  %v3315_v43 = vld [vmem:[%s5923_s2 + $0x14] sm:$0xf0]  ;;  %v3314_v9 = vld [vmem:[%s5923_s2 + $0x14] sm:$0xf] }
 0x1b4   : > { %2854 = vmatpush.bf16.msra.mxu2 %v3147_v44  ;;  %v2166_v44 = vperm.slane %v1019_v12, %v4443_v45  ;;  %v1021_v6 = vmul.f32 0.015625, %v4724_v46  ;;  %v2168_v7 = vperm.slane %v1020_v2, %v4447_v40  ;;  %v1503_v46 = vsel %vm536_vm0, %v3750_v58, 0.0  ;;  %v3128_v2 = vld [vmem:[%s5923_s2 + $0x18] sm:$0xf0] }
 0x1b5   : > { %1414 = vadd.xlane.f32.xlu2 %v1413_v16  ;;  %1369 = vadd.xlane.f32.xlu1 %v1368_v10  ;;  %v3136_v16 = vld [vmem:[%s5923_s2 + $0x28] sm:$0xf0]  ;;  %v1033_v10 = vmul.f32 0.015625, %v875_v50  ;;  %v3127_v36 = vor.u32 %v3315_v43, %v3126_v22  ;;  %v1022_v22 = vmul.f32 0.015625, %v4722_v8  ;;  %vm6043_vm14 = vcmask 720512  }
 0x1b6   : > { %1501 = vadd.xlane.f32.xlu0 %v1500_v35  ;;  %v3139_v4 = vor.u32 %v3316_v47, %v3136_v16  ;;  %v2145_v35 = vperm.slane %v1008_v23, %v4486_v34  ;;  %v1545_v47 = vsel %vm536_vm0, %v3778_v57, 0.0  ;;  %v2147_v23 = vperm.slane %v5006_v48, %v4467_v15  ;;  %v5044_v48 = vld [vmem:[%s4429_s30 + $0x58] sm:$0xff]  }
 0x1b7   : > { %2829 = vmatpush.bf16.msra.mxu0 %v3135_v11  ;;  %v2195_v57 = vperm.slane %v1034_v18, %v4417_v62  ;;  %v2194_v11 = vperm.slane %v1033_v10, %v4414_v24  ;;  %v1458_v16 = vsel %vm536_vm0, %v3719_v51, 0.0  ;;  %v2167_v43 = vsel %vm1954_vm2, %v2166_v44, %v2165_v31  ;;  %v3118_v51 = vld [vmem:[%s5923_s2] sm:$0xf]  ;;  %v3312_v44 = vld [vmem:[%s5923_s2 + $0x4] sm:$0xf] }
 0x1b8   : > { %v887_v63 = vpop.xlane.xlu2 %886  ;;  %v884_v52 = vpop.xlane.xlu1 %883  ;;  %2855 = vmatpush.bf16.msra.mxu2 %v3139_v4  ;;  %v2146_v58 = vsel %vm1974_vm7, %v2145_v35, %v2144_v3  ;;  %v1011_v4 = vmul.f32 0.015625, %v4598_v0  ;;  %v2170_v28 = vperm.slane %v1021_v6, %v4453_v41  ;;  %v2169_v18 = vsel %vm1958_vm3, %v2168_v7, %v2167_v43  ;;  %v3313_v0 = vld [vmem:[%s5923_s2 + $0x4] sm:$0xf0] }
 0x1b9   : > { %v881_v50 = vpop.xlane.xlu0 %880  ;;  %v1023_v10 = vmul.f32 0.015625, %v4771_v26  ;;  %v1036_v49 = vmul.f32 0.015625, %v884_v52  ;;  %v3691_v3 = vunpack.c.h.bf16 %v4903_v5  ;;  %v3662_v35 = vunpack.c.l.bf16 %v5044_v48  ;;  %v3120_v52 = vld [vmem:[%s5923_s2 + $0x8] sm:$0xf0] }
 0x1ba   : > { %v1035_v12 = vmul.f32 0.015625, %v881_v50  ;;  %v3131_v50 = vor.u32 %v3314_v9, %v3128_v2  ;;  %v3119_v26 = vor.u32 %v3313_v0, %v3118_v51  ;;  %v1012_v31 = vmul.f32 0.015625, %v4592_v33  ;;  %v5095_v0 = vld [vmem:[%s4429_s30 + $0xd0] sm:$0xff]  }
 0x1bb   : > { %2830 = vmatpush.bf16.msra.mxu0 %v3127_v36  ;;  %v2196_v6 = vsel %vm1950_vm1, %v2195_v57, %v2194_v11  ;;  %v3779_v7 = vunpack.c.h.bf16 %v4971_v37  ;;  %v2148_v5 = vsel %vm1978_vm8, %v2147_v23, %v2146_v58  ;;  %v1037_v36 = vmul.f32 0.015625, %v887_v63 }
 0x1bc   : > { %v2197_v8 = vperm.slane %v1035_v12, %v4443_v45  ;;  %2856 = vmatpush.bf16.msra.mxu2 %v3131_v50  ;;  %v2151_v12 = vperm.slane %v1011_v4, %v4510_v39  ;;  %v1024_v33 = vmul.f32 0.015625, %v4765_v56  ;;  %v2174_v57 = vperm.slane %v1023_v10, %v4481_v25 }
 0x1bd   : > { %1546 = vadd.xlane.f32.xlu2 %v1545_v47  ;;  %1504 = vadd.xlane.f32.xlu1 %v1503_v46  ;;  %v3123_v47 = vor.u32 %v3312_v44, %v3120_v52  ;;  %v2172_v46 = vperm.slane %v1022_v22, %v4456_v60  ;;  %v2199_v37 = vperm.slane %v1036_v49, %v4447_v40  ;;  %v1416_v58 = vsel %vm536_vm0, %v3691_v3, 0.0  ;;  %v5089_v22 = vld [vmem:[%s4429_s30 + $0x148] sm:$0xff]  }
 0x1be   : > { %1459 = vadd.xlane.f32.xlu0 %v1458_v16  ;;  %v2171_v16 = vsel %vm6040_vm4, %v2170_v28, %v2169_v18  ;;  %v2198_v23 = vsel %vm1954_vm2, %v2197_v8, %v2196_v6  ;;  %v1371_v63 = vsel %vm536_vm0, %v3662_v35, 0.0  ;;  %v1013_v4 = vmul.f32 0.015625, %v4590_v59 }
 0x1bf   : > { %2831 = vmatpush.bf16.msra.mxu0 %v3119_v26  ;;  %v2153_v28 = vperm.slane %v1012_v31, %v4493_v61  ;;  %v2150_v56 = vsel %vm1982_vm9, %v2149_v29, %v2148_v5  ;;  %v1548_v49 = vsel %vm536_vm0, %v3779_v7, 0.0  ;;  %v2173_v18 = vsel %vm1966_vm5, %v2172_v46, %v2171_v16 }
 0x1c0   : > { %v896_v9 = vpop.xlane.xlu2 %895  ;;  %v893_v2 = vpop.xlane.xlu1 %892  ;;  %2857 = vmatpush.bf16.msra.mxu2 %v3123_v47  ;;  %v2152_v43 = vsel %vm6043_vm14, %v2151_v12, %v2150_v56  ;;  %v2201_v10 = vperm.slane %v1037_v36, %v4453_v41  ;;  %v1025_v59 = vmul.f32 0.015625, %v4763_v21  ;;  %v2176_v8 = vperm.slane %v1024_v33, %v4486_v34  ;;  %v6044_v47 = vld [vmem:[#allocation50_spill] sm:$0xff] }
 0x1c1   : > { %v890_v11 = vpop.xlane.xlu0 %889  ;;  %v1039_v51 = vmul.f32 0.015625, %v893_v2  ;;  %v2200_v38 = vsel %vm1958_vm3, %v2199_v37, %v2198_v23  ;;  %v2175_v3 = vsel %vm1970_vm6, %v2174_v57, %v2173_v18  ;;  %v1026_v35 = vmul.f32 0.015625, %v4818_v42  ;;  %v6045_v2 = vld [vmem:[#allocation10_spill] sm:$0xff] }
 0x1c2   : > { %v1038_v50 = vmul.f32 0.015625, %v890_v11  ;;  %v3782_v26 = vunpack.c.l.bf16 %v5089_v22  ;;  %v3751_v44 = vunpack.c.h.bf16 %v4985_v19  ;;  %v2128_v21 = vperm.slane %v4980_v30, %v4521_v53  ;;  %v3982_v56 = vld [vmem:[%s4429_s30 + $0x180] sm:$0xff]  }
 0x1c3   : > { %v2155_v52 = vperm.slane %v1013_v4, %v4535_v54  ;;  %v1040_v31 = vmul.f32 0.015625, %v896_v9  ;;  %v3722_v6 = vunpack.c.l.bf16 %v5095_v0  ;;  %v2154_v7 = vsel %vm5933_vm11, %v2153_v28, %v2152_v43  ;;  %v6047_v43 = vld [vmem:[#allocation3_spill] sm:$0xff] }
 0x1c4   : > { %v2203_v29 = vperm.slane %v1038_v50, %v4456_v60  ;;  %v1014_v5 = vmul.f32 0.015625, %v6044_v47  ;;  %v2205_v12 = vperm.slane %v1039_v51, %v4481_v25  ;;  %v2202_v42 = vsel %vm6040_vm4, %v2201_v10, %v2200_v38  ;;  %v6046_v50 = vld [vmem:[#allocation49_spill] sm:$0xff] }
 0x1c5   : > { %1417 = vadd.xlane.f32.xlu2 %v1416_v58  ;;  %1372 = vadd.xlane.f32.xlu1 %v1371_v63  ;;  %v2178_v19 = vperm.slane %v1025_v59, %v4467_v15  ;;  %v2177_v30 = vsel %vm1974_vm7, %v2176_v8, %v2175_v3  ;;  %v1027_v16 = vmul.f32 0.015625, %v6045_v2  ;;  %v2180_v57 = vperm.slane %v1026_v35, %v4500_v1  ;;  %v6048_v38 = vld [vmem:[#allocation5_spill] sm:$0xff] }
 0x1c6   : > { %1549 = vadd.xlane.f32.xlu0 %v1548_v49  ;;  %v2204_v9 = vsel %vm1966_vm5, %v2203_v29, %v2202_v42  ;;  %v1551_v11 = vsel %vm536_vm0, %v3782_v26, 0.0  ;;  %v1506_v23 = vsel %vm536_vm0, %v3751_v44, 0.0  ;;  %v1015_v58 = vmul.f32 0.015625, %v6046_v50 }
 0x1c7   : > { %v2207_v63 = vperm.slane %v1040_v31, %v4486_v34  ;;  %v1461_v28 = vsel %vm536_vm0, %v3722_v6, 0.0  ;;  %v2157_v49 = vperm.slane %v1014_v5, %v4532_v14  ;;  %v1028_v18 = vmul.f32 0.015625, %v6047_v43  ;;  %v6049_v6 = vld [vmem:[#allocation48_spill] sm:$0xff] }
 0x1c8   : > { %v905_v46 = vpop.xlane.xlu2 %904  ;;  %v902_v36 = vpop.xlane.xlu1 %901  ;;  %v2206_v10 = vsel %vm1970_vm6, %v2205_v12, %v2204_v9  ;;  %v2182_v59 = vperm.slane %v1027_v16, %v4510_v39  ;;  %v2179_v8 = vsel %vm1978_vm8, %v2178_v19, %v2177_v30  ;;  %v1029_v29 = vmul.f32 0.015625, %v6048_v38 }
 0x1c9   : > { %v899_v33 = vpop.xlane.xlu0 %898  ;;  %v1042_v4 = vmul.f32 0.015625, %v902_v36  ;;  %v3663_v3 = vunpack.c.h.bf16 %v5044_v48  ;;  %v2156_v35 = vsel %vm5934_vm12, %v2155_v52, %v2154_v7  ;;  %v2181_v26 = vsel %vm1982_vm9, %v2180_v57, %v2179_v8  ;;  %v6050_v48 = vld [vmem:[#allocation6_spill] sm:$0xff] }
 0x1ca   : > { %v1041_v37 = vmul.f32 0.015625, %v899_v33  ;;  %v1043_v44 = vmul.f32 0.015625, %v905_v46  ;;  %v3811_v31 = vunpack.c.h.bf16 %v3982_v56  ;;  %v1016_v47 = vmul.f32 0.015625, %v6049_v6 }
 0x1cb   : > { %v2211_v5 = vperm.slane %v1042_v4, %v4500_v1  ;;  %v2208_v12 = vsel %vm1974_vm7, %v2207_v63, %v2206_v10  ;;  %v3810_v42 = vunpack.c.l.bf16 %v3982_v56  ;;  %vm5935_vm14 = vcmask 1043459   ;;  %v6053_v63 = vld [vmem:[#allocation2_spill] sm:$0xff] }
 0x1cc   : > { %v2209_v51 = vperm.slane %v1041_v37, %v4467_v15  ;;  %v2159_v36 = vperm.slane %v1015_v58, %v4521_v53  ;;  %v2184_v19 = vperm.slane %v1028_v18, %v4493_v61  ;;  %v1030_v30 = vmul.f32 0.015625, %v6050_v48 }
 0x1cd   : > { %1552 = vadd.xlane.f32.xlu2 %v1551_v11  ;;  %1507 = vadd.xlane.f32.xlu1 %v1506_v23  ;;  %v2158_v2 = vsel %vm1998_vm13, %v2157_v49, %v2156_v35  ;;  %vm6051_vm4 = vcmask 720512   ;;  %v2186_v9 = vperm.slane %v1029_v29, %v4535_v54  ;;  %v1374_v57 = vsel %vm536_vm0, %v3663_v3, 0.0  ;;  %v5153_v49 = vld [vmem:[%s4429_s30 + $0x110] sm:$0xff]  }
 0x1ce   : > { %1462 = vadd.xlane.f32.xlu0 %v1461_v28  ;;  %v2210_v52 = vsel %vm1978_vm8, %v2209_v51, %v2208_v12  ;;  %v2183_v16 = vsel %vm6051_vm4, %v2182_v59, %v2181_v26  ;;  %v2213_v37 = vperm.slane %v1043_v44, %v4510_v39  ;;  %v1596_v50 = vsel %vm536_vm0, %v3811_v31, 0.0  ;;  %v5160_v59 = vld [vmem:[%s4429_s30 + $0x98] sm:$0xff]  }
 0x1cf   : > { %v2129_v58 = vsel %vm6052_vm10, %v2128_v21, %v4967_v20  ;;  %v1031_v4 = vmul.f32 0.015625, %v6053_v63  ;;  %v2212_v28 = vsel %vm1982_vm9, %v2211_v5, %v2210_v52  ;;  %v1593_v56 = vsel %vm536_vm0, %v3810_v42, 0.0 }
 0x1d0   : > { %v914_v7 = vpop.xlane.xlu2 %913  ;;  %v911_v46 = vpop.xlane.xlu1 %910  ;;  %v2188_v43 = vperm.slane %v1030_v30, %v4532_v14  ;;  %v2185_v18 = vsel %vm5933_vm11, %v2184_v19, %v2183_v16  ;;  %v1032_v10 = vmul.f32 0.015625, %v4955_v17  ;;  %v2161_v20 = vperm.slane %v1016_v47, %v4550_v13 }
 0x1d1   : > { %v908_v33 = vpop.xlane.xlu0 %907  ;;  %v1045_v11 = vmul.f32 0.015625, %v911_v46  ;;  %v2160_v21 = vsel %vm6052_vm10, %v2159_v36, %v2158_v2  ;;  %v2187_v8 = vsel %vm5934_vm12, %v2186_v9, %v2185_v18  ;;  %v1046_v38 = vmul.f32 0.015625, %v914_v7  ;;  %v6056_v2 = vld [vmem:[#allocation13_spill] sm:$0xff] }
 0x1d2   : > { %v1044_v23 = vmul.f32 0.015625, %v908_v33  ;;  %v2214_v3 = vsel %vm6051_vm4, %v2213_v37, %v2212_v28  ;;  %v3754_v17 = vunpack.c.l.bf16 %v5153_v49  ;;  %v3723_v35 = vunpack.c.h.bf16 %v5095_v0  ;;  %v3990_v37 = vld [vmem:[%s4429_s30 + $0x1c0] sm:$0xff]  }
 0x1d3   : > { %v2217_v29 = vperm.slane %v1045_v11, %v4535_v54  ;;  %v6054_v26 = vperm.slane %v4930_v27, %v4550_v13  ;;  %v2190_v31 = vperm.slane %v1031_v4, %v4521_v53  ;;  %v3694_v47 = vunpack.c.l.bf16 %v5160_v59  ;;  %v5195_v11 = vld [vmem:[%s4429_s30 + $0x188] sm:$0xff]  }
 0x1d4   : > { %v2215_v51 = vperm.slane %v1044_v23, %v4493_v61  ;;  %v6055_v5 = vperm.slane %v4945_v32, %v4550_v13  ;;  %v2189_v42 = vsel %vm1998_vm13, %v2188_v43, %v2187_v8  ;;  %v2192_v0 = vperm.slane %v1032_v10, %v4550_v13 }
 0x1d5   : > { %1375 = vadd.xlane.f32.xlu2 %v1374_v57  ;;  %1597 = vadd.xlane.f32.xlu1 %v1596_v50  ;;  %v2100_v44 = vsel %vm2006_vm15, %v6054_v26, %v4951_v55  ;;  %vm2231_vm10 = vcmask 1044484   ;;  %v2219_v55 = vperm.slane %v1046_v38, %v4532_v14  ;;  %v2162_v30 = vsel %vm2006_vm15, %v2161_v20, %v2160_v21 }
 0x1d6   : > { %1594 = vadd.xlane.f32.xlu0 %v1593_v56  ;;  %v2216_v6 = vsel %vm5933_vm11, %v2215_v51, %v2214_v3  ;;  %v2131_v12 = vsel %vm2006_vm15, %v6055_v5, %v2129_v58  ;;  %vm2233_vm4 = vcmask 1045509   ;;  %v1509_v7 = vsel %vm536_vm0, %v3754_v17, 0.0  ;;  %v5214_v5 = vld [vmem:[%s4429_s30 + $0x60] sm:$0xff]  }
 0x1d7   : > { %v2218_v32 = vsel %vm5934_vm12, %v2217_v29, %v2216_v6  ;;  %v1464_v46 = vsel %vm536_vm0, %v3723_v35, 0.0  ;;  %v2230_v16 = vsel %vm5935_vm14, %v2100_v44, %v6056_v2  ;;  %v1419_v33 = vsel %vm536_vm0, %v3694_v47, 0.0 }
 0x1d8   : > { %v1307_v36 = vpop.xlane.xlu2 %1306  ;;  %v920_v27 = vpop.xlane.xlu1 %919  ;;  %vm6057_vm11 = vcmask 982912   ;;  %v2232_v58 = vsel %vm2231_vm10, %v2131_v12, %v2230_v16  ;;  %vm5937_vm12 = vcmask 1046534   ;;  %v2220_v63 = vsel %vm1998_vm13, %v2219_v55, %v2218_v32 }
 0x1d9   : > { %v1048_v19 = vmul.f32 0.015625, %v920_v27  ;;  %v917_v48 = vpop.xlane.xlu0 %916  ;;  %v2191_v57 = vsel %vm6057_vm11, %v2190_v31, %v2189_v42  ;;  %v2234_v4 = vsel %vm2233_vm4, %v2162_v30, %v2232_v58  ;;  %vm5936_vm14 = vcmask 1047559  }
 0x1da   : > { %v1047_v52 = vmul.f32 0.015625, %v917_v48  ;;  %v2193_v50 = vsel %vm2006_vm15, %v2192_v0, %v2191_v57  ;;  %v1689_v28 = vmul.f32 0.015625, %v1307_v36  ;;  %v3842_v43 = vunpack.c.l.bf16 %v3990_v37  ;;  %v5228_v57 = vld [vmem:[%s4429_s30 + $0x150] sm:$0xff]  }
 0x1db   : > { %v2223_v9 = vperm.slane %v1048_v19, %v4550_v13  ;;  %v3814_v18 = vunpack.c.l.bf16 %v5195_v11  ;;  %v2236_v51 = vsel %vm5937_vm12, %v2193_v50, %v2234_v4  ;;  %v3783_v20 = vunpack.c.h.bf16 %v5089_v22  ;;  %v3961_v50 = vld [vmem:[%s4429_s30 + $0xd8] sm:$0xff]  }
 0x1dc   : > { %v2221_v23 = vperm.slane %v1047_v52, %v4521_v53  ;;  %v2368_v26 = vperm.slane %v1689_v28, %v4414_v24  ;;  %v1641_v31 = vsel %vm536_vm0, %v3842_v43, 0.0  ;;  %v3695_v36 = vunpack.c.h.bf16 %v5160_v59 }
 0x1dd   : > { %1510 = vadd.xlane.f32.xlu2 %v1509_v7  ;;  %1465 = vadd.xlane.f32.xlu1 %v1464_v46  ;;  %v1599_v6 = vsel %vm536_vm0, %v3814_v18, 0.0  ;;  %v1554_v22 = vsel %vm536_vm0, %v3783_v20, 0.0  ;;  %v3666_v27 = vunpack.c.l.bf16 %v5214_v5  ;;  %v3843_v19 = vunpack.c.h.bf16 %v3990_v37 }
 0x1de   : > { %1420 = vadd.xlane.f32.xlu0 %v1419_v33  ;;  %v2222_v56 = vsel %vm6057_vm11, %v2221_v23, %v2220_v63  ;;  %v1422_v16 = vsel %vm536_vm0, %v3695_v36, 0.0  ;;  %vm6058_vm11 = vcmask 326912   ;;  %v3786_v63 = vunpack.c.l.bf16 %v5228_v57 }
 0x1df   : > { %v2224_v10 = vsel %vm2006_vm15, %v2223_v9, %v2222_v56  ;;  %v1377_v9 = vsel %vm536_vm0, %v3666_v27, 0.0  ;;  %v1644_v33 = vsel %vm536_vm0, %v3843_v19, 0.0  ;;  %v3755_v4 = vunpack.c.h.bf16 %v5153_v49  ;;  %v3991_v49 = vld [vmem:[%s4429_s30 + $0x1c8] sm:$0xff]  }
 0x1e0   : > { %v1316_v21 = vpop.xlane.xlu2 %1315  ;;  %v1313_v8 = vpop.xlane.xlu1 %1312  ;;  %v2238_v38 = vsel %vm5936_vm14, %v2224_v10, %v2236_v51  ;;  %v3726_v56 = vunpack.c.l.bf16 %v3961_v50  ;;  %vm6060_vm14 = vcmask 786112   ;;  %vm6061_vm12 = vcmask 851712  }
 0x1e1   : > { %v1692_v29 = vmul.f32 0.015625, %v1316_v21  ;;  %v1691_v3 = vmul.f32 0.015625, %v1313_v8  ;;  %v1310_v17 = vpop.xlane.xlu0 %1309  ;;  %v2624_v35 = vpack.c.bf16 %v2238_v38, %v2238_v38  ;;  %v1557_v38 = vsel %vm536_vm0, %v3786_v63, 0.0 }
 0x1e2   : > { %v1690_v44 = vmul.f32 0.015625, %v1310_v17  ;;  %v1467_v17 = vsel %vm536_vm0, %v3726_v56, 0.0 }
 0x1e3   : > { %v2371_v47 = vperm.slane %v1691_v3, %v4443_v45  ;;  %2832 = vmatmul.bf16.vlgmr.msra.gmra.mxu0 %v2624_v35  ;;  %2858 = vmatmul.bf16.vlgmr.msra.gmra.mxu2 %v2624_v35  ;;  %v2373_v12 = vperm.slane %v1692_v29, %v4447_v40  ;;  %v1512_v29 = vsel %vm536_vm0, %v3755_v4, 0.0 }
 0x1e4   : > { %v2369_v42 = vperm.slane %v1690_v44, %v4417_v62 }
 0x1e5   : > { %1642 = vadd.xlane.f32.xlu2 %v1641_v31  ;;  %1600 = vadd.xlane.f32.xlu1 %v1599_v6  ;;  %v3667_v31 = vunpack.c.h.bf16 %v5214_v5  ;;  %v3846_v6 = vunpack.c.l.bf16 %v3991_v49 }
 0x1e6   : > { %v2370_v0 = vsel %vm1950_vm1, %v2369_v42, %v2368_v26  ;;  %1555 = vadd.xlane.f32.xlu0 %v1554_v22  ;;  %v3815_v22 = vunpack.c.h.bf16 %v5195_v11 }
 0x1e7   : > { %v2372_v55 = vsel %vm1954_vm2, %v2371_v47, %v2370_v0 }
 0x1e8   : > { %v1325_v48 = vpop.xlane.xlu2 %1324  ;;  %v1322_v30 = vpop.xlane.xlu1 %1321  ;;  %v2374_v32 = vsel %vm1958_vm3, %v2373_v12, %v2372_v55 }
 0x1e9   : > { %v1695_v52 = vmul.f32 0.015625, %v1325_v48  ;;  %v1694_v7 = vmul.f32 0.015625, %v1322_v30  ;;  %v1319_v46 = vpop.xlane.xlu0 %1318  ;;  %v1380_v48 = vsel %vm536_vm0, %v3667_v31, 0.0  ;;  %v1647_v30 = vsel %vm536_vm0, %v3846_v6, 0.0 }
 0x1ea   : > { %v1693_v2 = vmul.f32 0.015625, %v1319_v46  ;;  %v3954_v46 = vld [vmem:[%s4429_s30 + $0xa0] sm:$0xff]  }
 0x1eb   : > { %v2377_v59 = vperm.slane %v1694_v7, %v4456_v60  ;;  %v2379_v37 = vperm.slane %v1695_v52, %v4481_v25  ;;  %v5255_v52 = vld [vmem:[%s4429_s30 + $0x118] sm:$0xff]  }
 0x1ec   : > { %v2375_v23 = vperm.slane %v1693_v2, %v4453_v41 }
 0x1ed   : > { %1423 = vadd.xlane.f32.xlu2 %v1422_v16  ;;  %1378 = vadd.xlane.f32.xlu1 %v1377_v9  ;;  %v3758_v16 = vunpack.c.l.bf16 %v5255_v52  ;;  %v3727_v9 = vunpack.c.h.bf16 %v3961_v50 }
 0x1ee   : > { %v2376_v58 = vsel %vm6058_vm11, %v2375_v23, %v2374_v32  ;;  %1645 = vadd.xlane.f32.xlu0 %v1644_v33  ;;  %v1602_v32 = vsel %vm536_vm0, %v3815_v22, 0.0  ;;  %vm6059_vm11 = vcmask 720512   ;;  %v3698_v33 = vunpack.c.l.bf16 %v3954_v46 }
 0x1ef   : > { %v2378_v28 = vsel %vm1966_vm5, %v2377_v59, %v2376_v58  ;;  %v1515_v56 = vsel %vm536_vm0, %v3758_v16, 0.0 }
 0x1f0   : > { %v1334_v43 = vpop.xlane.xlu2 %1333  ;;  %v1331_v18 = vpop.xlane.xlu1 %1330  ;;  %v2380_v10 = vsel %vm1970_vm6, %v2379_v37, %v2378_v28 }
 0x1f1   : > { %v1698_v51 = vmul.f32 0.015625, %v1334_v43  ;;  %v1697_v20 = vmul.f32 0.015625, %v1331_v18  ;;  %v1328_v21 = vpop.xlane.xlu0 %1327  ;;  %v1470_v43 = vsel %vm536_vm0, %v3727_v9, 0.0 }
 0x1f2   : > { %v1696_v8 = vmul.f32 0.015625, %v1328_v21 }
 0x1f3   : > { %v2383_v3 = vperm.slane %v1697_v20, %v4467_v15  ;;  %v2385_v35 = vperm.slane %v1698_v51, %v4500_v1  ;;  %v5269_v51 = vld [vmem:[%s4429_s30 + $0x190] sm:$0xff]  }
 0x1f4   : > { %v2381_v26 = vperm.slane %v1696_v8, %v4486_v34  ;;  %v3847_v8 = vunpack.c.h.bf16 %v3991_v49 }
 0x1f5   : > { %1558 = vadd.xlane.f32.xlu2 %v1557_v38  ;;  %1513 = vadd.xlane.f32.xlu1 %v1512_v29  ;;  %v3818_v38 = vunpack.c.l.bf16 %v5269_v51  ;;  %v3787_v29 = vunpack.c.h.bf16 %v5228_v57 }
 0x1f6   : > { %v2382_v44 = vsel %vm1974_vm7, %v2381_v26, %v2380_v10  ;;  %1468 = vadd.xlane.f32.xlu0 %v1467_v17  ;;  %v1425_v10 = vsel %vm536_vm0, %v3698_v33, 0.0 }
 0x1f7   : > { %v2384_v47 = vsel %vm1978_vm8, %v2383_v3, %v2382_v44  ;;  %v1605_v22 = vsel %vm536_vm0, %v3818_v38, 0.0 }
 0x1f8   : > { %v1343_v12 = vpop.xlane.xlu2 %1342  ;;  %v1340_v42 = vpop.xlane.xlu1 %1339  ;;  %v2386_v0 = vsel %vm1982_vm9, %v2385_v35, %v2384_v47  ;;  %v1650_v47 = vsel %vm536_vm0, %v3847_v8, 0.0 }
 0x1f9   : > { %v1701_v36 = vmul.f32 0.015625, %v1343_v12  ;;  %v1700_v27 = vmul.f32 0.015625, %v1340_v42  ;;  %v1337_v55 = vpop.xlane.xlu0 %1336  ;;  %v1560_v12 = vsel %vm536_vm0, %v3787_v29, 0.0  ;;  %v5284_v42 = vld [vmem:[%s4429_s30 + $0xe0] sm:$0xff]  }
 0x1fa   : > { %v1699_v19 = vmul.f32 0.015625, %v1337_v55  ;;  %v3730_v55 = vunpack.c.l.bf16 %v5284_v42 }
 0x1fb   : > { %v2389_v5 = vperm.slane %v1700_v27, %v4493_v61  ;;  %v2391_v11 = vperm.slane %v1701_v36, %v4535_v54 }
 0x1fc   : > { %v2387_v7 = vperm.slane %v1699_v19, %v4510_v39  ;;  %v3699_v19 = vunpack.c.h.bf16 %v3954_v46 }
 0x1fd   : > { %1381 = vadd.xlane.f32.xlu2 %v1380_v48  ;;  %1648 = vadd.xlane.f32.xlu1 %v1647_v30 }
 0x1fe   : > { %v2388_v2 = vsel %vm6059_vm11, %v2387_v7, %v2386_v0  ;;  %1603 = vadd.xlane.f32.xlu0 %v1602_v32  ;;  %v3947_v0 = vld [vmem:[%s4429_s30 + $0x68] sm:$0xff]   ;;  %v1428_v33 = vsel %vm536_vm0, %v3699_v19, 0.0 }
 0x1ff   : > { %v2390_v59 = vsel %vm6060_vm14, %v2389_v5, %v2388_v2  ;;  %v3670_v30 = vunpack.c.l.bf16 %v3947_v0  ;;  %vm6063_vm14 = vcmask 326912  }
 0x200   : > { %v1355_v37 = vpop.xlane.xlu2 %1354  ;;  %v1349_v23 = vpop.xlane.xlu1 %1348  ;;  %v2392_v58 = vsel %vm6061_vm12, %v2391_v11, %v2390_v59  ;;  %vm6062_vm12 = vcmask 982912   ;;  %v1473_v59 = vsel %vm536_vm0, %v3730_v55, 0.0  ;;  %vm6064_vm11 = vmmov %vm6063_vm14 }
 0x201   : > { %v1703_v63 = vmul.f32 0.015625, %v1349_v23  ;;  %v1346_v4 = vpop.xlane.xlu0 %1345  ;;  %v1705_v20 = vmul.f32 0.015625, %v1355_v37  ;;  %v1383_v46 = vsel %vm536_vm0, %v3670_v30, 0.0 }
 0x202   : > { %v1702_v28 = vmul.f32 0.015625, %v1346_v4 }
 0x203   : > { %v2395_v18 = vperm.slane %v1703_v63, %v4521_v53  ;;  %v2399_v31 = vperm.slane %v1705_v20, %v4414_v24 }
 0x204   : > { %v2393_v50 = vperm.slane %v1702_v28, %v4532_v14 }
 0x205   : > { %1516 = vadd.xlane.f32.xlu2 %v1515_v56  ;;  %1471 = vadd.xlane.f32.xlu1 %v1470_v43  ;;  %v3819_v56 = vunpack.c.h.bf16 %v5269_v51 }
 0x206   : > { %v2394_v21 = vsel %vm1998_vm13, %v2393_v50, %v2392_v58  ;;  %1426 = vadd.xlane.f32.xlu0 %v1425_v10  ;;  %v3977_v58 = vld [vmem:[%s4429_s30 + $0x158] sm:$0xff]  }
 0x207   : > { %v5276_v3 = vsel %vm6062_vm12, %v2395_v18, %v2394_v21  ;;  %v3790_v43 = vunpack.c.l.bf16 %v3977_v58  ;;  %v3759_v18 = vunpack.c.h.bf16 %v5255_v52  ;;  %vm6065_vm12 = vmmov %vm6064_vm11 }
 0x208   : > { %v1403_v17 = vpop.xlane.xlu2 %1402  ;;  %v1361_v35 = vpop.xlane.xlu1 %1360 }
 0x209   : > { %v1707_v26 = vmul.f32 0.015625, %v1361_v35  ;;  %v1358_v44 = vpop.xlane.xlu0 %1357  ;;  %v1721_v36 = vmul.f32 0.015625, %v1403_v17  ;;  %v1608_v17 = vsel %vm536_vm0, %v3819_v56, 0.0  ;;  %v1563_v35 = vsel %vm536_vm0, %v3790_v43, 0.0 }
 0x20a   : > { %v1706_v6 = vmul.f32 0.015625, %v1358_v44  ;;  %v1518_v44 = vsel %vm536_vm0, %v3759_v18, 0.0 }
 0x20b   : > { %v2402_v49 = vperm.slane %v1707_v26, %v4443_v45  ;;  %v2430_v16 = vperm.slane %v1721_v36, %v4414_v24 }
 0x20c   : > { %v2400_v57 = vperm.slane %v1706_v6, %v4417_v62  ;;  %v3992_v6 = vld [vmem:[%s4429_s30 + $0x1d0] sm:$0xff]  }
 0x20d   : > { %1651 = vadd.xlane.f32.xlu2 %v1650_v47  ;;  %1606 = vadd.xlane.f32.xlu1 %v1605_v22 }
 0x20e   : > { %v2401_v27 = vsel %vm1950_vm1, %v2400_v57, %v2399_v31  ;;  %1561 = vadd.xlane.f32.xlu0 %v1560_v12  ;;  %v5310_v31 = vld [vmem:[%s4429_s30 + $0xa8] sm:$0xff]   ;;  %v3671_v12 = vunpack.c.h.bf16 %v3947_v0  ;;  %v3850_v57 = vunpack.c.l.bf16 %v3992_v6 }
 0x20f   : > { %v2403_v48 = vsel %vm1954_vm2, %v2402_v49, %v2401_v27  ;;  %v3702_v49 = vunpack.c.l.bf16 %v5310_v31 }
 0x210   : > { %v1409_v5 = vpop.xlane.xlu2 %1408  ;;  %v1364_v32 = vpop.xlane.xlu1 %1363 }
 0x211   : > { %v1723_v11 = vmul.f32 0.015625, %v1409_v5  ;;  %v1708_v7 = vmul.f32 0.015625, %v1364_v32  ;;  %v1406_v2 = vpop.xlane.xlu0 %1405  ;;  %v1431_v30 = vsel %vm536_vm0, %v3702_v49, 0.0  ;;  %v1386_v5 = vsel %vm536_vm0, %v3671_v12, 0.0 }
 0x212   : > { %v1722_v9 = vmul.f32 0.015625, %v1406_v2 }
 0x213   : > { %v2433_v37 = vperm.slane %v1723_v11, %v4443_v45  ;;  %v2404_v23 = vperm.slane %v1708_v7, %v4447_v40  ;;  %v1653_v11 = vsel %vm536_vm0, %v3850_v57, 0.0  ;;  %v5322_v7 = vld [vmem:[%s4429_s30 + $0x120] sm:$0xff]  }
 0x214   : > { %v2431_v63 = vperm.slane %v1722_v9, %v4417_v62 }
 0x215   : > { %v2405_v4 = vsel %vm1958_vm3, %v2404_v23, %v2403_v48  ;;  %1474 = vadd.xlane.f32.xlu2 %v1473_v59  ;;  %1429 = vadd.xlane.f32.xlu1 %v1428_v33  ;;  %v3791_v59 = vunpack.c.h.bf16 %v3977_v58  ;;  %v3762_v33 = vunpack.c.l.bf16 %v5322_v7 }
 0x216   : > { %v2432_v28 = vsel %vm1950_vm1, %v2431_v63, %v2430_v16  ;;  %1384 = vadd.xlane.f32.xlu0 %v1383_v46 }
 0x217   : > { %v2434_v10 = vsel %vm1954_vm2, %v2433_v37, %v2432_v28  ;;  %v3731_v37 = vunpack.c.h.bf16 %v5284_v42  ;;  %v1566_v18 = vsel %vm536_vm0, %v3791_v59, 0.0 }
 0x218   : > { %v1367_v50 = vpop.xlane.xlu2 %1366  ;;  %v1454_v20 = vpop.xlane.xlu1 %1453 }
 0x219   : > { %v1709_v21 = vmul.f32 0.015625, %v1367_v50  ;;  %v1738_v8 = vmul.f32 0.015625, %v1454_v20  ;;  %v1451_v38 = vpop.xlane.xlu0 %1450  ;;  %v1476_v20 = vsel %vm536_vm0, %v3731_v37, 0.0 }
 0x21a   : > { %v1737_v29 = vmul.f32 0.015625, %v1451_v38 }
 0x21b   : > { %v2406_v26 = vperm.slane %v1709_v21, %v4453_v41  ;;  %v2462_v51 = vperm.slane %v1738_v8, %v4417_v62  ;;  %v5336_v21 = vld [vmem:[%s4429_s30 + $0x70] sm:$0xff]   ;;  %v3985_v8 = vld [vmem:[%s4429_s30 + $0x198] sm:$0xff]  }
 0x21c   : > { %v2461_v52 = vperm.slane %v1737_v29, %v4414_v24 }
 0x21d   : > { %v2407_v47 = vsel %vm6063_vm14, %v2406_v26, %v2405_v4  ;;  %1609 = vadd.xlane.f32.xlu2 %v1608_v17  ;;  %1564 = vadd.xlane.f32.xlu1 %v1563_v35  ;;  %v3674_v35 = vunpack.c.l.bf16 %v5336_v21  ;;  %v3851_v26 = vunpack.c.h.bf16 %v3992_v6  ;;  %vm6066_vm14 = vmmov %vm6064_vm11 }
 0x21e   : > { %v2463_v22 = vsel %vm1950_vm1, %v2462_v51, %v2461_v52  ;;  %1519 = vadd.xlane.f32.xlu0 %v1518_v44  ;;  %v3822_v51 = vunpack.c.l.bf16 %v3985_v8 }
 0x21f   : > { %v1389_v57 = vsel %vm536_vm0, %v3674_v35, 0.0 }
 0x220   : > { %v1499_v36 = vpop.xlane.xlu2 %1498  ;;  %v1457_v27 = vpop.xlane.xlu1 %1456 }
 0x221   : > { %v1739_v55 = vmul.f32 0.015625, %v1457_v27  ;;  %v1412_v19 = vpop.xlane.xlu0 %1411  ;;  %v1753_v16 = vmul.f32 0.015625, %v1499_v36  ;;  %v1656_v36 = vsel %vm536_vm0, %v3851_v26, 0.0  ;;  %v1611_v27 = vsel %vm536_vm0, %v3822_v51, 0.0 }
 0x222   : > { %v1724_v48 = vmul.f32 0.015625, %v1412_v19 }
 0x223   : > { %v2464_v32 = vperm.slane %v1739_v55, %v4443_v45  ;;  %v2492_v56 = vperm.slane %v1753_v16, %v4414_v24  ;;  %v5349_v55 = vld [vmem:[%s4429_s30 + $0xe8] sm:$0xff]  }
 0x224   : > { %v2435_v2 = vperm.slane %v1724_v48, %v4447_v40 }
 0x225   : > { %v2465_v0 = vsel %vm1954_vm2, %v2464_v32, %v2463_v22  ;;  %1432 = vadd.xlane.f32.xlu2 %v1431_v30  ;;  %1387 = vadd.xlane.f32.xlu1 %v1386_v5  ;;  %v3763_v5 = vunpack.c.h.bf16 %v5322_v7  ;;  %v3734_v32 = vunpack.c.l.bf16 %v5349_v55 }
 0x226   : > { %v2436_v9 = vsel %vm1958_vm3, %v2435_v2, %v2434_v10  ;;  %1654 = vadd.xlane.f32.xlu0 %v1653_v11  ;;  %v1521_v10 = vsel %vm536_vm0, %v3762_v33, 0.0  ;;  %v3703_v11 = vunpack.c.h.bf16 %v5310_v31 }
 0x228   : > { %v1415_v23 = vpop.xlane.xlu2 %1414  ;;  %v1370_v46 = vpop.xlane.xlu1 %1369 }
 0x229   : > { %v1725_v63 = vmul.f32 0.015625, %v1415_v23  ;;  %v1710_v4 = vmul.f32 0.015625, %v1370_v46  ;;  %v1502_v28 = vpop.xlane.xlu0 %1501  ;;  %v1524_v46 = vsel %vm536_vm0, %v3763_v5, 0.0 }
 0x22a   : > { %v1754_v43 = vmul.f32 0.015625, %v1502_v28  ;;  %v5364_v28 = vld [vmem:[%s4429_s30 + $0x1d8] sm:$0xff]  }
 0x22b   : > { %v2437_v50 = vperm.slane %v1725_v63, %v4453_v41  ;;  %v2408_v58 = vperm.slane %v1710_v4, %v4456_v60  ;;  %v1434_v4 = vsel %vm536_vm0, %v3703_v11, 0.0 }
 0x22c   : > { %v2493_v42 = vperm.slane %v1754_v43, %v4417_v62 }
 0x22d   : > { %v2438_v38 = vsel %vm6064_vm11, %v2437_v50, %v2436_v9  ;;  %v2409_v29 = vsel %vm1966_vm5, %v2408_v58, %v2407_v47  ;;  %1567 = vadd.xlane.f32.xlu2 %v1566_v18  ;;  %1522 = vadd.xlane.f32.xlu1 %v1521_v10  ;;  %v3854_v50 = vunpack.c.l.bf16 %v5364_v28  ;;  %v3823_v58 = vunpack.c.h.bf16 %v3985_v8 }
 0x22e   : > { %v2494_v17 = vsel %vm1950_vm1, %v2493_v42, %v2492_v56  ;;  %1477 = vadd.xlane.f32.xlu0 %v1476_v20  ;;  %v3978_v56 = vld [vmem:[%s4429_s30 + $0x160] sm:$0xff]  }
 0x22f   : > { %v3794_v20 = vunpack.c.l.bf16 %v3978_v56 }
 0x230   : > { %v1547_v44 = vpop.xlane.xlu2 %1546  ;;  %v1505_v52 = vpop.xlane.xlu1 %1504 }
 0x231   : > { %v1755_v22 = vmul.f32 0.015625, %v1505_v52  ;;  %v1460_v49 = vpop.xlane.xlu0 %1459  ;;  %v1769_v48 = vmul.f32 0.015625, %v1547_v44 }
 0x232   : > { %v1740_v12 = vmul.f32 0.015625, %v1460_v49  ;;  %v1569_v49 = vsel %vm536_vm0, %v3794_v20, 0.0 }
 0x233   : > { %v2495_v47 = vperm.slane %v1755_v22, %v4443_v45  ;;  %v2523_v37 = vperm.slane %v1769_v48, %v4414_v24  ;;  %v3675_v48 = vunpack.c.h.bf16 %v5336_v21 }
 0x234   : > { %v2466_v19 = vperm.slane %v1740_v12, %v4447_v40  ;;  %v3956_v12 = vld [vmem:[%s4429_s30 + $0xb0] sm:$0xff]  }
 0x235   : > { %v2496_v6 = vsel %vm1954_vm2, %v2495_v47, %v2494_v17  ;;  %1390 = vadd.xlane.f32.xlu2 %v1389_v57  ;;  %1657 = vadd.xlane.f32.xlu1 %v1656_v36 }
 0x236   : > { %v2467_v30 = vsel %vm1958_vm3, %v2466_v19, %v2465_v0  ;;  %1612 = vadd.xlane.f32.xlu0 %v1611_v27  ;;  %v1479_v0 = vsel %vm536_vm0, %v3734_v32, 0.0  ;;  %v3735_v27 = vunpack.c.h.bf16 %v5349_v55  ;;  %v3706_v19 = vunpack.c.l.bf16 %v3956_v12 }
 0x237   : > { %v1392_v55 = vsel %vm536_vm0, %v3675_v48, 0.0 }
 0x238   : > { %v1418_v2 = vpop.xlane.xlu2 %1417  ;;  %v1373_v16 = vpop.xlane.xlu1 %1372 }
 0x239   : > { %v1726_v9 = vmul.f32 0.015625, %v1418_v2  ;;  %v1711_v59 = vmul.f32 0.015625, %v1373_v16  ;;  %v1550_v33 = vpop.xlane.xlu0 %1549 }
 0x23a   : > { %v1770_v23 = vmul.f32 0.015625, %v1550_v33 }
 0x23b   : > { %v2439_v63 = vperm.slane %v1726_v9, %v4456_v60  ;;  %v2410_v7 = vperm.slane %v1711_v59, %v4481_v25  ;;  %v1437_v59 = vsel %vm536_vm0, %v3706_v19, 0.0 }
 0x23c   : > { %v2524_v31 = vperm.slane %v1770_v23, %v4417_v62  ;;  %v3971_v23 = vld [vmem:[%s4429_s30 + $0x128] sm:$0xff]  }
 0x23d   : > { %v5369_v43 = vsel %vm1966_vm5, %v2439_v63, %v2438_v38  ;;  %v2411_v18 = vsel %vm1970_vm6, %v2410_v7, %v2409_v29  ;;  %1525 = vadd.xlane.f32.xlu2 %v1524_v46  ;;  %1480 = vadd.xlane.f32.xlu1 %v1479_v0  ;;  %v1659_v38 = vsel %vm536_vm0, %v3854_v50, 0.0  ;;  %v1614_v29 = vsel %vm536_vm0, %v3823_v58, 0.0 }
 0x23e   : > { %v2525_v10 = vsel %vm1950_vm1, %v2524_v31, %v2523_v37  ;;  %1435 = vadd.xlane.f32.xlu0 %v1434_v4  ;;  %v5394_v37 = vld [vmem:[%s4429_s30 + $0x1a0] sm:$0xff]   ;;  %v3795_v7 = vunpack.c.h.bf16 %v3978_v56  ;;  %v3766_v4 = vunpack.c.l.bf16 %v3971_v23 }
 0x23f   : > { %v3826_v63 = vunpack.c.l.bf16 %v5394_v37 }
 0x240   : > { %v1553_v42 = vpop.xlane.xlu2 %1552  ;;  %v1508_v17 = vpop.xlane.xlu1 %1507 }
 0x241   : > { %v1771_v35 = vmul.f32 0.015625, %v1553_v42  ;;  %v1756_v26 = vmul.f32 0.015625, %v1508_v17  ;;  %v1463_v51 = vpop.xlane.xlu0 %1462  ;;  %v1617_v17 = vsel %vm536_vm0, %v3826_v63, 0.0 }
 0x242   : > { %v1741_v44 = vmul.f32 0.015625, %v1463_v51  ;;  %v1527_v51 = vsel %vm536_vm0, %v3766_v4, 0.0 }
 0x243   : > { %v2526_v52 = vperm.slane %v1771_v35, %v4443_v45  ;;  %v2497_v22 = vperm.slane %v1756_v26, %v4447_v40 }
 0x244   : > { %v2468_v8 = vperm.slane %v1741_v44, %v4453_v41  ;;  %v5409_v44 = vld [vmem:[%s4429_s30 + $0x78] sm:$0xff]  }
 0x245   : > { %v5382_v57 = vsel %vm1954_vm2, %v2526_v52, %v2525_v10  ;;  %v2498_v36 = vsel %vm1958_vm3, %v2497_v22, %v2496_v6  ;;  %1660 = vadd.xlane.f32.xlu2 %v1659_v38  ;;  %1615 = vadd.xlane.f32.xlu1 %v1614_v29  ;;  %v1482_v6 = vsel %vm536_vm0, %v3735_v27, 0.0  ;;  %v3707_v22 = vunpack.c.h.bf16 %v3956_v12 }
 0x246   : > { %v2469_v47 = vsel %vm6065_vm12, %v2468_v8, %v2467_v30  ;;  %1570 = vadd.xlane.f32.xlu0 %v1569_v49  ;;  %v3678_v49 = vunpack.c.l.bf16 %v5409_v44  ;;  %v3855_v8 = vunpack.c.h.bf16 %v5364_v28  ;;  %vm6071_vm12 = vcmask 786112  }
 0x248   : > { %v1376_v5 = vpop.xlane.xlu2 %1375  ;;  %v1598_v32 = vpop.xlane.xlu1 %1597 }
 0x249   : > { %v1712_v11 = vmul.f32 0.015625, %v1376_v5  ;;  %v1786_v2 = vmul.f32 0.015625, %v1598_v32  ;;  %v1595_v16 = vpop.xlane.xlu0 %1594  ;;  %v1395_v32 = vsel %vm536_vm0, %v3678_v49, 0.0 }
 0x24a   : > { %v1785_v9 = vmul.f32 0.015625, %v1595_v16  ;;  %v5431_v16 = vld [vmem:[%s4429_s30 + $0xf0] sm:$0xff]  }
 0x24b   : > { %v2412_v30 = vperm.slane %v1712_v11, %v4486_v34  ;;  %v2555_v33 = vperm.slane %v1786_v2, %v4417_v62  ;;  %v5425_v11 = vld [vmem:[%s4429_s30 + $0x168] sm:$0xff]   ;;  %v1662_v2 = vsel %vm536_vm0, %v3855_v8, 0.0 }
 0x24c   : > { %v2554_v21 = vperm.slane %v1785_v9, %v4414_v24  ;;  %v3798_v9 = vunpack.c.l.bf16 %v5425_v11 }
 0x24d   : > { %v5399_v46 = vsel %vm1974_vm7, %v2412_v30, %v2411_v18  ;;  %1483 = vadd.xlane.f32.xlu2 %v1482_v6  ;;  %1438 = vadd.xlane.f32.xlu1 %v1437_v59  ;;  %v1572_v18 = vsel %vm536_vm0, %v3795_v7, 0.0  ;;  %v3767_v30 = vunpack.c.h.bf16 %v3971_v23 }
 0x24e   : > { %v2556_v0 = vsel %vm1950_vm1, %v2555_v33, %v2554_v21  ;;  %1393 = vadd.xlane.f32.xlu0 %v1392_v55  ;;  %v3738_v33 = vunpack.c.l.bf16 %v5431_v16  ;;  %v1575_v4 = vsel %vm536_vm0, %v3798_v9, 0.0 }
 0x250   : > { %v1511_v31 = vpop.xlane.xlu2 %1510  ;;  %v1466_v10 = vpop.xlane.xlu1 %1465  ;;  %v1485_v23 = vsel %vm536_vm0, %v3738_v33, 0.0  ;;  %v3739_v33 = vunpack.c.h.bf16 %v5431_v16  ;;  %v5487_v16 = vld [vmem:[%s4429_s30 + $0x1a8] sm:$0xff]  }
 0x251   : > { %v1757_v50 = vmul.f32 0.015625, %v1511_v31  ;;  %v1742_v58 = vmul.f32 0.015625, %v1466_v10  ;;  %v1421_v20 = vpop.xlane.xlu0 %1420 }
 0x252   : > { %v1727_v42 = vmul.f32 0.015625, %v1421_v20  ;;  %v5448_v20 = vld [vmem:[%s4429_s30 + $0x1e0] sm:$0xff]  }
 0x253   : > { %v2499_v35 = vperm.slane %v1757_v50, %v4453_v41  ;;  %v2470_v26 = vperm.slane %v1742_v58, %v4456_v60 }
 0x254   : > { %v2441_v56 = vperm.slane %v1727_v42, %v4481_v25 }
 0x255   : > { %v5413_v38 = vsel %vm6066_vm14, %v2499_v35, %v2498_v36  ;;  %v5416_v29 = vsel %vm1966_vm5, %v2470_v26, %v2469_v47  ;;  %1618 = vadd.xlane.f32.xlu2 %v1617_v17  ;;  %1573 = vadd.xlane.f32.xlu1 %v1572_v18  ;;  %v1440_v47 = vsel %vm536_vm0, %v3707_v22, 0.0  ;;  %v3858_v22 = vunpack.c.l.bf16 %v5448_v20 }
 0x256   : > { %v2442_v52 = vsel %vm1970_vm6, %v2441_v56, %v5369_v43  ;;  %1528 = vadd.xlane.f32.xlu0 %v1527_v51  ;;  %v4007_v51 = vld [vmem:[%s4429_s30 + $0x38] sm:$0xff]  }
 0x257   : > { %v3647_v56 = vunpack.c.h.bf16 %v4007_v51 }
 0x258   : > { %v1643_v27 = vpop.xlane.xlu2 %1642  ;;  %v1601_v19 = vpop.xlane.xlu1 %1600 }
 0x259   : > { %v1787_v36 = vmul.f32 0.015625, %v1601_v19  ;;  %v1556_v48 = vpop.xlane.xlu0 %1555  ;;  %v1801_v6 = vmul.f32 0.015625, %v1643_v27 }
 0x25a   : > { %v1772_v5 = vmul.f32 0.015625, %v1556_v48 }
 0x25b   : > { %v2557_v43 = vperm.slane %v1787_v36, %v4443_v45  ;;  %v2585_v31 = vperm.slane %v1801_v6, %v4414_v24 }
 0x25c   : > { %v2528_v12 = vperm.slane %v1772_v5, %v4447_v40  ;;  %v1665_v5 = vsel %vm536_vm0, %v3858_v22, 0.0 }
 0x25d   : > { %v5434_v28 = vsel %vm1954_vm2, %v2557_v43, %v2556_v0  ;;  %1441 = vadd.xlane.f32.xlu2 %v1440_v47  ;;  %1396 = vadd.xlane.f32.xlu1 %v1395_v32  ;;  %v5468_v43 = vld [vmem:[%s4429_s30 + $0xb8] sm:$0xff]  }
 0x25e   : > { %v2529_v59 = vsel %vm1958_vm3, %v2528_v12, %v5382_v57  ;;  %1663 = vadd.xlane.f32.xlu0 %v1662_v2  ;;  %v1530_v57 = vsel %vm536_vm0, %v3767_v30, 0.0 }
 0x260   : > { %v5440_v55 = vpop.f32.mrf.mxu0  ;;  %v1424_v21 = vpop.xlane.xlu2 %1423 }
 0x261   : > { %v1728_v63 = vmul.f32 0.015625, %v1424_v21  ;;  %v1379_v7 = vpop.xlane.xlu1 %1378  ;;  %v1646_v0 = vpop.xlane.xlu0 %1645  ;;  %v3710_v21 = vunpack.c.l.bf16 %v5468_v43 }
 0x262   : > { %v1713_v10 = vmul.f32 0.015625, %v1379_v7  ;;  %v1802_v50 = vmul.f32 0.015625, %v1646_v0 }
 0x263   : > { %v2443_v58 = vperm.slane %v1728_v63, %v4486_v34  ;;  %v3679_v63 = vunpack.c.h.bf16 %v5409_v44 }
 0x264   : > { %v2414_v42 = vperm.slane %v1713_v10, %v4467_v15  ;;  %v2586_v17 = vperm.slane %v1802_v50, %v4417_v62  ;;  %v3827_v62 = vunpack.c.h.bf16 %v5394_v37 }
 0x265   : > { %v5453_v18 = vsel %vm1974_vm7, %v2443_v58, %v2442_v52  ;;  %1576 = vadd.xlane.f32.xlu2 %v1575_v4  ;;  %1531 = vadd.xlane.f32.xlu1 %v1530_v57  ;;  %v1398_v57 = vsel %vm536_vm0, %v3679_v63, 0.0 }
 0x266   : > { %v2415_v24 = vsel %vm1978_vm8, %v2414_v42, %v5399_v46  ;;  %v2587_v35 = vsel %vm1950_vm1, %v2586_v17, %v2585_v31  ;;  %1486 = vadd.xlane.f32.xlu0 %v1485_v23  ;;  %v5458_v26 = vpop.f32.mrf.mxu2  ;;  %v1350_v46 = vsel %vm536_vm0, %v3647_v56, 0.0  ;;  %v1620_v32 = vsel %vm536_vm0, %v3827_v62, 0.0  ;;  %vm6067_vm1 = vmmov %vm6064_vm11  ;;  %v5492_v23 = vld [vmem:[%s4429_s30 + $0x130] sm:$0xff]  }
 0x267   : > { %v3830_v56 = vunpack.c.l.bf16 %v5487_v16  ;;  %v3770_v22 = vunpack.c.l.bf16 %v5492_v23  ;;  %vm6072_vm14 = vmmov %vm6067_vm1 }
 0x268   : > { %v2835_v49 = vpop.f32.mrf.mxu0  ;;  %v1559_v52 = vpop.xlane.xlu2 %1558 }
 0x269   : > { %v1773_v8 = vmul.f32 0.015625, %v1559_v52  ;;  %v1514_v27 = vpop.xlane.xlu1 %1513  ;;  %v1469_v19 = vpop.xlane.xlu0 %1468 }
 0x26a   : > { %v1758_v36 = vmul.f32 0.015625, %v1514_v27  ;;  %v1743_v48 = vmul.f32 0.015625, %v1469_v19  ;;  %v1623_v19 = vsel %vm536_vm0, %v3830_v56, 0.0 }
 0x26b   : > { %v2530_v47 = vperm.slane %v1773_v8, %v4453_v41 }
 0x26c   : > { %v2501_v2 = vperm.slane %v1758_v36, %v4456_v60  ;;  %v2472_v37 = vperm.slane %v1743_v48, %v4481_v25  ;;  %v5508_v48 = vld [vmem:[%s4429_s30 + $0xf8] sm:$0xff]  }
 0x26d   : > { %v5473_v12 = vsel %vm6067_vm1, %v2530_v47, %v2529_v59  ;;  %1351 = vadd.xlane.f32.xlu2 %v1350_v46  ;;  %1666 = vadd.xlane.f32.xlu1 %v1665_v5 }
 0x26e   : > { %v2502_v9 = vsel %vm1966_vm5, %v2501_v2, %v5413_v38  ;;  %v2473_v6 = vsel %vm1970_vm6, %v2472_v37, %v5416_v29  ;;  %1621 = vadd.xlane.f32.xlu0 %v1620_v32  ;;  %v2861_v30 = vpop.f32.mrf.mxu2  ;;  %v1488_v38 = vsel %vm536_vm0, %v3739_v33, 0.0  ;;  %v1443_v29 = vsel %vm536_vm0, %v3710_v21, 0.0 }
 0x26f   : > { %v3742_v2 = vunpack.c.l.bf16 %v5508_v48  ;;  %v3711_v37 = vunpack.c.h.bf16 %v5468_v43  ;;  %v3859_v30 = vunpack.c.h.bf16 %v5448_v20 }
 0x270   : > { %v1382_v59 = vpop.xlane.xlu2 %1381 }
 0x271   : > { %v1714_v7 = vmul.f32 0.015625, %v1382_v59  ;;  %v1649_v0 = vpop.xlane.xlu1 %1648  ;;  %v1604_v4 = vpop.xlane.xlu0 %1603 }
 0x272   : > { %v1803_v31 = vmul.f32 0.015625, %v1649_v0  ;;  %v1788_v10 = vmul.f32 0.015625, %v1604_v4  ;;  %v1491_v0 = vsel %vm536_vm0, %v3742_v2, 0.0 }
 0x273   : > { %v2416_v50 = vperm.slane %v1714_v7, %v4500_v1 }
 0x274   : > { %v2588_v58 = vperm.slane %v1803_v31, %v4443_v45  ;;  %v2559_v44 = vperm.slane %v1788_v10, %v4447_v40  ;;  %v3799_v45 = vunpack.c.h.bf16 %v5425_v11  ;;  %v5526_v31 = vld [vmem:[%s4429_s30 + $0x170] sm:$0xff]  }
 0x275   : > { %v5495_v42 = vsel %vm1982_vm9, %v2416_v50, %v2415_v24  ;;  %1489 = vadd.xlane.f32.xlu2 %v1488_v38  ;;  %1444 = vadd.xlane.f32.xlu1 %v1443_v29  ;;  %v3802_v50 = vunpack.c.l.bf16 %v5526_v31 }
 0x276   : > { %v2589_v17 = vsel %vm1954_vm2, %v2588_v58, %v2587_v35  ;;  %v2560_v51 = vsel %vm1958_vm3, %v2559_v44, %v5434_v28  ;;  %1399 = vadd.xlane.f32.xlu0 %v1398_v57  ;;  %v1578_v35 = vsel %vm536_vm0, %v3799_v45, 0.0  ;;  %v1533_v28 = vsel %vm536_vm0, %v3770_v22, 0.0  ;;  %vm6068_vm2 = vmmov %vm6067_vm1 }
 0x277   : > { %v3771_v57 = vunpack.c.h.bf16 %v5492_v23  ;;  %vm6073_vm1 = vcmask 851712  }
 0x278   : > { %v1517_v62 = vpop.xlane.xlu2 %1516 }
 0x279   : > { %v1759_v49 = vmul.f32 0.015625, %v1517_v62  ;;  %v1472_v52 = vpop.xlane.xlu1 %1471  ;;  %v1427_v24 = vpop.xlane.xlu0 %1426  ;;  %v1581_v62 = vsel %vm536_vm0, %v3802_v50, 0.0 }
 0x27a   : > { %v1744_v8 = vmul.f32 0.015625, %v1472_v52  ;;  %v1729_v27 = vmul.f32 0.015625, %v1427_v24  ;;  %v3995_v24 = vld [vmem:[%s4429_s30 + $0x1e8] sm:$0xff]  }
 0x27b   : > { %v2503_v36 = vperm.slane %v1759_v49, %v4481_v25  ;;  %v1536_v49 = vsel %vm536_vm0, %v3771_v57, 0.0 }
 0x27c   : > { %v2474_v11 = vperm.slane %v1744_v8, %v4486_v34  ;;  %v2445_v46 = vperm.slane %v1729_v27, %v4467_v15 }
 0x27d   : > { %v5513_v5 = vsel %vm1970_vm6, %v2503_v36, %v2502_v9  ;;  %1624 = vadd.xlane.f32.xlu2 %v1623_v19  ;;  %1579 = vadd.xlane.f32.xlu1 %v1578_v35  ;;  %v3743_v36 = vunpack.c.h.bf16 %v5508_v48 }
 0x27e   : > { %v2475_v47 = vsel %vm1974_vm7, %v2474_v11, %v2473_v6  ;;  %v2446_v32 = vsel %vm1978_vm8, %v2445_v46, %v5453_v18  ;;  %1534 = vadd.xlane.f32.xlu0 %v1533_v28  ;;  %v1446_v6 = vsel %vm536_vm0, %v3711_v37, 0.0  ;;  %v1668_v18 = vsel %vm536_vm0, %v3859_v30, 0.0 }
 0x27f   : > { %v3862_v28 = vunpack.c.l.bf16 %v3995_v24 }
 0x280   : > { %v1652_v33 = vpop.xlane.xlu2 %1651 }
 0x281   : > { %v1804_v21 = vmul.f32 0.015625, %v1652_v33  ;;  %v1607_v63 = vpop.xlane.xlu1 %1606  ;;  %v1562_v9 = vpop.xlane.xlu0 %1561 }
 0x282   : > { %v1789_v59 = vmul.f32 0.015625, %v1607_v63  ;;  %v1774_v7 = vmul.f32 0.015625, %v1562_v9  ;;  %v3988_v63 = vld [vmem:[%s4429_s30 + $0x1b0] sm:$0xff]  }
 0x283   : > { %v2590_v4 = vperm.slane %v1804_v21, %v4447_v40  ;;  %v3831_v40 = vunpack.c.h.bf16 %v5487_v16  ;;  %v5544_v16 = vld [vmem:[%s4429_s30 + $0x138] sm:$0xff]  }
 0x284   : > { %v2561_v43 = vperm.slane %v1789_v59, %v4453_v41  ;;  %v2532_v20 = vperm.slane %v1774_v7, %v4456_v60  ;;  %v3774_v35 = vunpack.c.l.bf16 %v5544_v16 }
 0x285   : > { %v5531_v10 = vsel %vm1958_vm3, %v2590_v4, %v2589_v17  ;;  %1492 = vadd.xlane.f32.xlu2 %v1491_v0  ;;  %1447 = vadd.xlane.f32.xlu1 %v1446_v6  ;;  %vm6069_vm3 = vcmask 720512   ;;  %v3863_v6 = vunpack.c.h.bf16 %v3995_v24  ;;  %v3834_v4 = vunpack.c.l.bf16 %v3988_v63 }
 0x286   : > { %v2562_v38 = vsel %vm6068_vm2, %v2561_v43, %v2560_v51  ;;  %v2533_v29 = vsel %vm1966_vm5, %v2532_v20, %v5473_v12  ;;  %1669 = vadd.xlane.f32.xlu0 %v1668_v18  ;;  %v1626_v51 = vsel %vm536_vm0, %v3831_v40, 0.0  ;;  %v1539_v33 = vsel %vm536_vm0, %v3774_v35, 0.0  ;;  %vm6070_vm11 = vmmov %vm6069_vm3 }
 0x287   : > { %v3803_v18 = vunpack.c.h.bf16 %v5526_v31  ;;  %vm6075_vm2 = vmmov %vm6071_vm12 }
 0x288   : > { %v1475_v58 = vpop.xlane.xlu2 %1474 }
 0x289   : > { %v1745_v44 = vmul.f32 0.015625, %v1475_v58  ;;  %v1430_v17 = vpop.xlane.xlu1 %1429  ;;  %v1385_v56 = vpop.xlane.xlu0 %1384  ;;  %v1674_v58 = vsel %vm536_vm0, %v3863_v6, 0.0 }
 0x28a   : > { %v1730_v45 = vmul.f32 0.015625, %v1430_v17  ;;  %v1715_v22 = vmul.f32 0.015625, %v1385_v56  ;;  %v1584_v17 = vsel %vm536_vm0, %v3803_v18, 0.0 }
 0x28b   : > { %v2476_v12 = vperm.slane %v1745_v44, %v4467_v15  ;;  %v1629_v44 = vsel %vm536_vm0, %v3834_v4, 0.0 }
 0x28c   : > { %v2447_v52 = vperm.slane %v1730_v45, %v4500_v1  ;;  %v2418_v23 = vperm.slane %v1715_v22, %v4510_v39 }
 0x28d   : > { %v5550_v8 = vsel %vm1978_vm8, %v2476_v12, %v2475_v47  ;;  %1627 = vadd.xlane.f32.xlu2 %v1626_v51  ;;  %1582 = vadd.xlane.f32.xlu1 %v1581_v62  ;;  %v3835_v62 = vunpack.c.h.bf16 %v3988_v63 }
 0x28e   : > { %v2448_v27 = vsel %vm1982_vm9, %v2447_v52, %v2446_v32  ;;  %v2419_v19 = vsel %vm6069_vm3, %v2418_v23, %v5495_v42  ;;  %1537 = vadd.xlane.f32.xlu0 %v1536_v49  ;;  %v1494_v32 = vsel %vm536_vm0, %v3743_v36, 0.0  ;;  %v1671_v42 = vsel %vm536_vm0, %v3862_v28, 0.0 }
 0x28f   : > { %v3775_v49 = vunpack.c.h.bf16 %v5544_v16  ;;  %v1632_v36 = vsel %vm536_vm0, %v3835_v62, 0.0  ;;  %v3996_v16 = vld [vmem:[%s4429_s30 + $0x1f0] sm:$0xff]  }
 0x290   : > { %v1610_v11 = vpop.xlane.xlu2 %1609 }
 0x291   : > { %v1790_v46 = vmul.f32 0.015625, %v1610_v11  ;;  %v1565_v2 = vpop.xlane.xlu1 %1564  ;;  %v1520_v37 = vpop.xlane.xlu0 %1519  ;;  %v3989_v11 = vld [vmem:[%s4429_s30 + $0x1b8] sm:$0xff]  }
 0x292   : > { %v1775_v47 = vmul.f32 0.015625, %v1565_v2  ;;  %v1760_v30 = vmul.f32 0.015625, %v1520_v37 }
 0x293   : > { %v2563_v21 = vperm.slane %v1790_v46, %v4456_v60 }
 0x294   : > { %v2534_v9 = vperm.slane %v1775_v47, %v4481_v25  ;;  %v2505_v48 = vperm.slane %v1760_v30, %v4486_v34 }
 0x295   : > { %v5565_v59 = vsel %vm1966_vm5, %v2563_v21, %v2562_v38  ;;  %1540 = vadd.xlane.f32.xlu2 %v1539_v33  ;;  %1495 = vadd.xlane.f32.xlu1 %v1494_v32  ;;  %v3838_v33 = vunpack.c.l.bf16 %v3989_v11  ;;  %v3866_v21 = vunpack.c.l.bf16 %v3996_v16 }
 0x296   : > { %v2535_v7 = vsel %vm1970_vm6, %v2534_v9, %v2533_v29  ;;  %v2506_v0 = vsel %vm1974_vm7, %v2505_v48, %v5513_v5  ;;  %1672 = vadd.xlane.f32.xlu0 %v1671_v42  ;;  %v3981_v5 = vld [vmem:[%s4429_s30 + $0x178] sm:$0xff]  }
 0x297   : > { %v3806_v12 = vunpack.c.l.bf16 %v3981_v5  ;;  %v3807_v32 = vunpack.c.h.bf16 %v3981_v5 }
 0x298   : > { %v1433_v43 = vpop.xlane.xlu2 %1432 }
 0x299   : > { %v1731_v20 = vmul.f32 0.015625, %v1433_v43  ;;  %v1388_v40 = vpop.xlane.xlu1 %1387  ;;  %v1655_v50 = vpop.xlane.xlu0 %1654  ;;  %v1590_v18 = vsel %vm536_vm0, %v3807_v32, 0.0  ;;  %v1677_v43 = vsel %vm536_vm0, %v3866_v21, 0.0 }
 0x29a   : > { %v1716_v57 = vmul.f32 0.015625, %v1388_v40  ;;  %v1805_v38 = vmul.f32 0.015625, %v1655_v50 }
 0x29b   : > { %v2449_v29 = vperm.slane %v1731_v20, %v4510_v39  ;;  %v3997_v20 = vld [vmem:[%s4429_s30 + $0x1f8] sm:$0xff]  }
 0x29c   : > { %v2420_v56 = vperm.slane %v1716_v57, %v4493_v61  ;;  %v2592_v45 = vperm.slane %v1805_v38, %v4453_v41 }
 0x29d   : > { %v5579_v31 = vsel %vm6070_vm11, %v2449_v29, %v2448_v27  ;;  %1675 = vadd.xlane.f32.xlu2 %v1674_v58  ;;  %1630 = vadd.xlane.f32.xlu1 %v1629_v44  ;;  %v3839_v58 = vunpack.c.h.bf16 %v3989_v11  ;;  %v3870_v44 = vunpack.c.l.bf16 %v3997_v20  ;;  %v3867_v29 = vunpack.c.h.bf16 %v3996_v16 }
 0x29e   : > { %v2421_v22 = vsel %vm6071_vm12, %v2420_v56, %v2419_v19  ;;  %v2593_v51 = vsel %vm6072_vm14, %v2592_v45, %v5531_v10  ;;  %1585 = vadd.xlane.f32.xlu0 %v1584_v17  ;;  %v1587_v19 = vsel %vm536_vm0, %v3806_v12, 0.0  ;;  %v1542_v10 = vsel %vm536_vm0, %v3775_v49, 0.0  ;;  %vm6079_vm12 = vmmov %vm6069_vm3 }
 0x29f   : > { %v1638_v12 = vsel %vm536_vm0, %v3839_v58, 0.0  ;;  %vm6078_vm11 = vcmask 982912  }
 0x2a0   : > { %v1568_v52 = vpop.xlane.xlu2 %1567 }
 0x2a1   : > { %v1776_v23 = vmul.f32 0.015625, %v1568_v52  ;;  %v1523_v41 = vpop.xlane.xlu1 %1522  ;;  %v1478_v24 = vpop.xlane.xlu0 %1477 }
 0x2a2   : > { %v1761_v27 = vmul.f32 0.015625, %v1523_v41  ;;  %v1746_v35 = vmul.f32 0.015625, %v1478_v24 }
 0x2a3   : > { %v2536_v28 = vperm.slane %v1776_v23, %v4486_v34 }
 0x2a4   : > { %v2507_v46 = vperm.slane %v1761_v27, %v4467_v15  ;;  %v2478_v2 = vperm.slane %v1746_v35, %v4500_v1  ;;  %v3871_v27 = vunpack.c.h.bf16 %v3997_v20 }
 0x2a5   : > { %v5594_v37 = vsel %vm1974_vm7, %v2536_v28, %v2535_v7  ;;  %1633 = vadd.xlane.f32.xlu2 %v1632_v36  ;;  %1588 = vadd.xlane.f32.xlu1 %v1587_v19  ;;  %v1635_v7 = vsel %vm536_vm0, %v3838_v33, 0.0 }
 0x2a6   : > { %v2508_v47 = vsel %vm1978_vm8, %v2507_v46, %v2506_v0  ;;  %v2479_v30 = vsel %vm1982_vm9, %v2478_v2, %v5550_v8  ;;  %1543 = vadd.xlane.f32.xlu0 %v1542_v10  ;;  %v1686_v2 = vsel %vm536_vm0, %v3871_v27, 0.0 }
 0x2a8   : > { %v1391_v42 = vpop.xlane.xlu2 %1390 }
 0x2a9   : > { %v1717_v63 = vmul.f32 0.015625, %v1391_v42  ;;  %v1658_v9 = vpop.xlane.xlu1 %1657  ;;  %v1613_v48 = vpop.xlane.xlu0 %1612 }
 0x2aa   : > { %v1806_v6 = vmul.f32 0.015625, %v1658_v9  ;;  %v1791_v4 = vmul.f32 0.015625, %v1613_v48 }
 0x2ab   : > { %v2422_v0 = vperm.slane %v1717_v63, %v4535_v54 }
 0x2ac   : > { %v2594_v8 = vperm.slane %v1806_v6, %v4456_v60  ;;  %v2565_v40 = vperm.slane %v1791_v4, %v4481_v25 }
 0x2ad   : > { %v2423_v50 = vsel %vm6073_vm1, %v2422_v0, %v2421_v22  ;;  %1636 = vadd.xlane.f32.xlu2 %v1635_v7  ;;  %1591 = vadd.xlane.f32.xlu1 %v1590_v18  ;;  %v1683_v22 = vsel %vm536_vm0, %v3870_v44, 0.0 }
 0x2ae   : > { %v2595_v57 = vsel %vm1966_vm5, %v2594_v8, %v2593_v51  ;;  %v2566_v38 = vsel %vm1970_vm6, %v2565_v40, %v5565_v59  ;;  %1678 = vadd.xlane.f32.xlu0 %v1677_v43  ;;  %v1680_v51 = vsel %vm536_vm0, %v3867_v29, 0.0  ;;  %vm6074_vm5 = vmmov %vm6069_vm3 }
 0x2af   : > { %vm6076_vm0 = vmmov %vm6075_vm2 }
 0x2b0   : > { %v1526_v17 = vpop.xlane.xlu2 %1525  ;;  %vm6080_vm14 = vmmov %vm6076_vm0 }
 0x2b1   : > { %v1762_v5 = vmul.f32 0.015625, %v1526_v17  ;;  %v1481_v56 = vpop.xlane.xlu1 %1480  ;;  %v1436_v45 = vpop.xlane.xlu0 %1435 }
 0x2b2   : > { %v1747_v60 = vmul.f32 0.015625, %v1481_v56  ;;  %v1732_v62 = vmul.f32 0.015625, %v1436_v45 }
 0x2b3   : > { %v2509_v49 = vperm.slane %v1762_v5, %v4500_v1 }
 0x2b4   : > { %v2480_v59 = vperm.slane %v1747_v60, %v4510_v39  ;;  %v2451_v52 = vperm.slane %v1732_v62, %v4493_v61 }
 0x2b5   : > { %v2510_v23 = vsel %vm1982_vm9, %v2509_v49, %v2508_v47  ;;  %1639 = vadd.xlane.f32.xlu1 %v1638_v12  ;;  %1684 = vadd.xlane.f32.xlu2 %v1683_v22 }
 0x2b6   : > { %v2481_v41 = vsel %vm6074_vm5, %v2480_v59, %v2479_v30  ;;  %v2452_v24 = vsel %vm6075_vm2, %v2451_v52, %v5579_v31  ;;  %1681 = vadd.xlane.f32.xlu0 %v1680_v51  ;;  %vm6083_vm5 = vcmask 1042434  }
 0x2b8   : > { %v1661_v35 = vpop.xlane.xlu2 %1660 }
 0x2b9   : > { %v1807_v36 = vmul.f32 0.015625, %v1661_v35  ;;  %v1616_v19 = vpop.xlane.xlu1 %1615  ;;  %v1571_v28 = vpop.xlane.xlu0 %1570 }
 0x2ba   : > { %v1792_v10 = vmul.f32 0.015625, %v1616_v19  ;;  %v1777_v11 = vmul.f32 0.015625, %v1571_v28 }
 0x2bb   : > { %v2596_v46 = vperm.slane %v1807_v36, %v4481_v25 }
 0x2bc   : > { %v2567_v16 = vperm.slane %v1792_v10, %v4486_v34  ;;  %v2538_v47 = vperm.slane %v1777_v11, %v4467_v15 }
 0x2bd   : > { %v2597_v30 = vsel %vm1970_vm6, %v2596_v46, %v2595_v57  ;;  %vm6077_vm6 = vmmov %vm6073_vm1 }
 0x2be   : > { %v2568_v31 = vsel %vm1974_vm7, %v2567_v16, %v2566_v38  ;;  %v2539_v33 = vsel %vm1978_vm8, %v2538_v47, %v5594_v37  ;;  %1687 = vadd.xlane.f32.xlu0 %v1686_v2 }
 0x2c0   : > { %v1484_v32 = vpop.xlane.xlu2 %1483 }
 0x2c1   : > { %v1748_v21 = vmul.f32 0.015625, %v1484_v32  ;;  %v1439_v42 = vpop.xlane.xlu1 %1438  ;;  %v1394_v63 = vpop.xlane.xlu0 %1393 }
 0x2c2   : > { %v1733_v9 = vmul.f32 0.015625, %v1439_v42  ;;  %v1718_v25 = vmul.f32 0.015625, %v1394_v63 }
 0x2c3   : > { %v2482_v48 = vperm.slane %v1748_v21, %v4493_v61 }
 0x2c4   : > { %v2453_v6 = vperm.slane %v1733_v9, %v4535_v54  ;;  %v2424_v4 = vperm.slane %v1718_v25, %v4532_v14 }
 0x2c5   : > { %v2483_v7 = vsel %vm6076_vm0, %v2482_v48, %v2481_v41  ;;  %vm6085_vm0 = vcmask 1043459  }
 0x2c6   : > { %v2454_v18 = vsel %vm6077_vm6, %v2453_v6, %v2452_v24  ;;  %v2425_v0 = vsel %vm1998_vm13, %v2424_v4, %v2423_v50  ;;  %vm6086_vm6 = vmmov %vm6073_vm1 }
 0x2c8   : > { %v1619_v37 = vpop.xlane.xlu2 %1618 }
 0x2c9   : > { %v1793_v43 = vmul.f32 0.015625, %v1619_v37  ;;  %v1574_v20 = vpop.xlane.xlu1 %1573  ;;  %v1529_v8 = vpop.xlane.xlu0 %1528 }
 0x2ca   : > { %v1778_v40 = vmul.f32 0.015625, %v1574_v20  ;;  %v1763_v57 = vmul.f32 0.015625, %v1529_v8 }
 0x2cb   : > { %v2569_v38 = vperm.slane %v1793_v43, %v4467_v15 }
 0x2cc   : > { %v2540_v58 = vperm.slane %v1778_v40, %v4500_v1  ;;  %v2511_v44 = vperm.slane %v1763_v57, %v4510_v39  ;;  %v3238_v57 = vld [vmem:[%s5923_s2 + $0xf0] sm:$0xf] }
 0x2cd   : > { %v2570_v29 = vsel %vm1978_vm8, %v2569_v38, %v2568_v31  ;;  %v3343_v38 = vld [vmem:[%s5923_s2 + $0xf4] sm:$0xf0] }
 0x2ce   : > { %v2541_v17 = vsel %vm1982_vm9, %v2540_v58, %v2539_v33  ;;  %v2512_v5 = vsel %vm6069_vm3, %v2511_v44, %v2510_v23  ;;  %v3342_v58 = vld [vmem:[%s5923_s2 + $0xf4] sm:$0xf] }
 0x2d0   : > { %v1442_v56 = vpop.xlane.xlu2 %1441 }
 0x2d1   : > { %v1734_v50 = vmul.f32 0.015625, %v1442_v56  ;;  %v1397_v45 = vpop.xlane.xlu1 %1396  ;;  %v1664_v60 = vpop.xlane.xlu0 %1663  ;;  %v3240_v56 = vld [vmem:[%s5923_s2 + $0xf8] sm:$0xf0] }
 0x2d2   : > { %v1719_v62 = vmul.f32 0.015625, %v1397_v45  ;;  %v1808_v12 = vmul.f32 0.015625, %v1664_v60  ;;  %v3243_v45 = vor.u32 %v3342_v58, %v3240_v56  ;;  %v3332_v56 = vld [vmem:[%s5923_s2 + $0xa4] sm:$0xf] }
 0x2d3   : > { %v2455_v22 = vperm.slane %v1734_v50, %v4532_v14 }
 0x2d4   : > { %v2426_v49 = vperm.slane %v1719_v62, %v4521_v53  ;;  %v2598_v51 = vperm.slane %v1808_v12, %v4486_v34  ;;  %2863 = vmatpush.bf16.msra.mxu3 %v3243_v45  ;;  %v3230_v62 = vld [vmem:[%s5923_s2 + $0xe0] sm:$0xf]  ;;  %v3341_v12 = vld [vmem:[%s5923_s2 + $0xe4] sm:$0xf0] }
 0x2d5   : > { %v2456_v59 = vsel %vm1998_vm13, %v2455_v22, %v2454_v18  ;;  %v3340_v22 = vld [vmem:[%s5923_s2 + $0xe4] sm:$0xf] }
 0x2d6   : > { %v2427_v52 = vsel %vm6078_vm11, %v2426_v49, %v2425_v0  ;;  %v2599_v41 = vsel %vm1974_vm7, %v2598_v51, %v2597_v30  ;;  %vm6081_vm7 = vcmask 1041409   ;;  %v3231_v51 = vor.u32 %v3341_v12, %v3230_v62 }
 0x2d8   : > { %v1577_v24 = vpop.xlane.xlu2 %1576 }
 0x2d9   : > { %v1779_v23 = vmul.f32 0.015625, %v1577_v24  ;;  %v1532_v27 = vpop.xlane.xlu1 %1531  ;;  %v1487_v35 = vpop.xlane.xlu0 %1486 }
 0x2da   : > { %v1764_v36 = vmul.f32 0.015625, %v1532_v27  ;;  %v1749_v19 = vmul.f32 0.015625, %v1487_v35  ;;  %v3222_v35 = vld [vmem:[%s5923_s2 + $0xd0] sm:$0xf] }
 0x2db   : > { %v2542_v28 = vperm.slane %v1779_v23, %v4510_v39 }
 0x2dc   : > { %v2513_v10 = vperm.slane %v1764_v36, %v4493_v61  ;;  %v2484_v11 = vperm.slane %v1749_v19, %v4535_v54  ;;  %v3338_v36 = vld [vmem:[%s5923_s2 + $0xd4] sm:$0xf] }
 0x2dd   : > { %v5650_v34 = vsel %vm6079_vm12, %v2542_v28, %v2541_v17 }
 0x2de   : > { %v5653_v46 = vsel %vm6080_vm14, %v2513_v10, %v2512_v5  ;;  %v5656_v2 = vsel %vm6073_vm1, %v2484_v11, %v2483_v7  ;;  %v3239_v5 = vor.u32 %v3343_v38, %v3238_v57  ;;  %v3224_v11 = vld [vmem:[%s5923_s2 + $0xd8] sm:$0xf0] }
 0x2e0   : > { %v1352_v16 = vpop.xlane.xlu2 %1351  ;;  %2837 = vmatpush.bf16.msra.mxu1 %v3239_v5  ;;  %v3333_v5 = vld [vmem:[%s5923_s2 + $0xa4] sm:$0xf0] }
 0x2e1   : > { %v1704_v47 = vmul.f32 0.015625, %v1352_v16  ;;  %v1667_v30 = vpop.xlane.xlu1 %1666  ;;  %v1622_v31 = vpop.xlane.xlu0 %1621  ;;  %v3227_v16 = vor.u32 %v3338_v36, %v3224_v11  ;;  %v3182_v11 = vld [vmem:[%s5923_s2 + $0x80] sm:$0xf] }
 0x2e2   : > { %v1809_v33 = vmul.f32 0.015625, %v1667_v30  ;;  %v1794_v32 = vmul.f32 0.015625, %v1622_v31  ;;  %v3214_v30 = vld [vmem:[%s5923_s2 + $0xc0] sm:$0xf]  ;;  %v3337_v31 = vld [vmem:[%s5923_s2 + $0xc4] sm:$0xf0] }
 0x2e3   : > { %v2397_v21 = vperm.slane %v1704_v47, %v4550_v13 }
 0x2e4   : > { %v2600_v42 = vperm.slane %v1809_v33, %v4467_v15  ;;  %v2571_v63 = vperm.slane %v1794_v32, %v4500_v1  ;;  %2838 = vmatpush.bf16.msra.mxu1 %v3231_v51  ;;  %v3336_v33 = vld [vmem:[%s5923_s2 + $0xc4] sm:$0xf]  ;;  %v3331_v51 = vld [vmem:[%s5923_s2 + $0x94] sm:$0xf0] }
 0x2e5   : > { %v2398_v9 = vsel %vm2006_vm15, %v2397_v21, %v5276_v3  ;;  %v3215_v21 = vor.u32 %v3337_v31, %v3214_v30 }
 0x2e6   : > { %v5664_v25 = vsel %vm1978_vm8, %v2600_v42, %v2599_v41  ;;  %v5667_v48 = vsel %vm1982_vm9, %v2571_v63, %v2570_v29  ;;  %vm6082_vm8 = vmmov %vm6078_vm11  ;;  %v3216_v42 = vld [vmem:[%s5923_s2 + $0xc8] sm:$0xf0] }
 0x2e7   : > { %v3219_v63 = vor.u32 %v3336_v33, %v3216_v42  ;;  %vm6084_vm2 = vmmov %vm6082_vm8 }
 0x2e8   : > { %v1490_v6 = vpop.xlane.xlu2 %1489  ;;  %vm6087_vm3 = vmmov %vm6084_vm2 }
 0x2e9   : > { %v1445_v4 = vpop.xlane.xlu1 %1444  ;;  %v1400_v7 = vpop.xlane.xlu0 %1399  ;;  %v1750_v47 = vmul.f32 0.015625, %v1490_v6  ;;  %vm6089_vm11 = vmmov %vm6073_vm1 }
 0x2ea   : > { %v1720_v18 = vmul.f32 0.015625, %v1400_v7  ;;  %v1735_v8 = vmul.f32 0.015625, %v1445_v4  ;;  %v3206_v4 = vld [vmem:[%s5923_s2 + $0xb0] sm:$0xf]  ;;  %v3335_v7 = vld [vmem:[%s5923_s2 + $0xb4] sm:$0xf0]  ;;  %vm6090_vm12 = vmmov %vm6084_vm2 }
 0x2ec   : > { %v2428_v0 = vperm.slane %v1720_v18, %v4550_v13  ;;  %v2457_v44 = vperm.slane %v1735_v8, %v4521_v53  ;;  %v3334_v18 = vld [vmem:[%s5923_s2 + $0xb4] sm:$0xf]  ;;  %v3207_v8 = vor.u32 %v3335_v7, %v3206_v4  ;;  %v3351_v7 = vld [vmem:[%s5925_s4 + $0x38] sm:$0xff] }
 0x2ed   : > { %3012 = vmatpush.bf16.msrb.mxu0 %v3351_v7 }
 0x2ee   : > { %v2429_v37 = vsel %vm2006_vm15, %v2428_v0, %v2427_v52  ;;  %v2458_v49 = vsel %vm6082_vm8, %v2457_v44, %v2456_v59  ;;  %v3232_v52 = vld [vmem:[%s5923_s2 + $0xe8] sm:$0xf0]  ;;  %v3339_v59 = vld [vmem:[%s5923_s2 + $0xd4] sm:$0xf0] }
 0x2ef   : > { %v2616_v15 = vsel %vm6081_vm7, %v2429_v37, %v2398_v9  ;;  %v3235_v24 = vor.u32 %v3340_v22, %v3232_v52  ;;  %v3223_v10 = vor.u32 %v3339_v59, %v3222_v35  ;;  %v2486_v9 = vperm.slane %v1750_v47, %v4532_v14  ;;  %v3330_v52 = vld [vmem:[%s5923_s2 + $0x94] sm:$0xf]  ;;  %v3328_v47 = vld [vmem:[%s5923_s2 + $0x84] sm:$0xf]  ;;  %vm6093_vm7 = vmmov %vm6084_vm2 }
 0x2f0   : > { %v5672_v43 = vpop.xlane.xlu2 %1624 }
 0x2f1   : > { %v5674_v20 = vpop.xlane.xlu1 %1579  ;;  %v5676_v3 = vpop.xlane.xlu0 %1534  ;;  %2864 = vmatpush.bf16.msra.mxu3 %v3235_v24  ;;  %2839 = vmatpush.bf16.msra.mxu1 %v3223_v10  ;;  %v2487_v58 = vsel %vm1998_vm13, %v2486_v9, %v5656_v2  ;;  %v3200_v2 = vld [vmem:[%s5923_s2 + $0xa8] sm:$0xf0] }
 0x2f2   : > { %v3203_v62 = vor.u32 %v3332_v56, %v3200_v2  ;;  %v1765_v36 = vmul.f32 0.015625, %v5676_v3  ;;  %v3184_v3 = vld [vmem:[%s5923_s2 + $0x88] sm:$0xf0]  ;;  %v1780_v4 = vmul.f32 0.015625, %v5674_v20  ;;  %v3350_v20 = vld [vmem:[%s5925_s4 + $0x30] sm:$0xff] }
 0x2f3   : > { %3013 = vmatpush.bf16.msrb.mxu0 %v3350_v20  ;;  %v3357_v2 = vld [vmem:[%s5925_s4 + $0x68] sm:$0xff] }
 0x2f4   : > { %v2515_v33 = vperm.slane %v1765_v36, %v4535_v54 }
 0x2f5   : > { %2865 = vmatpush.bf16.msra.mxu3 %v3227_v16  ;;  %2840 = vmatpush.bf16.msra.mxu1 %v3215_v21  ;;  %v3329_v16 = vld [vmem:[%s5923_s2 + $0x84] sm:$0xf0] }
 0x2f6   : > { %v3183_v31 = vor.u32 %v3329_v16, %v3182_v11 }
 0x2f8   : > { %v1493_v40 = vpop.xlane.xlu2 %1492 }
 0x2f9   : > { %v1448_v29 = vpop.xlane.xlu1 %1447  ;;  %v5688_v17 = vpop.xlane.xlu0 %1669  ;;  %v1751_v32 = vmul.f32 0.015625, %v1493_v40  ;;  %2866 = vmatpush.bf16.msra.mxu3 %v3219_v63  ;;  %v3208_v40 = vld [vmem:[%s5923_s2 + $0xb8] sm:$0xf0]  ;;  %2841 = vmatpush.bf16.msra.mxu1 %v3207_v8 }
 0x2fa   : > { %v1736_v50 = vmul.f32 0.015625, %v1448_v29  ;;  %v3211_v38 = vor.u32 %v3334_v18, %v3208_v40  ;;  %v3198_v29 = vld [vmem:[%s5923_s2 + $0xa0] sm:$0xf]  ;;  %v3359_v18 = vld [vmem:[%s5925_s4 + $0x78] sm:$0xff]  ;;  %v1810_v16 = vmul.f32 0.015625, %v5688_v17 }
 0x2fb   : > { %v2488_v0 = vperm.slane %v1751_v32, %v4521_v53  ;;  %v3199_v45 = vor.u32 %v3333_v5, %v3198_v29  ;;  %v3355_v17 = vld [vmem:[%s5925_s4 + $0x58] sm:$0xff] }
 0x2fc   : > { %v2459_v60 = vperm.slane %v1736_v50, %v4550_v13 }
 0x2fd   : > { %2867 = vmatpush.bf16.msra.mxu3 %v3211_v38  ;;  %v2489_v50 = vsel %vm6084_vm2, %v2488_v0, %v2487_v58  ;;  %2842 = vmatpush.bf16.msra.mxu1 %v3199_v45  ;;  %v2516_v0 = vsel %vm6086_vm6, %v2515_v33, %v5653_v46  ;;  %v3358_v38 = vld [vmem:[%s5925_s4 + $0x70] sm:$0xff]  ;;  %v3349_v45 = vld [vmem:[%s5925_s4 + $0x28] sm:$0xff]  ;;  %vm6099_vm6 = vcmask 1047559  }
 0x2fe   : > { %v2460_v41 = vsel %vm2006_vm15, %v2459_v60, %v2458_v49  ;;  %v3190_v49 = vld [vmem:[%s5923_s2 + $0x90] sm:$0xf]  ;;  %3014 = vmatpush.bf16.msrb.mxu0 %v3349_v45 }
 0x2ff   : > { %v2617_v23 = vsel %vm6083_vm5, %v2460_v41, %v2616_v15  ;;  %v3191_v35 = vor.u32 %v3331_v51, %v3190_v49  ;;  %vm6095_vm5 = vcmask 1046534  }
 0x300   : > { %v5709_v27 = vpop.xlane.xlu2 %1627 }
 0x301   : > { %v5720_v19 = vpop.xlane.xlu1 %1582  ;;  %v1538_v28 = vpop.xlane.xlu0 %1537  ;;  %2868 = vmatpush.bf16.msra.mxu3 %v3203_v62  ;;  %2843 = vmatpush.bf16.msra.mxu1 %v3191_v35 }
 0x302   : > { %v1766_v10 = vmul.f32 0.015625, %v1538_v28  ;;  %v3187_v28 = vor.u32 %v3328_v47, %v3184_v3 }
 0x304   : > { %v2517_v32 = vperm.slane %v1766_v10, %v4532_v14 }
 0x305   : > { %2844 = vmatpush.bf16.msra.mxu1 %v3183_v31 }
 0x306   : > { %v2518_v8 = vsel %vm1998_vm13, %v2517_v32, %v2516_v0 }
 0x308   : > { %v1541_v6 = vpop.xlane.xlu2 %1540 }
 0x309   : > { %v1496_v37 = vpop.xlane.xlu1 %1495  ;;  %v5748_v15 = vpop.xlane.xlu0 %1672  ;;  %v1767_v30 = vmul.f32 0.015625, %v1541_v6  ;;  %3025 = vmatpush.bf16.msrb.mxu1 %v3359_v18 }
 0x30a   : > { %v1752_v57 = vmul.f32 0.015625, %v1496_v37  ;;  %v1781_v37 = vmul.f32 0.015625, %v5720_v19  ;;  %v2544_v19 = vperm.slane %v1780_v4, %v4493_v61  ;;  %v1811_v31 = vmul.f32 0.015625, %v5748_v15 }
 0x30b   : > { %v2519_v42 = vperm.slane %v1767_v30, %v4521_v53  ;;  %v2602_v4 = vperm.slane %v1810_v16, %v4500_v1  ;;  %v3346_v1 = vld [vmem:[%s5925_s4 + $0x10] sm:$0xff] }
 0x30c   : > { %v2490_v44 = vperm.slane %v1752_v57, %v4550_v13  ;;  %v2546_v29 = vperm.slane %v1781_v37, %v4535_v54  ;;  %v2604_v37 = vperm.slane %v1811_v31, %v4510_v39 }
 0x30d   : > { %v2520_v58 = vsel %vm6087_vm3, %v2519_v42, %v2518_v8  ;;  %3026 = vmatpush.bf16.msrb.mxu1 %v3358_v38 }
 0x30e   : > { %v2491_v60 = vsel %vm2006_vm15, %v2490_v44, %v2489_v50 }
 0x30f   : > { %v2618_v12 = vsel %vm6085_vm0, %v2491_v60, %v2617_v23  ;;  %v3192_v23 = vld [vmem:[%s5923_s2 + $0x98] sm:$0xf0]  ;;  %v1795_v60 = vmul.f32 0.015625, %v5672_v43  ;;  %v3348_v43 = vld [vmem:[%s5925_s4 + $0x20] sm:$0xff]  ;;  %vm6097_vm0 = vmmov %vm6073_vm1 }
 0x310   : > { %v5771_v22 = vpop.xlane.xlu2 %1675  ;;  %v3195_v59 = vor.u32 %v3330_v52, %v3192_v23  ;;  %v1796_v52 = vmul.f32 0.015625, %v5709_v27  ;;  %3015 = vmatpush.bf16.msrb.mxu0 %v3348_v43 }
 0x311   : > { %v1631_v41 = vpop.xlane.xlu1 %1630  ;;  %v1586_v24 = vpop.xlane.xlu0 %1585  ;;  %3027 = vmatpush.bf16.msrb.mxu1 %v3357_v2  ;;  %v2573_v27 = vperm.slane %v1795_v60, %v4510_v39  ;;  %v1812_v33 = vmul.f32 0.015625, %v5771_v22  ;;  %v2603_v39 = vsel %vm1982_vm9, %v2602_v4, %v5664_v25  ;;  %vm6098_vm9 = vmmov %vm6087_vm3 }
 0x312   : > { %2869 = vmatpush.bf16.msra.mxu3 %v3195_v59  ;;  %v1782_v40 = vmul.f32 0.015625, %v1586_v24  ;;  %v1797_v23 = vmul.f32 0.015625, %v1631_v41  ;;  %v2575_v47 = vperm.slane %v1796_v52, %v4493_v61  ;;  %v2658_v52 = vld [vmem:[%s5924_s3] sm:$0x3] }
 0x314   : > { %v2548_v56 = vperm.slane %v1782_v40, %v4532_v14  ;;  %v2577_v3 = vperm.slane %v1797_v23, %v4535_v54  ;;  %v2606_v40 = vperm.slane %v1812_v33, %v4493_v61 }
 0x316   : > { %2870 = vmatpush.bf16.msra.mxu3 %v3187_v28 }
 0x318   : > { %v1634_v21 = vpop.xlane.xlu2 %1633 }
 0x319   : > { %v1589_v63 = vpop.xlane.xlu1 %1588  ;;  %v1544_v9 = vpop.xlane.xlu0 %1543  ;;  %v1798_v36 = vmul.f32 0.015625, %v1634_v21  ;;  %v3347_v21 = vld [vmem:[%s5925_s4 + $0x18] sm:$0xff] }
 0x31a   : > { %v1768_v6 = vmul.f32 0.015625, %v1544_v9  ;;  %v1783_v46 = vmul.f32 0.015625, %v1589_v63  ;;  %3016 = vmatpush.bf16.msrb.mxu0 %v3347_v21 }
 0x31b   : > { %v2579_v32 = vperm.slane %v1798_v36, %v4532_v14 }
 0x31c   : > { %v2521_v57 = vperm.slane %v1768_v6, %v4550_v13  ;;  %v2550_v62 = vperm.slane %v1783_v46, %v4521_v53 }
 0x31e   : > { %v2522_v44 = vsel %vm2006_vm15, %v2521_v57, %v2520_v58  ;;  %3017 = vmatpush.bf16.msrb.mxu0 %v3346_v1 }
 0x31f   : > { %v2619_v5 = vsel %vm2231_vm10, %v2522_v44, %v2618_v12  ;;  %vm6088_vm10 = vmmov %vm6080_vm14  ;;  %vm6091_vm14 = vcmask 720512  }
 0x320   : > { %v1637_v50 = vpop.xlane.xlu2 %1636  ;;  %v2545_v12 = vsel %vm6088_vm10, %v2544_v19, %v5650_v34  ;;  %v3356_v34 = vld [vmem:[%s5925_s4 + $0x60] sm:$0xff]  ;;  %v2574_v15 = vsel %vm6091_vm14, %v2573_v27, %v5667_v48  ;;  %vm6094_vm8 = vmmov %vm6091_vm14 }
 0x321   : > { %v1592_v49 = vpop.xlane.xlu1 %1591  ;;  %v1679_v51 = vpop.xlane.xlu0 %1678  ;;  %v2547_v35 = vsel %vm6089_vm11, %v2546_v29, %v2545_v12  ;;  %v1799_v41 = vmul.f32 0.015625, %v1637_v50  ;;  %3028 = vmatpush.bf16.msrb.mxu1 %v3356_v34  ;;  %v2605_v19 = vsel %vm6094_vm8, %v2604_v37, %v2603_v39  ;;  %v3352_v12 = vld [vmem:[%s5925_s4 + $0x40] sm:$0xff] }
 0x322   : > { %v1784_v24 = vmul.f32 0.015625, %v1592_v49  ;;  %v2549_v59 = vsel %vm1998_vm13, %v2548_v56, %v2547_v35  ;;  %v1813_v63 = vmul.f32 0.015625, %v1679_v51  ;;  %v3345_v49 = vld [vmem:[%s5925_s4 + $0x8] sm:$0xff] }
 0x323   : > { %v2551_v11 = vsel %vm6090_vm12, %v2550_v62, %v2549_v59  ;;  %v2581_v42 = vperm.slane %v1799_v41, %v4521_v53  ;;  %3018 = vmatpush.bf16.msrb.mxu0 %v3345_v49  ;;  %v3353_v51 = vld [vmem:[%s5925_s4 + $0x48] sm:$0xff]  ;;  %v2661_v59 = vperm.slane %v2658_v52, 1 }
 0x324   : > { %v2552_v10 = vperm.slane %v1784_v24, %v4550_v13  ;;  %v2608_v38 = vperm.slane %v1813_v63, %v4535_v54  ;;  %v2660_v24 = vperm.slane %v2658_v52, 0 }
 0x325   : > { %3029 = vmatpush.bf16.msrb.mxu1 %v3355_v17  ;;  %v2860_v43 = vadd.f32 %v5458_v26, %v2661_v59 }
 0x326   : > { %v2553_v30 = vsel %vm2006_vm15, %v2552_v10, %v2551_v11  ;;  %v2834_v35 = vadd.f32 %v5440_v55, %v2660_v24  ;;  %v4006_v55 = vld [vmem:[%s5926_s5] ss:$0 sm:$0xff] }
 0x327   : > { %v2620_v28 = vsel %vm2233_vm4, %v2553_v30, %v2619_v5  ;;  %vm6092_vm4 = vmmov %vm6088_vm10 }
 0x328   : > { %v2576_v6 = vsel %vm6092_vm4, %v2575_v47, %v2574_v15  ;;  %v1685_v0 = vpop.xlane.xlu2 %1684  ;;  %vm6096_vm2 = vmmov %vm6092_vm4 }
 0x329   : > { %v1640_v9 = vpop.xlane.xlu1 %1639  ;;  %v1682_v22 = vpop.xlane.xlu0 %1681  ;;  %v2578_v8 = vsel %vm6073_vm1, %v2577_v3, %v2576_v6  ;;  %v1815_v58 = vmul.f32 0.015625, %v1685_v0  ;;  %v2607_v29 = vsel %vm6096_vm2, %v2606_v40, %v2605_v19 }
 0x32a   : > { %v1800_v7 = vmul.f32 0.015625, %v1640_v9  ;;  %v1814_v18 = vmul.f32 0.015625, %v1682_v22  ;;  %v2580_v48 = vsel %vm1998_vm13, %v2579_v32, %v2578_v8  ;;  %v2609_v5 = vsel %vm6097_vm0, %v2608_v38, %v2607_v29 }
 0x32b   : > { %v2582_v20 = vsel %vm6093_vm7, %v2581_v42, %v2580_v48  ;;  %v2612_v56 = vperm.slane %v1815_v58, %v4521_v53  ;;  %v3354_v53 = vld [vmem:[%s5925_s4 + $0x50] sm:$0xff] }
 0x32c   : > { %v2583_v57 = vperm.slane %v1800_v7, %v4550_v13  ;;  %v2610_v61 = vperm.slane %v1814_v18, %v4532_v14  ;;  %3030 = vmatpush.bf16.msrb.mxu1 %v3354_v53 }
 0x32e   : > { %v2584_v46 = vsel %vm2006_vm15, %v2583_v57, %v2582_v20  ;;  %v2611_v50 = vsel %vm1998_vm13, %v2610_v61, %v2609_v5 }
 0x32f   : > { %v2621_v44 = vsel %vm6095_vm5, %v2584_v46, %v2620_v28  ;;  %v2613_v14 = vsel %vm6098_vm9, %v2612_v56, %v2611_v50 }
 0x330   : > { %3031 = vmatpush.bf16.msrb.mxu1 %v3353_v51 }
 0x331   : > { %v1688_v54 = vpop.xlane.xlu0 %1687 }
 0x332   : > { %v1816_v45 = vmul.f32 0.015625, %v1688_v54 }
 0x334   : > { %v2614_v25 = vperm.slane %v1816_v45, %v4550_v13  ;;  %v3344_v13 = vld [vmem:[%s5925_s4] sm:$0xff]  ;;  %3032 = vmatpush.bf16.msrb.mxu1 %v3352_v12 }
 0x335   : > { %3019 = vmatpush.bf16.msrb.mxu0 %v3344_v13 }
 0x336   : > { %v2615_v2 = vsel %vm2006_vm15, %v2614_v25, %v2613_v14 }
 0x337   : > { %v2622_v60 = vsel %vm6099_vm6, %v2615_v2, %v2621_v44 }
 0x338   : > { %v2625_v62 = vpack.c.bf16 %v2622_v60, %v2622_v60 }
 0x33a   : > { %2845 = vmatmul.bf16.vlgmr.msra.gmra.mxu1 %v2625_v62  ;;  %2871 = vmatmul.bf16.vlgmr.msra.gmra.mxu3 %v2625_v62 }
 0x3b7   : > { %v2846_v23 = vpop.f32.mrf.mxu1 }
 0x3b8   : > { %v2847_v36 = vadd.f32 %v2846_v23, %v2834_v35 }
 0x3ba   : > { %v2876_v10 = vmax.f32 %v2847_v36, 0.0 }
 0x3bc   : > { %v2878_v34 = vpack.c.bf16 %v2876_v10, %v2876_v10 }
 0x3bd   : > { %v2872_v27 = vpop.f32.mrf.mxu3 }
 0x3be   : > { %v2873_v11 = vadd.f32 %v2872_v27, %v2860_v43  ;;  %3020 = vmatmul.bf16.vlgmr.msrb.gmra.mxu0 %v2878_v34 }
 0x3bf   : > { %v2848_v41 = vpop.f32.mrf.mxu1 }
 0x3c0   : > { %v2877_v16 = vmax.f32 %v2873_v11, 0.0 }
 0x3c2   : > { %v2879_v47 = vpack.c.bf16 %v2877_v16, %v2877_v16 }
 0x3c4   : > { %3033 = vmatmul.bf16.vlgmr.msrb.gmra.mxu1 %v2879_v47 }
 0x3c5   : > { %v2874_v30 = vpop.f32.mrf.mxu3 }
 0x43b   : > { %v3021_v31 = vpop.f32.mrf.mxu0 }
 0x43c   : > { %v3022_v3 = vadd.f32 %v4006_v55, %v3021_v31 }
 0x441   : > { %v3034_v26 = vpop.f32.mrf.mxu1 }
 0x442   : > { %v3035_v28 = vadd.f32 %v3034_v26, %v3022_v3 }
 0x443   : > { %v3023_v33 = vpop.f32.mrf.mxu0 }
 0x444   : > { %3038 = vst [vmem:[%s279_s24] sm:$0xff] %v3035_v28 }
 0x449   : > { %v3036_v32 = vpop.f32.mrf.mxu1 }
 0x44a PF: > { %s16_s21 = sadd.s32 1, %s4014_s21  }
 0x44b   : > { %p13_p5 = scmp.ge.s32.totalorder %s16_s21, 4  }
 0x44d   :  { %15 = sbr.rel (!%p13_p5) target bundleno = 1 (0x1), region = 77 }

</bundles_post_ra>
